<compile_context>
chip_gen: v7x
topology: tpu7x:2x2x1
jax: 0.10.0
libtpu: 0.0.40
codegen_flags: <defaults>
</compile_context>

<pallas_src>
import functools

import jax
import jax.numpy as jnp
from jax import lax
from jax.experimental import pallas as pl
from jax.experimental.pallas import tpu as pltpu

GN_GROUPS = 32
GN_EPS = 1e-5


def _round_up(x, m):
    return (x + m - 1) // m * m


def _interp_matrix(n_in, n_out):
    # Bilinear x2 upsample weights with align_corners=True semantics.
    if n_in == 1:
        return jnp.ones((n_out, 1), jnp.float32)
    pos = jnp.arange(n_out, dtype=jnp.float32) * (n_in - 1) / (n_out - 1)
    lo = jnp.clip(jnp.floor(pos).astype(jnp.int32), 0, n_in - 2)
    frac = pos - lo.astype(jnp.float32)
    rows = jnp.arange(n_out)
    a = jnp.zeros((n_out, n_in), jnp.float32)
    a = a.at[rows, lo].add(1.0 - frac)
    a = a.at[rows, lo + 1].add(frac)
    return a


# ------------------------------ Pallas kernel --------------------------------

def _block_kernel(x_ref, w_ref, p_ref, g_ref, b_ref, a_ref, o_ref, *, H, W, Cout):
    """Fused 3x3 conv + GroupNorm(32) + ReLU + (optional) bilinear x2 upsample.

    x_ref: (1, Lpad, Cin)   bf16  zero-padded image, rows flattened (width W+2)
    w_ref: (9, Cin, Cout)   bf16  conv taps
    p_ref: (Cout, Cout)     f32   group-mean operator (block-diag ones / count)
    g_ref, b_ref: (1, Cout) f32   GroupNorm affine params
    a_ref: (Lout, H*(W+2))  f32   output map (compaction [+ bilinear upsample])
    o_ref: (1, Lout, Cout)  f32
    """
    wp = W + 2
    lrow = H * wp

    # --- 3x3 conv: 9 shifted row-slab matmuls (bf16 in, f32 accumulate). ---
    # Row r = y*(W+2)+x of acc holds the conv output at pixel (y, x); the two
    # columns x in {W, W+1} of each row are "overrun" garbage, discarded later.
    acc = jnp.zeros((lrow, Cout), jnp.float32)
    for t in range(9):
        ky, kx = divmod(t, 3)
        s = ky * wp + kx
        acc = acc + jnp.dot(x_ref[0, pl.ds(s, lrow), :], w_ref[t],
                            preferred_element_type=jnp.float32)

    # --- GroupNorm(32, Cout): masked stats excluding the overrun columns. ---
    row = lax.broadcasted_iota(jnp.int32, (lrow, 1), 0)
    valid = ((row % wp) < W).astype(jnp.float32)            # (lrow, 1)
    masked = acc * valid
    ch_sum = jnp.sum(masked, axis=0, keepdims=True)         # (1, Cout) f32
    ch_sq = jnp.sum(masked * acc, axis=0, keepdims=True)    # (1, Cout) f32
    mean_c = jnp.dot(ch_sum, p_ref[...], preferred_element_type=jnp.float32)
    msq_c = jnp.dot(ch_sq, p_ref[...], preferred_element_type=jnp.float32)
    var_c = msq_c - mean_c * mean_c                         # biased (PyTorch GN)
    inv_c = lax.rsqrt(var_c + GN_EPS)

    y = jnp.maximum((acc - mean_c) * (inv_c * g_ref[...]) + b_ref[...], 0.0)

    # --- Fused epilogue: compact valid pixels (+ bilinear x2 upsample). ---
    o_ref[0] = jnp.dot(a_ref[...], y, preferred_element_type=jnp.float32)


# -------------------------------- wrappers -----------------------------------

def conv3x3_gn_relu(x, w, gamma, beta, upsample):
    """x: (N, H, W, Cin) f32; w: (3,3,Cin,Cout); -> (N, Ho, Wo, Cout) f32."""
    n, h, wdt, cin = x.shape
    cout = w.shape[-1]
    assert cout % GN_GROUPS == 0
    wp = wdt + 2
    lrow = h * wp
    lpad = _round_up((h + 2) * wp + 2, 8)   # + tail so every shifted slab is in-bounds

    # Zero-pad (conv pad=1), flatten rows, bf16 feed for the MXU.
    xp = jnp.pad(x, ((0, 0), (1, 1), (1, 1), (0, 0)))
    xf = xp.reshape(n, (h + 2) * wp, cin)
    xf = jnp.pad(xf, ((0, 0), (0, lpad - (h + 2) * wp), (0, 0))).astype(jnp.bfloat16)
    w9 = w.reshape(9, cin, cout).astype(jnp.bfloat16)

    # Group-mean operator: block-diagonal ones / (H*W*group_size).
    gs = cout // GN_GROUPS
    grp = jnp.arange(cout) // gs
    p_op = (grp[:, None] == grp[None, :]).astype(jnp.float32) / float(h * wdt * gs)

    # Output map over the padded-row layout: picks the H*W valid pixels and
    # (optionally) applies the separable bilinear x2 upsample as kron(Ah, Aw).
    if upsample:
        a_core = jnp.kron(_interp_matrix(h, 2 * h), _interp_matrix(wdt, 2 * wdt))
        ho, wo = 2 * h, 2 * wdt
    else:
        a_core = jnp.eye(h * wdt, dtype=jnp.float32)
        ho, wo = h, wdt
    lout = a_core.shape[0]
    col = (jnp.arange(h * wdt) // wdt) * wp + (jnp.arange(h * wdt) % wdt)
    a_out = jnp.zeros((lout, lrow), jnp.float32).at[:, col].set(a_core)

    kernel = functools.partial(_block_kernel, H=h, W=wdt, Cout=cout)
    out = pl.pallas_call(
        kernel,
        out_shape=jax.ShapeDtypeStruct((n, lout, cout), jnp.float32),
        grid_spec=pltpu.PrefetchScalarGridSpec(
            num_scalar_prefetch=0,
            grid=(n,),
            in_specs=[
                pl.BlockSpec((1, lpad, cin), lambda b: (b, 0, 0)),
                pl.BlockSpec((9, cin, cout), lambda b: (0, 0, 0)),
                pl.BlockSpec((cout, cout), lambda b: (0, 0)),
                pl.BlockSpec((1, cout), lambda b: (0, 0)),
                pl.BlockSpec((1, cout), lambda b: (0, 0)),
                pl.BlockSpec((lout, lrow), lambda b: (0, 0)),
            ],
            out_specs=pl.BlockSpec((1, lout, cout), lambda b: (b, 0, 0)),
        ),
        compiler_params=pltpu.CompilerParams(
            dimension_semantics=("parallel",),
            vmem_limit_bytes=32 * 1024 * 1024),
    )(xf, w9, p_op, gamma.reshape(1, cout), beta.reshape(1, cout), a_out)
    return out.reshape(n, ho, wo, cout)


def segmentation_block(x_nchw, params, n_upsamples):
    """SegmentationBlock.forward. x_nchw: (N, Cin, H, W) -> (N, Cout, H*2^u, W*2^u)."""
    x = jnp.transpose(x_nchw, (0, 2, 3, 1)).astype(jnp.float32)   # NCHW -> NHWC
    for i, p in enumerate(params):
        do_upsample = (n_upsamples > 0) if i == 0 else True
        x = conv3x3_gn_relu(x, p["w"], p["gamma"], p["beta"], do_upsample)
    return jnp.transpose(x, (0, 3, 1, 2))                         # NHWC -> NCHW


def init_params(key, in_channels, out_channels, n_upsamples):
    n_blocks = max(1, n_upsamples)
    params = []
    cin = in_channels
    for _ in range(n_blocks):
        key, k1, k2, k3 = jax.random.split(key, 4)
        params.append(dict(
            w=0.08 * jax.random.normal(k1, (3, 3, cin, out_channels), jnp.float32),
            gamma=1.0 + 0.1 * jax.random.normal(k2, (out_channels,), jnp.float32),
            beta=0.1 * jax.random.normal(k3, (out_channels,), jnp.float32),
        ))
        cin = out_channels
    return params


# --------------------------- pure-JAX reference ------------------------------

def ref_segmentation_block(x_nchw, params, n_upsamples):
    hp = lax.Precision.HIGHEST
    x = x_nchw.astype(jnp.float32)
    for i, p in enumerate(params):
        w_oihw = jnp.transpose(p["w"], (3, 2, 0, 1))
        x = lax.conv_general_dilated(
            x, w_oihw, (1, 1), ((1, 1), (1, 1)),
            dimension_numbers=("NCHW", "OIHW", "NCHW"), precision=hp)
        n, c, h, wdt = x.shape
        g = GN_GROUPS
        xr = x.reshape(n, g, c // g, h, wdt)
        mean = xr.mean(axis=(2, 3, 4), keepdims=True)
        var = xr.var(axis=(2, 3, 4), keepdims=True)
        xr = (xr - mean) * lax.rsqrt(var + GN_EPS)
        x = (xr.reshape(n, c, h, wdt) * p["gamma"][None, :, None, None]
             + p["beta"][None, :, None, None])
        x = jnp.maximum(x, 0.0)
        if (n_upsamples > 0) if i == 0 else True:
            ah = _interp_matrix(h, 2 * h)
            aw = _interp_matrix(wdt, 2 * wdt)
            x = jnp.einsum("ph,nchw->ncpw", ah, x, precision=hp)
            x = jnp.einsum("qw,ncpw->ncpq", aw, x, precision=hp)
    return x


# ---------------------------------- main --------------------------------------

if __name__ == "__main__":
    key = jax.random.PRNGKey(0)
    in_channels, out_channels, n_upsamples = 64, 64, 2   # GN(32, C) needs C % 32 == 0
    N, H, W = 2, 16, 16

    key, kx = jax.random.split(key)
    x = jax.random.normal(kx, (N, in_channels, H, W), jnp.float32)
    params = init_params(key, in_channels, out_channels, n_upsamples)

    out = jax.block_until_ready(segmentation_block(x, params, n_upsamples))
    assert out.shape == (N, out_channels, H * (2 ** n_upsamples), W * (2 ** n_upsamples)), out.shape

    ref = jax.block_until_ready(ref_segmentation_block(x, params, n_upsamples))
    # bf16 MXU operands in the conv -> slightly looser atol than a pure-f32 path.
    if not jnp.allclose(out, ref, rtol=2e-2, atol=3e-2):
        raise AssertionError(
            f"mismatch vs JAX reference: max abs err {jnp.max(jnp.abs(out - ref))}")

    print("KERNEL_OK")
</pallas_src>

<mosaic_0001>
module attributes {stable_mosaic.version = 11 : i64} {
  func.func @_block_kernel(%arg0: i32, %arg1: memref<1x328x64xbf16, #tpu.memory_space<vmem>>, %arg2: memref<9x64x64xbf16, #tpu.memory_space<vmem>>, %arg3: memref<64x64xf32, #tpu.memory_space<vmem>>, %arg4: memref<1x64xf32, #tpu.memory_space<vmem>>, %arg5: memref<1x64xf32, #tpu.memory_space<vmem>>, %arg6: memref<1024x288xf32, #tpu.memory_space<vmem>>, %arg7: memref<1x1024x64xf32, #tpu.memory_space<vmem>>) attributes {dimension_semantics = [#tpu.dimension_semantics<parallel>], iteration_bounds = array<i64: 2>, scalar_prefetch = 0 : i64, scratch_operands = 0 : i64, tpu.core_type = #tpu.core_type<tc>, window_params = [{transform_indices = @transform_0, window_bounds = array<i64: 1, 328, 64>}, {pipeline_mode = #tpu.pipeline_mode<synchronous>, transform_indices = @transform_1, window_bounds = array<i64: 9, 64, 64>}, {pipeline_mode = #tpu.pipeline_mode<synchronous>, transform_indices = @transform_2, window_bounds = array<i64: 64, 64>}, {pipeline_mode = #tpu.pipeline_mode<synchronous>, transform_indices = @transform_3, window_bounds = array<i64: 1, 64>}, {pipeline_mode = #tpu.pipeline_mode<synchronous>, transform_indices = @transform_4, window_bounds = array<i64: 1, 64>}, {pipeline_mode = #tpu.pipeline_mode<synchronous>, transform_indices = @transform_5, window_bounds = array<i64: 1024, 288>}, {transform_indices = @transform_6, window_bounds = array<i64: 1, 1024, 64>}]} {
    %cst = arith.constant 0.000000e+00 : f32
    %0 = vector.broadcast %cst : f32 to vector<288x64xf32>
    %c0 = arith.constant 0 : index
    %c0_0 = arith.constant 0 : index
    %c0_1 = arith.constant 0 : index
    %1 = vector.load %arg1[%c0, %c0_0, %c0_1] : memref<1x328x64xbf16, #tpu.memory_space<vmem>>, vector<1x288x64xbf16>
    %2 = vector.shape_cast %1 : vector<1x288x64xbf16> to vector<288x64xbf16>
    %c0_2 = arith.constant 0 : index
    %c0_3 = arith.constant 0 : index
    %c0_4 = arith.constant 0 : index
    %3 = vector.load %arg2[%c0_2, %c0_3, %c0_4] : memref<9x64x64xbf16, #tpu.memory_space<vmem>>, vector<1x64x64xbf16>
    %4 = vector.shape_cast %3 : vector<1x64x64xbf16> to vector<64x64xbf16>
    %cst_5 = arith.constant dense<0.000000e+00> : vector<288x64xf32>
    %5 = tpu.matmul %2, %4, %cst_5 {dimension_numbers = #tpu.dot_dimension_numbers<[1], [0], [0], [1], [0, 0, 1, 1], [], []>} : vector<288x64xbf16>, vector<64x64xbf16>, vector<288x64xf32> -> vector<288x64xf32>
    %6 = arith.addf %0, %5 : vector<288x64xf32>
    %c0_6 = arith.constant 0 : index
    %c1 = arith.constant 1 : index
    %c0_7 = arith.constant 0 : index
    %7 = vector.load %arg1[%c0_6, %c1, %c0_7] : memref<1x328x64xbf16, #tpu.memory_space<vmem>>, vector<1x288x64xbf16>
    %8 = vector.shape_cast %7 : vector<1x288x64xbf16> to vector<288x64xbf16>
    %c1_8 = arith.constant 1 : index
    %c0_9 = arith.constant 0 : index
    %c0_10 = arith.constant 0 : index
    %9 = vector.load %arg2[%c1_8, %c0_9, %c0_10] : memref<9x64x64xbf16, #tpu.memory_space<vmem>>, vector<1x64x64xbf16>
    %10 = vector.shape_cast %9 : vector<1x64x64xbf16> to vector<64x64xbf16>
    %cst_11 = arith.constant dense<0.000000e+00> : vector<288x64xf32>
    %11 = tpu.matmul %8, %10, %cst_11 {dimension_numbers = #tpu.dot_dimension_numbers<[1], [0], [0], [1], [0, 0, 1, 1], [], []>} : vector<288x64xbf16>, vector<64x64xbf16>, vector<288x64xf32> -> vector<288x64xf32>
    %12 = arith.addf %6, %11 : vector<288x64xf32>
    %c0_12 = arith.constant 0 : index
    %c2 = arith.constant 2 : index
    %c0_13 = arith.constant 0 : index
    %13 = vector.load %arg1[%c0_12, %c2, %c0_13] : memref<1x328x64xbf16, #tpu.memory_space<vmem>>, vector<1x288x64xbf16>
    %14 = vector.shape_cast %13 : vector<1x288x64xbf16> to vector<288x64xbf16>
    %c2_14 = arith.constant 2 : index
    %c0_15 = arith.constant 0 : index
    %c0_16 = arith.constant 0 : index
    %15 = vector.load %arg2[%c2_14, %c0_15, %c0_16] : memref<9x64x64xbf16, #tpu.memory_space<vmem>>, vector<1x64x64xbf16>
    %16 = vector.shape_cast %15 : vector<1x64x64xbf16> to vector<64x64xbf16>
    %cst_17 = arith.constant dense<0.000000e+00> : vector<288x64xf32>
    %17 = tpu.matmul %14, %16, %cst_17 {dimension_numbers = #tpu.dot_dimension_numbers<[1], [0], [0], [1], [0, 0, 1, 1], [], []>} : vector<288x64xbf16>, vector<64x64xbf16>, vector<288x64xf32> -> vector<288x64xf32>
    %18 = arith.addf %12, %17 : vector<288x64xf32>
    %c0_18 = arith.constant 0 : index
    %c18 = arith.constant 18 : index
    %c0_19 = arith.constant 0 : index
    %19 = vector.load %arg1[%c0_18, %c18, %c0_19] : memref<1x328x64xbf16, #tpu.memory_space<vmem>>, vector<1x288x64xbf16>
    %20 = vector.shape_cast %19 : vector<1x288x64xbf16> to vector<288x64xbf16>
    %c3 = arith.constant 3 : index
    %c0_20 = arith.constant 0 : index
    %c0_21 = arith.constant 0 : index
    %21 = vector.load %arg2[%c3, %c0_20, %c0_21] : memref<9x64x64xbf16, #tpu.memory_space<vmem>>, vector<1x64x64xbf16>
    %22 = vector.shape_cast %21 : vector<1x64x64xbf16> to vector<64x64xbf16>
    %cst_22 = arith.constant dense<0.000000e+00> : vector<288x64xf32>
    %23 = tpu.matmul %20, %22, %cst_22 {dimension_numbers = #tpu.dot_dimension_numbers<[1], [0], [0], [1], [0, 0, 1, 1], [], []>} : vector<288x64xbf16>, vector<64x64xbf16>, vector<288x64xf32> -> vector<288x64xf32>
    %24 = arith.addf %18, %23 : vector<288x64xf32>
    %c0_23 = arith.constant 0 : index
    %c19 = arith.constant 19 : index
    %c0_24 = arith.constant 0 : index
    %25 = vector.load %arg1[%c0_23, %c19, %c0_24] : memref<1x328x64xbf16, #tpu.memory_space<vmem>>, vector<1x288x64xbf16>
    %26 = vector.shape_cast %25 : vector<1x288x64xbf16> to vector<288x64xbf16>
    %c4 = arith.constant 4 : index
    %c0_25 = arith.constant 0 : index
    %c0_26 = arith.constant 0 : index
    %27 = vector.load %arg2[%c4, %c0_25, %c0_26] : memref<9x64x64xbf16, #tpu.memory_space<vmem>>, vector<1x64x64xbf16>
    %28 = vector.shape_cast %27 : vector<1x64x64xbf16> to vector<64x64xbf16>
    %cst_27 = arith.constant dense<0.000000e+00> : vector<288x64xf32>
    %29 = tpu.matmul %26, %28, %cst_27 {dimension_numbers = #tpu.dot_dimension_numbers<[1], [0], [0], [1], [0, 0, 1, 1], [], []>} : vector<288x64xbf16>, vector<64x64xbf16>, vector<288x64xf32> -> vector<288x64xf32>
    %30 = arith.addf %24, %29 : vector<288x64xf32>
    %c0_28 = arith.constant 0 : index
    %c20 = arith.constant 20 : index
    %c0_29 = arith.constant 0 : index
    %31 = vector.load %arg1[%c0_28, %c20, %c0_29] : memref<1x328x64xbf16, #tpu.memory_space<vmem>>, vector<1x288x64xbf16>
    %32 = vector.shape_cast %31 : vector<1x288x64xbf16> to vector<288x64xbf16>
    %c5 = arith.constant 5 : index
    %c0_30 = arith.constant 0 : index
    %c0_31 = arith.constant 0 : index
    %33 = vector.load %arg2[%c5, %c0_30, %c0_31] : memref<9x64x64xbf16, #tpu.memory_space<vmem>>, vector<1x64x64xbf16>
    %34 = vector.shape_cast %33 : vector<1x64x64xbf16> to vector<64x64xbf16>
    %cst_32 = arith.constant dense<0.000000e+00> : vector<288x64xf32>
    %35 = tpu.matmul %32, %34, %cst_32 {dimension_numbers = #tpu.dot_dimension_numbers<[1], [0], [0], [1], [0, 0, 1, 1], [], []>} : vector<288x64xbf16>, vector<64x64xbf16>, vector<288x64xf32> -> vector<288x64xf32>
    %36 = arith.addf %30, %35 : vector<288x64xf32>
    %c0_33 = arith.constant 0 : index
    %c36 = arith.constant 36 : index
    %c0_34 = arith.constant 0 : index
    %37 = vector.load %arg1[%c0_33, %c36, %c0_34] : memref<1x328x64xbf16, #tpu.memory_space<vmem>>, vector<1x288x64xbf16>
    %38 = vector.shape_cast %37 : vector<1x288x64xbf16> to vector<288x64xbf16>
    %c6 = arith.constant 6 : index
    %c0_35 = arith.constant 0 : index
    %c0_36 = arith.constant 0 : index
    %39 = vector.load %arg2[%c6, %c0_35, %c0_36] : memref<9x64x64xbf16, #tpu.memory_space<vmem>>, vector<1x64x64xbf16>
    %40 = vector.shape_cast %39 : vector<1x64x64xbf16> to vector<64x64xbf16>
    %cst_37 = arith.constant dense<0.000000e+00> : vector<288x64xf32>
    %41 = tpu.matmul %38, %40, %cst_37 {dimension_numbers = #tpu.dot_dimension_numbers<[1], [0], [0], [1], [0, 0, 1, 1], [], []>} : vector<288x64xbf16>, vector<64x64xbf16>, vector<288x64xf32> -> vector<288x64xf32>
    %42 = arith.addf %36, %41 : vector<288x64xf32>
    %c0_38 = arith.constant 0 : index
    %c37 = arith.constant 37 : index
    %c0_39 = arith.constant 0 : index
    %43 = vector.load %arg1[%c0_38, %c37, %c0_39] : memref<1x328x64xbf16, #tpu.memory_space<vmem>>, vector<1x288x64xbf16>
    %44 = vector.shape_cast %43 : vector<1x288x64xbf16> to vector<288x64xbf16>
    %c7 = arith.constant 7 : index
    %c0_40 = arith.constant 0 : index
    %c0_41 = arith.constant 0 : index
    %45 = vector.load %arg2[%c7, %c0_40, %c0_41] : memref<9x64x64xbf16, #tpu.memory_space<vmem>>, vector<1x64x64xbf16>
    %46 = vector.shape_cast %45 : vector<1x64x64xbf16> to vector<64x64xbf16>
    %cst_42 = arith.constant dense<0.000000e+00> : vector<288x64xf32>
    %47 = tpu.matmul %44, %46, %cst_42 {dimension_numbers = #tpu.dot_dimension_numbers<[1], [0], [0], [1], [0, 0, 1, 1], [], []>} : vector<288x64xbf16>, vector<64x64xbf16>, vector<288x64xf32> -> vector<288x64xf32>
    %48 = arith.addf %42, %47 : vector<288x64xf32>
    %c0_43 = arith.constant 0 : index
    %c38 = arith.constant 38 : index
    %c0_44 = arith.constant 0 : index
    %49 = vector.load %arg1[%c0_43, %c38, %c0_44] : memref<1x328x64xbf16, #tpu.memory_space<vmem>>, vector<1x288x64xbf16>
    %50 = vector.shape_cast %49 : vector<1x288x64xbf16> to vector<288x64xbf16>
    %c8 = arith.constant 8 : index
    %c0_45 = arith.constant 0 : index
    %c0_46 = arith.constant 0 : index
    %51 = vector.load %arg2[%c8, %c0_45, %c0_46] : memref<9x64x64xbf16, #tpu.memory_space<vmem>>, vector<1x64x64xbf16>
    %52 = vector.shape_cast %51 : vector<1x64x64xbf16> to vector<64x64xbf16>
    %cst_47 = arith.constant dense<0.000000e+00> : vector<288x64xf32>
    %53 = tpu.matmul %50, %52, %cst_47 {dimension_numbers = #tpu.dot_dimension_numbers<[1], [0], [0], [1], [0, 0, 1, 1], [], []>} : vector<288x64xbf16>, vector<64x64xbf16>, vector<288x64xf32> -> vector<288x64xf32>
    %54 = arith.addf %48, %53 : vector<288x64xf32>
    %55 = tpu.iota {dimensions = array<i32: 0>} : vector<288x1xi32>
    %c18_i32 = arith.constant 18 : i32
    %c0_i32 = arith.constant 0 : i32
    %56 = arith.cmpi eq, %c18_i32, %c0_i32 : i32
    %c1_i32 = arith.constant 1 : i32
    %57 = arith.select %56, %c1_i32, %c18_i32 : i32
    %58 = vector.broadcast %57 : i32 to vector<288x1xi32>
    %59 = arith.remsi %55, %58 : vector<288x1xi32>
    %c0_i32_48 = arith.constant 0 : i32
    %60 = vector.broadcast %c0_i32_48 : i32 to vector<288x1xi32>
    %61 = arith.cmpi ne, %59, %60 : vector<288x1xi32>
    %c0_i32_49 = arith.constant 0 : i32
    %62 = vector.broadcast %c0_i32_49 : i32 to vector<288x1xi32>
    %63 = arith.cmpi slt, %59, %62 : vector<288x1xi32>
    %c0_i32_50 = arith.constant 0 : i32
    %64 = arith.cmpi slt, %57, %c0_i32_50 : i32
    %65 = vector.broadcast %64 : i1 to vector<288x1xi1>
    %66 = vector.broadcast %65 : vector<288x1xi1> to vector<288x1xi1>
    %67 = arith.xori %63, %66 : vector<288x1xi1>
    %68 = arith.andi %67, %61 : vector<288x1xi1>
    %69 = vector.broadcast %57 : i32 to vector<288x1xi32>
    %70 = arith.addi %59, %69 : vector<288x1xi32>
    %71 = arith.select %68, %70, %59 : vector<288x1xi1>, vector<288x1xi32>
    %c16_i32 = arith.constant 16 : i32
    %72 = vector.broadcast %c16_i32 : i32 to vector<288x1xi32>
    %73 = arith.cmpi slt, %71, %72 : vector<288x1xi32>
    %74 = arith.extui %73 : vector<288x1xi1> to vector<288x1xi32>
    %75 = arith.sitofp %74 : vector<288x1xi32> to vector<288x1xf32>
    %76 = vector.broadcast %75 : vector<288x1xf32> to vector<288x64xf32>
    %77 = arith.mulf %54, %76 : vector<288x64xf32>
    %cst_51 = arith.constant dense<0.000000e+00> : vector<64xf32>
    %78 = vector.multi_reduction <add>, %77, %cst_51 [0] : vector<288x64xf32> to vector<64xf32>
    %79 = vector.shape_cast %78 : vector<64xf32> to vector<1x64xf32>
    %80 = arith.mulf %77, %54 : vector<288x64xf32>
    %cst_52 = arith.constant dense<0.000000e+00> : vector<64xf32>
    %81 = vector.multi_reduction <add>, %80, %cst_52 [0] : vector<288x64xf32> to vector<64xf32>
    %82 = vector.shape_cast %81 : vector<64xf32> to vector<1x64xf32>
    %c0_53 = arith.constant 0 : index
    %c0_54 = arith.constant 0 : index
    %83 = vector.load %arg3[%c0_53, %c0_54] : memref<64x64xf32, #tpu.memory_space<vmem>>, vector<64x64xf32>
    %cst_55 = arith.constant dense<0.000000e+00> : vector<1x64xf32>
    %84 = tpu.matmul %79, %83, %cst_55 {dimension_numbers = #tpu.dot_dimension_numbers<[1], [0], [0], [1], [0, 0, 1, 1], [], []>} : vector<1x64xf32>, vector<64x64xf32>, vector<1x64xf32> -> vector<1x64xf32>
    %c0_56 = arith.constant 0 : index
    %c0_57 = arith.constant 0 : index
    %85 = vector.load %arg3[%c0_56, %c0_57] : memref<64x64xf32, #tpu.memory_space<vmem>>, vector<64x64xf32>
    %cst_58 = arith.constant dense<0.000000e+00> : vector<1x64xf32>
    %86 = tpu.matmul %82, %85, %cst_58 {dimension_numbers = #tpu.dot_dimension_numbers<[1], [0], [0], [1], [0, 0, 1, 1], [], []>} : vector<1x64xf32>, vector<64x64xf32>, vector<1x64xf32> -> vector<1x64xf32>
    %87 = arith.mulf %84, %84 : vector<1x64xf32>
    %88 = arith.subf %86, %87 : vector<1x64xf32>
    %cst_59 = arith.constant 9.99999974E-6 : f32
    %89 = vector.broadcast %cst_59 : f32 to vector<1x64xf32>
    %90 = arith.addf %88, %89 : vector<1x64xf32>
    %91 = math.rsqrt %90 : vector<1x64xf32>
    %92 = vector.broadcast %84 : vector<1x64xf32> to vector<288x64xf32>
    %93 = arith.subf %54, %92 : vector<288x64xf32>
    %c0_60 = arith.constant 0 : index
    %c0_61 = arith.constant 0 : index
    %94 = vector.load %arg4[%c0_60, %c0_61] : memref<1x64xf32, #tpu.memory_space<vmem>>, vector<1x64xf32>
    %95 = arith.mulf %91, %94 : vector<1x64xf32>
    %96 = vector.broadcast %95 : vector<1x64xf32> to vector<288x64xf32>
    %97 = arith.mulf %93, %96 : vector<288x64xf32>
    %c0_62 = arith.constant 0 : index
    %c0_63 = arith.constant 0 : index
    %98 = vector.load %arg5[%c0_62, %c0_63] : memref<1x64xf32, #tpu.memory_space<vmem>>, vector<1x64xf32>
    %99 = vector.broadcast %98 : vector<1x64xf32> to vector<288x64xf32>
    %100 = arith.addf %97, %99 : vector<288x64xf32>
    %cst_64 = arith.constant 0.000000e+00 : f32
    %101 = vector.broadcast %cst_64 : f32 to vector<288x64xf32>
    %102 = arith.maximumf %100, %101 : vector<288x64xf32>
    %c0_65 = arith.constant 0 : index
    %c0_66 = arith.constant 0 : index
    %103 = vector.load %arg6[%c0_65, %c0_66] : memref<1024x288xf32, #tpu.memory_space<vmem>>, vector<1024x288xf32>
    %cst_67 = arith.constant dense<0.000000e+00> : vector<1024x64xf32>
    %104 = tpu.matmul %103, %102, %cst_67 {dimension_numbers = #tpu.dot_dimension_numbers<[1], [0], [0], [1], [0, 0, 1, 1], [], []>} : vector<1024x288xf32>, vector<288x64xf32>, vector<1024x64xf32> -> vector<1024x64xf32>
    %c0_68 = arith.constant 0 : index
    %c0_69 = arith.constant 0 : index
    %c0_70 = arith.constant 0 : index
    %105 = vector.load %arg7[%c0_68, %c0_69, %c0_70] : memref<1x1024x64xf32, #tpu.memory_space<vmem>>, vector<1x1024x64xf32>
    %106 = vector.shape_cast %105 : vector<1x1024x64xf32> to vector<1024x64xf32>
    %107 = vector.shape_cast %104 : vector<1024x64xf32> to vector<1x1024x64xf32>
    tpu.vector_store %arg7[%c0_68, %c0_69, %c0_70], %107 {strides = array<i32>} : memref<1x1024x64xf32, #tpu.memory_space<vmem>>, vector<1x1024x64xf32>,
    return
  }
  func.func @transform_0(%arg0: i32) -> (i32, i32, i32) {
    %c0_i32 = arith.constant 0 : i32
    %c0_i32_0 = arith.constant 0 : i32
    %c0_i32_1 = arith.constant 0 : i32
    return %arg0, %c0_i32, %c0_i32_0 : i32, i32, i32
  }
  func.func @transform_1(%arg0: i32) -> (i32, i32, i32) {
    %c0_i32 = arith.constant 0 : i32
    %c0_i32_0 = arith.constant 0 : i32
    %c0_i32_1 = arith.constant 0 : i32
    %c0_i32_2 = arith.constant 0 : i32
    return %c0_i32, %c0_i32_0, %c0_i32_1 : i32, i32, i32
  }
  func.func @transform_2(%arg0: i32) -> (i32, i32) {
    %c0_i32 = arith.constant 0 : i32
    %c0_i32_0 = arith.constant 0 : i32
    %c0_i32_1 = arith.constant 0 : i32
    return %c0_i32, %c0_i32_0 : i32, i32
  }
  func.func @transform_3(%arg0: i32) -> (i32, i32) {
    %c0_i32 = arith.constant 0 : i32
    %c0_i32_0 = arith.constant 0 : i32
    %c0_i32_1 = arith.constant 0 : i32
    return %c0_i32, %c0_i32_0 : i32, i32
  }
  func.func @transform_4(%arg0: i32) -> (i32, i32) {
    %c0_i32 = arith.constant 0 : i32
    %c0_i32_0 = arith.constant 0 : i32
    %c0_i32_1 = arith.constant 0 : i32
    return %c0_i32, %c0_i32_0 : i32, i32
  }
  func.func @transform_5(%arg0: i32) -> (i32, i32) {
    %c0_i32 = arith.constant 0 : i32
    %c0_i32_0 = arith.constant 0 : i32
    %c0_i32_1 = arith.constant 0 : i32
    return %c0_i32, %c0_i32_0 : i32, i32
  }
  func.func @transform_6(%arg0: i32) -> (i32, i32, i32) {
    %c0_i32 = arith.constant 0 : i32
    %c0_i32_0 = arith.constant 0 : i32
    %c0_i32_1 = arith.constant 0 : i32
    return %arg0, %c0_i32, %c0_i32_0 : i32, i32, i32
  }
}

</mosaic_0001>

<bundles_post_ra>
// kernel: tpu_custom_call.1
= control target key start
LH: loop header
LB: loop body
LE: loop exit
PB: predicated region body
PF: predicated region fallthrough
CT: control target
= control target key end

     0   :  { %s9694_s21 = smov 0   ;;  %s13963_s0 = inlined_call_operand.vmem [shape: bf16[2,328,64], index: 0, kind: input, shape index: {}]   ;;  %s13964_s1 = inlined_call_operand.vmem [shape: bf16[9,64,64], index: 1, kind: input, shape index: {}]   ;;  %s13965_s2 = inlined_call_operand.vmem [shape: f32[64,64], index: 2, kind: input, shape index: {}]   ;;  %s13966_s3 = inlined_call_operand.vmem [shape: f32[1,64], index: 3, kind: input, shape index: {}]   ;;  %s13967_s4 = inlined_call_operand.vmem [shape: f32[1,64], index: 4, kind: input, shape index: {}]   ;;  %s13968_s5 = inlined_call_operand.vmem [shape: f32[1024,288], index: 5, kind: input, shape index: {}]   ;;  %s13969_s6 = inlined_call_operand.vmem [shape: f32[2,1024,64], index: 6, kind: output, shape index: {}]  }
   0x1 LB: > { %s7580_s22 = sadd.s32 4294967295, %s9654_s21   ;;  %p7584_p0 = scmp.ge.s32.totalorder %s9654_s21, 1  ;;  %s9654_s21 = sphi %s9694_s21, %s16_s21  }
   0x2   : > { %p212_p1 = scmp.lt.s32.totalorder %s9654_s21, 3 }
   0x4   : > { %p213_p2 = pnand %p7584_p0, %p212_p1 }
   0x6   : > { %216 = sbr.rel (%p213_p2) target bundleno = 2123 (0x84b), region = 44 }
   0xd   : > { %v9548_v0 = vld [vmem:[%s13964_s1 + $0x20] sm:$0xff]   ;;  %p242_p3 = scmp.lt.s32.totalorder %s7580_s22, 1  ;;  %v9549_v1 = vld [vmem:[%s13964_s1 + $0x28] sm:$0xff]   ;;  %v9550_v2 = vld [vmem:[%s13964_s1 + $0x30] sm:$0xff]   ;;  %vm573_vm0 = vcmask 523264   ;;  %vm1055_vm2 = vcmask 1046528  }
   0xe   : > { %8430 = vmatprep.subr.bf16.mxu0 %v9548_v0  ;;  %v9551_v3 = vld [vmem:[%s13964_s1 + $0x38] sm:$0xff]   ;;  %v9555_v13 = vld [vmem:[%s13964_s1] sm:$0xff]   ;;  %vm400_vm1 = vsmask.f32 7424  ;;  %v9560_v29 = vld [vmem:[%s13964_s1 + $0x8] sm:$0xff]   ;;  %vm2339_vm4 = vcmask 1045504  }
   0xf   : > { %s14264_s22 = smov (!%p242_p3, %s7580_s22), 1  ;;  %8431 = vmatpush3.bf16.msra.mxu0 %v9548_v0  ;;  %v9565_v41 = vld [vmem:[%s13964_s1 + $0x10] sm:$0xff]   ;;  %v9570_v50 = vld [vmem:[%s13964_s1 + $0x18] sm:$0xff]   ;;  %vm1864_vm3 = vsmask.f32 6400  ;;  %vm3623_vm6 = vcmask 1044480  }
  0x10   : > { %8432 = vmatprep.subr.bf16.mxu0 %v9549_v1  ;;  %s9464_s29 = smul.u32 164, %s14264_s22  ;;  %vm3148_vm5 = vsmask.f32 5376  ;;  %s8081_s9 = sshll.u32 %s14264_s22, 10 }
  0x11   : > { %s13496_s16 = scalar_lea.vmem %s13969_s6, %s8081_s9 }
  0x12   : > { %s9720_s10 = scalar_lea.vmem %s13963_s0, %s9464_s29 }
  0x13   : > { %8433 = vmatpush3.bf16.msra.mxu0 %v9549_v1  ;;  %v253_v4 = vld [vmem:[%s9720_s10] sm:$0xf]  ;;  %v9724_v5 = vld [vmem:[%s9720_s10 + $0x4] sm:$0xf]  ;;  %v9730_v7 = vld [vmem:[%s9720_s10 + $0x8] sm:$0xff]  }
  0x14   : > { %8434 = vmatprep.subr.bf16.mxu0 %v9550_v2  ;;  %v9727_v6 = vcombine.low %v253_v4, %v9724_v5  ;;  %v9733_v8 = vld [vmem:[%s9720_s10 + $0x10] sm:$0xff]   ;;  %v409_v11 = vshll.u32 %v9730_v7, 16  ;;  %v413_v12 = vshrl.u32 %v9730_v7, 16  ;;  %v9744_v15 = vld [vmem:[%s9720_s10 + $0x18] sm:$0xff]   ;;  %v9748_v17 = vld [vmem:[%s9720_s10 + $0x20] sm:$0xff]  }
  0x15   : > { %v417_v14 = vshll.u32 %v9733_v8, 16  ;;  %v421_v16 = vshrl.u32 %v9733_v8, 16  ;;  %v425_v21 = vshll.u32 %v9744_v15, 16  ;;  %v433_v24 = vshll.u32 %v9748_v17, 16  ;;  %v9753_v25 = vld [vmem:[%s9720_s10 + $0x28] sm:$0xff]   ;;  %v9767_v36 = vld [vmem:[%s9720_s10 + $0x30] sm:$0xff]  }
  0x16   : > { %v402_v9 = vshrl.u32 %v9727_v6, 16  ;;  %v404_v10 = vshll.u32 %v9727_v6, 16  ;;  %v411_v19 = vrot.slane %v409_v11, 1  ;;  %v429_v28 = vshrl.u32 %v9744_v15, 16  ;;  %v9771_v40 = vld [vmem:[%s9720_s10 + $0x38] sm:$0xff]   ;;  %v9784_v49 = vld [vmem:[%s9720_s10 + $0x40] sm:$0xff]  }
  0x17   : > { %8435 = vmatpush3.bf16.msra.mxu0 %v9550_v2  ;;  %v419_v20 = vrot.slane %v417_v14, 1  ;;  %v427_v27 = vrot.slane %v425_v21, 1  ;;  %v437_v32 = vshrl.u32 %v9748_v17, 16  ;;  %v441_v33 = vshll.u32 %v9753_v25, 16  ;;  %v9791_v54 = vld [vmem:[%s9720_s10 + $0x48] sm:$0xff]   ;;  %v9794_v55 = vld [vmem:[%s9720_s10 + $0x50] sm:$0xff]  }
  0x18   : > { %8436 = vmatprep.subr.bf16.mxu0 %v9551_v3  ;;  %v406_v18 = vrot.slane %v404_v10, 1  ;;  %v415_v23 = vor.u32 %v413_v12, %v411_v19  ;;  %v435_v35 = vrot.slane %v433_v24, 1  ;;  %v449_v42 = vshll.u32 %v9767_v36, 16  ;;  %v9803_v62 = vld [vmem:[%s9720_s10 + $0x58] sm:$0xff]   ;;  %v9807_v0 = vld [vmem:[%s9720_s10 + $0x60] sm:$0xff]  }
  0x19   : > { %v423_v26 = vor.u32 %v421_v16, %v419_v20  ;;  %v431_v37 = vor.u32 %v429_v28, %v427_v27  ;;  %v443_v39 = vrot.slane %v441_v33, 1  ;;  %v445_v44 = vshrl.u32 %v9753_v25, 16  ;;  %v9812_v1 = vld [vmem:[%s13964_s1 + $0x40] sm:$0xff]  }
  0x1a   : > { %v407_v22 = vor.u32 %v406_v18, %v402_v9  ;;  %v420_v31 = vsel %vm400_vm1, %v415_v23, %v419_v20  ;;  %v439_v38 = vor.u32 %v437_v32, %v435_v35  ;;  %v453_v46 = vshrl.u32 %v9767_v36, 16  ;;  %v9825_v18 = vld [vmem:[%s9720_s10 + $0x70] sm:$0xff]   ;;  %v9837_v32 = vld [vmem:[%s9720_s10 + $0x78] sm:$0xff]  }
  0x1b   : > { %8437 = vmatpush3.bf16.msra.mxu0 %v9551_v3  ;;  %v428_v34 = vsel %vm400_vm1, %v423_v26, %v427_v27  ;;  %v436_v43 = vsel %vm400_vm1, %v431_v37, %v435_v35  ;;  %v457_v47 = vshll.u32 %v9771_v40, 16  ;;  %v451_v48 = vrot.slane %v449_v42, 1  ;;  %v9816_v3 = vld [vmem:[%s9720_s10 + $0x68] sm:$0xff]  }
  0x1c   : > { %v412_v30 = vsel %vm400_vm1, %v407_v22, %v411_v19  ;;  %8474 = vmatprep.subr.bf16.mxu0 %v9555_v13  ;;  %v444_v45 = vsel %vm400_vm1, %v439_v38, %v443_v39  ;;  %v447_v51 = vor.u32 %v445_v44, %v443_v39  ;;  %v461_v56 = vshrl.u32 %v9771_v40, 16  ;;  %v9850_v44 = vld [vmem:[%s9720_s10 + $0x88] sm:$0xff]  }
  0x1d   : > { %8438 = vmatprep.mubr.msk.bf16.mxu0 %vm573_vm0, %v412_v30  ;;  %v455_v52 = vor.u32 %v453_v46, %v451_v48  ;;  %v459_v53 = vrot.slane %v457_v47, 1  ;;  %v465_v57 = vshll.u32 %v9784_v49, 16  ;;  %v469_v60 = vshrl.u32 %v9784_v49, 16 }
  0x1e   : > { %8439 = vmatmul.mubr.msk.bf16.vlgmr.msra.gmra.mrb[0].mxu0 %vm573_vm0, %v420_v31  ;;  %v452_v58 = vsel %vm400_vm1, %v447_v51, %v451_v48  ;;  %v473_v61 = vshll.u32 %v9791_v54, 16  ;;  %v481_v63 = vshll.u32 %v9794_v55, 16  ;;  %v489_v11 = vshll.u32 %v9803_v62, 16 }
  0x1f   : > { %8475 = vmatpush3.bf16.msra.mxu0 %v9555_v13  ;;  %8442 = vmatprep.mubr.msk.bf16.mxu0 %vm573_vm0, %v428_v34  ;;  %v460_v59 = vsel %vm400_vm1, %v455_v52, %v459_v53  ;;  %v467_v2 = vrot.slane %v465_v57, 1  ;;  %v463_v4 = vor.u32 %v461_v56, %v459_v53  ;;  %v477_v12 = vshrl.u32 %v9791_v54, 16  ;;  %v9860_v56 = vld [vmem:[%s9720_s10 + $0x90] ss:$0 sps:$4 sm:$0x11]  }
  0x20   : > { %8476 = vmatprep.subr.bf16.mxu0 %v9560_v29  ;;  %v475_v10 = vrot.slane %v473_v61, 1  ;;  %v483_v13 = vrot.slane %v481_v63, 1  ;;  %v485_v14 = vshrl.u32 %v9794_v55, 16  ;;  %v493_v16 = vshrl.u32 %v9803_v62, 16 }
  0x21   : > { %v471_v9 = vor.u32 %v469_v60, %v467_v2  ;;  %v497_v19 = vshll.u32 %v9807_v0, 16  ;;  %v505_v20 = vshll.u32 %v9816_v3, 16  ;;  %v468_v21 = vsel %vm400_vm1, %v463_v4, %v467_v2 }
  0x22   : > { %v491_v23 = vrot.slane %v489_v11, 1  ;;  %v501_v24 = vshrl.u32 %v9807_v0, 16  ;;  %v509_v27 = vshrl.u32 %v9816_v3, 16  ;;  %v479_v28 = vor.u32 %v477_v12, %v475_v10 }
  0x23   : > { %8477 = vmatpush3.bf16.msra.mxu0 %v9560_v29  ;;  %v476_v22 = vsel %vm400_vm1, %v471_v9, %v475_v10  ;;  %v499_v26 = vrot.slane %v497_v19, 1  ;;  %v507_v29 = vrot.slane %v505_v20, 1  ;;  %v513_v30 = vshll.u32 %v9825_v18, 16  ;;  %v1042_v19 = vld [vmem:[%s9720_s10] sm:$0xe] }
  0x24   : > { %8478 = vmatprep.subr.bf16.mxu0 %v9565_v41  ;;  %v487_v31 = vor.u32 %v485_v14, %v483_v13  ;;  %v484_v33 = vsel %vm400_vm1, %v479_v28, %v483_v13  ;;  %v517_v37 = vshrl.u32 %v9825_v18, 16  ;;  %v495_v38 = vor.u32 %v493_v16, %v491_v23  ;;  %v9576_v14 = vld [vmem:[%s13964_s1 + $0x48] sm:$0xff]   ;;  %v9577_v16 = vld [vmem:[%s13964_s1 + $0x50] sm:$0xff]  }
  0x25   : > { %v515_v35 = vrot.slane %v513_v30, 1  ;;  %v521_v39 = vshll.u32 %v9837_v32, 16  ;;  %v503_v42 = vor.u32 %v501_v24, %v499_v26  ;;  %v537_v52 = vshll.u32 %v9850_v44, 16 }
  0x26   : > { %8443 = vmatmul.mubr.msk.bf16.gmra.mrb[4].mxu0 %vm573_vm0, %v436_v43  ;;  %v492_v34 = vsel %vm400_vm1, %v487_v31, %v491_v23  ;;  %v9847_v43 = vld [vmem:[%s9720_s10 + $0x80] sm:$0xff]   ;;  %v541_v60 = vshrl.u32 %v9850_v44, 16  ;;  %v545_v2 = vshll.u32 %v9860_v56, 16  ;;  %v7667_v20 = vcombine.low %v1042_v19, %v9724_v5  ;;  %v9583_v31 = vld [vmem:[%s13964_s1 + $0x78] sm:$0xff]  }
  0x27   : > { %8446 = vmatprep.mubr.msk.bf16.mxu0 %vm573_vm0, %v444_v45  ;;  %8479 = vmatpush3.bf16.msra.mxu0 %v9565_v41  ;;  %v525_v41 = vshrl.u32 %v9837_v32, 16  ;;  %v500_v45 = vsel %vm400_vm1, %v495_v38, %v499_v26  ;;  %v508_v46 = vsel %vm400_vm1, %v503_v42, %v507_v29  ;;  %v523_v47 = vrot.slane %v521_v39, 1 }
  0x28   : > { %8480 = vmatprep.subr.bf16.mxu0 %v9570_v50  ;;  %v529_v48 = vshll.u32 %v9847_v43, 16  ;;  %v533_v51 = vshrl.u32 %v9847_v43, 16  ;;  %v519_v53 = vor.u32 %v517_v37, %v515_v35  ;;  %v539_v63 = vrot.slane %v537_v52, 1  ;;  %v9986_v52 = vld [vmem:[%s9720_s10 + $0xc] sm:$0xf] }
  0x29   : > { %v527_v61 = vor.u32 %v525_v41, %v523_v47  ;;  %v547_v12 = vrot.slane %v545_v2, 1  ;;  %v1059_v24 = vrot.slane %v9733_v8, 1  ;;  %v1061_v5 = vrot.slane %v9744_v15, 1 }
  0x2a   : > { %v543_v11 = vor.u32 %v541_v60, %v539_v63  ;;  %v1063_v28 = vrot.slane %v9748_v17, 1  ;;  %v1073_v37 = vrot.slane %v9791_v54, 1  ;;  %v1075_v39 = vrot.slane %v9794_v55, 1  ;;  %v10003_v60 = vld [vmem:[%s9720_s10 + $0x18] sm:$0xff]  }
  0x2b   : > { %8481 = vmatpush3.bf16.msra.mxu0 %v9570_v50  ;;  %v511_v50 = vor.u32 %v509_v27, %v507_v29  ;;  %v1062_v27 = vsel %vm1055_vm2, %v1059_v24, %v1061_v5  ;;  %v1065_v29 = vrot.slane %v9753_v25, 1  ;;  %v1077_v41 = vrot.slane %v9803_v62, 1 }
  0x2c   : > { %8518 = vmatprep.subr.bf16.mxu0 %v9812_v1  ;;  %v548_v13 = vsel %vm400_vm1, %v543_v11, %v547_v12  ;;  %v1076_v42 = vsel %vm1055_vm2, %v1073_v37, %v1075_v39  ;;  %v1526_v2 = vrot.slane %v10003_v60, 1  ;;  %v10019_v11 = vld [vmem:[%s9720_s10 + $0x30] sm:$0xff]   ;;  %v9592_v12 = vld [vmem:[%s13964_s1 + $0x88] sm:$0xff]  }
  0x2d   : > { %v516_v57 = vsel %vm400_vm1, %v511_v50, %v515_v35  ;;  %v1066_v30 = vsel %vm1055_vm2, %v1063_v28, %v1065_v29 }
  0x2e   : > { %8447 = vmatmul.mubr.msk.bf16.gmra.mrb[8].mxu0 %vm573_vm0, %v452_v58  ;;  %v524_v58 = vsel %vm400_vm1, %v519_v53, %v523_v47  ;;  %v1085_v47 = vrot.slane %v9837_v32, 1 }
  0x2f   : > { %8450 = vmatprep.mubr.msk.bf16.mxu0 %vm573_vm0, %v460_v59  ;;  %v531_v59 = vrot.slane %v529_v48, 1 }
  0x31   : > { %v535_v4 = vor.u32 %v533_v51, %v531_v59  ;;  %v532_v9 = vsel %vm400_vm1, %v527_v61, %v531_v59  ;;  %v1384_v51 = vld [vmem:[%s9720_s10 + $0x8] sm:$0xe] }
  0x32   : > { %v9991_v53 = vcombine.low %v1384_v51, %v9986_v52 }
  0x33   : > { %v540_v10 = vsel %vm400_vm1, %v535_v4, %v539_v63  ;;  %v10007_v63 = vld [vmem:[%s9720_s10 + $0x20] sm:$0xff]  }
  0x36   : > { %8451 = vmatmul.mubr.msk.bf16.gmra.mrb[12].mxu0 %vm573_vm0, %v468_v21  ;;  %v1056_v21 = vrot.slane %v7667_v20, 1  ;;  %v10037_v20 = vld [vmem:[%s9720_s10 + $0x40] sm:$0xff]  }
  0x37   : > { %8454 = vmatprep.mubr.msk.bf16.mxu0 %vm573_vm0, %v476_v22  ;;  %v1057_v22 = vrot.slane %v9730_v7, 1 }
  0x39   : > { %v1058_v23 = vsel %vm1055_vm2, %v1056_v21, %v1057_v22  ;;  %v1060_v26 = vsel %vm1055_vm2, %v1057_v22, %v1059_v24  ;;  %v9602_v21 = vld [vmem:[%s13964_s1 + $0x98] sm:$0xff]   ;;  %v10049_v24 = vld [vmem:[%s13964_s1 + $0xa0] sm:$0xff]  }
  0x3e   : > { %8455 = vmatmul.mubr.msk.bf16.gmra.mrb[16].mxu0 %vm573_vm0, %v484_v33  ;;  %v9587_v33 = vld [vmem:[%s13964_s1 + $0x80] sm:$0xff]  }
  0x3f   : > { %8458 = vmatprep.mubr.msk.bf16.mxu0 %vm573_vm0, %v492_v34 }
  0x46   : > { %8459 = vmatmul.mubr.msk.bf16.gmra.mrb[20].mxu0 %vm573_vm0, %v500_v45  ;;  %v1078_v45 = vsel %vm1055_vm2, %v1075_v39, %v1077_v41  ;;  %v10090_v39 = vld [vmem:[%s9720_s10 + $0x78] sm:$0xff]  }
  0x47   : > { %8462 = vmatprep.mubr.msk.bf16.mxu0 %vm573_vm0, %v508_v46 }
  0x4e   : > { %8463 = vmatmul.mubr.msk.bf16.gmra.mrb[24].mxu0 %vm573_vm0, %v516_v57  ;;  %v9994_v57 = vld [vmem:[%s9720_s10 + $0x10] sm:$0xff]  }
  0x4f   : > { %8466 = vmatprep.mubr.msk.bf16.mxu0 %vm573_vm0, %v524_v58  ;;  %v1524_v58 = vrot.slane %v9994_v57, 1  ;;  %v1877_v51 = vshll.u32 %v9994_v57, 16 }
  0x51   : > { %v1527_v4 = vsel %vm1055_vm2, %v1524_v58, %v1526_v2 }
  0x56   : > { %8467 = vmatmul.mubr.msk.bf16.gmra.mrb[28].mxu0 %vm573_vm0, %v532_v9  ;;  %v10015_v9 = vld [vmem:[%s9720_s10 + $0x28] sm:$0xff]  }
  0x57   : > { %8470 = vmatprep.mubr.msk.bf16.mxu0 %vm573_vm0, %v540_v10 }
  0x5e   : > { %8471 = vmatmul.mubr.msk.bf16.gmra.mrb[32].mxu0 %vm573_vm0, %v548_v13  ;;  %v1530_v13 = vrot.slane %v10015_v9, 1 }
  0x5f   : > { %8482 = vmatprep.mubr.msk.bf16.mxu0 %vm573_vm0, %v9727_v6  ;;  %v9578_v6 = vld [vmem:[%s13964_s1 + $0x58] sm:$0xff]  }
  0x66   : > { %8483 = vmatmul.mubr.msk.bf16.vlgmr.msra.gmra.mrb[0].mxu0 %vm573_vm0, %v9730_v7  ;;  %v9581_v7 = vld [vmem:[%s13964_s1 + $0x68] sm:$0xff]  }
  0x67   : > { %8519 = vmatpush3.bf16.msra.mxu0 %v9812_v1  ;;  %8486 = vmatprep.mubr.msk.bf16.mxu0 %vm573_vm0, %v9733_v8  ;;  %v9580_v1 = vld [vmem:[%s13964_s1 + $0x60] sm:$0xff]   ;;  %v9582_v8 = vld [vmem:[%s13964_s1 + $0x70] sm:$0xff]  }
  0x68   : > { %8520 = vmatprep.subr.bf16.mxu0 %v9576_v14 }
  0x6b   : > { %8521 = vmatpush3.bf16.msra.mxu0 %v9576_v14  ;;  %v1532_v14 = vrot.slane %v10019_v11, 1 }
  0x6c   : > { %8522 = vmatprep.subr.bf16.mxu0 %v9577_v16 }
  0x6d   : > { %v1533_v19 = vsel %vm1055_vm2, %v1530_v13, %v1532_v14 }
  0x6e   : > { %8487 = vmatmul.mubr.msk.bf16.gmra.mrb[4].mxu0 %vm573_vm0, %v9744_v15  ;;  %v1064_v15 = vsel %vm1055_vm2, %v1061_v5, %v1063_v28 }
  0x6f   : > { %8490 = vmatprep.mubr.msk.bf16.mxu0 %vm573_vm0, %v9748_v17  ;;  %8523 = vmatpush3.bf16.msra.mxu0 %v9577_v16  ;;  %v1067_v17 = vrot.slane %v9767_v36, 1  ;;  %v9597_v16 = vld [vmem:[%s13964_s1 + $0x90] sm:$0xff]  }
  0x70   : > { %8524 = vmatprep.subr.bf16.mxu0 %v9578_v6 }
  0x71   : > { %v1068_v34 = vsel %vm1055_vm2, %v1065_v29, %v1067_v17 }
  0x73   : > { %8525 = vmatpush3.bf16.msra.mxu0 %v9578_v6 }
  0x74   : > { %8562 = vmatprep.subr.bf16.mxu0 %v9580_v1 }
  0x76   : > { %8491 = vmatmul.mubr.msk.bf16.gmra.mrb[8].mxu0 %vm573_vm0, %v9753_v25  ;;  %v1069_v25 = vrot.slane %v9771_v40, 1 }
  0x77   : > { %8494 = vmatprep.mubr.msk.bf16.mxu0 %vm573_vm0, %v9767_v36  ;;  %v1071_v36 = vrot.slane %v9784_v49, 1 }
  0x78   : > { %v1070_v35 = vsel %vm1055_vm2, %v1067_v17, %v1069_v25 }
  0x79   : > { %v1074_v38 = vsel %vm1055_vm2, %v1071_v36, %v1073_v37 }
  0x7e   : > { %8495 = vmatmul.mubr.msk.bf16.gmra.mrb[12].mxu0 %vm573_vm0, %v9771_v40  ;;  %v1072_v40 = vsel %vm1055_vm2, %v1069_v25, %v1071_v36  ;;  %v10082_v36 = vld [vmem:[%s9720_s10 + $0x70] sm:$0xff]  }
  0x7f   : > { %8498 = vmatprep.mubr.msk.bf16.mxu0 %vm573_vm0, %v9784_v49  ;;  %v1079_v49 = vrot.slane %v9807_v0, 1 }
  0x81   : > { %v1080_v46 = vsel %vm1055_vm2, %v1077_v41, %v1079_v49 }
  0x86   : > { %8499 = vmatmul.mubr.msk.bf16.gmra.mrb[16].mxu0 %vm573_vm0, %v9791_v54  ;;  %v1081_v54 = vrot.slane %v9816_v3, 1 }
  0x87   : > { %8502 = vmatprep.mubr.msk.bf16.mxu0 %vm573_vm0, %v9794_v55 }
  0x88   : > { %v1082_v55 = vsel %vm1055_vm2, %v1079_v49, %v1081_v54 }
  0x8e   : > { %8503 = vmatmul.mubr.msk.bf16.gmra.mrb[20].mxu0 %vm573_vm0, %v9803_v62  ;;  %v1083_v62 = vrot.slane %v9825_v18, 1 }
  0x8f   : > { %8506 = vmatprep.mubr.msk.bf16.mxu0 %vm573_vm0, %v9807_v0  ;;  %v1087_v0 = vrot.slane %v9847_v43, 1 }
  0x90   : > { %v1084_v48 = vsel %vm1055_vm2, %v1081_v54, %v1083_v62  ;;  %v1086_v50 = vsel %vm1055_vm2, %v1083_v62, %v1085_v47 }
  0x96   : > { %8507 = vmatmul.mubr.msk.bf16.gmra.mrb[24].mxu0 %vm573_vm0, %v9816_v3  ;;  %v1089_v3 = vrot.slane %v9850_v44, 1 }
  0x97   : > { %8510 = vmatprep.mubr.msk.bf16.mxu0 %vm573_vm0, %v9825_v18  ;;  %v1088_v18 = vsel %vm1055_vm2, %v1085_v47, %v1087_v0 }
  0x9e   : > { %8511 = vmatmul.mubr.msk.bf16.gmra.mrb[28].mxu0 %vm573_vm0, %v9837_v32  ;;  %v1090_v32 = vsel %vm1055_vm2, %v1087_v0, %v1089_v3  ;;  %v1869_v0 = vshll.u32 %v9991_v53, 16 }
  0x9f   : > { %8514 = vmatprep.mubr.msk.bf16.mxu0 %vm573_vm0, %v9847_v43  ;;  %v1091_v43 = vrot.slane %v9860_v56, 1  ;;  %v1528_v56 = vrot.slane %v10007_v63, 1 }
  0xa1   : > { %v1092_v59 = vsel %vm1055_vm2, %v1089_v3, %v1091_v43  ;;  %v1529_v10 = vsel %vm1055_vm2, %v1526_v2, %v1528_v56  ;;  %v1531_v6 = vsel %vm1055_vm2, %v1528_v56, %v1530_v13  ;;  %v1874_v3 = vshrl.u32 %v9994_v57, 16  ;;  %v9606_v43 = vld [vmem:[%s9720_s10 + $0x98] ss:$0 sps:$4 sm:$0x11]  }
  0xa2   : > { %v1558_v2 = vrot.slane %v9606_v43, 1  ;;  %v1886_v56 = vshll.u32 %v10003_v60, 16  ;;  %v1895_v13 = vshll.u32 %v10007_v63, 16 }
  0xa6   : > { %8515 = vmatmul.mubr.msk.bf16.gmra.mrb[32].mxu0 %vm573_vm0, %v9850_v44  ;;  %v1523_v44 = vrot.slane %v9991_v53, 1 }
  0xa7   : > { %8526 = vmatprep.mubr.msk.bf16.mxu0 %vm573_vm0, %v1058_v23  ;;  %v1536_v23 = vrot.slane %v10037_v20, 1 }
  0xa8   : > { %v1525_v61 = vsel %vm1055_vm2, %v1523_v44, %v1524_v58  ;;  %v1871_v58 = vrot.slane %v1869_v0, 2 }
  0xae   : > { %8527 = vmatmul.mubr.msk.bf16.vlgmr.msra.gmra.mrb[0].mxu0 %vm573_vm0, %v1060_v26  ;;  %v10053_v26 = vld [vmem:[%s9720_s10 + $0x48] sm:$0xff]  }
  0xaf   : > { %8563 = vmatpush3.bf16.msra.mxu0 %v9580_v1  ;;  %8530 = vmatprep.mubr.msk.bf16.mxu0 %vm573_vm0, %v1062_v27  ;;  %v10033_v1 = vld [vmem:[%s9720_s10 + $0x38] sm:$0xff]   ;;  %v1538_v28 = vrot.slane %v10053_v26, 1  ;;  %v1937_v43 = vshrl.u32 %v10053_v26, 16 }
  0xb0   : > { %8564 = vmatprep.subr.bf16.mxu0 %v9581_v7  ;;  %v1534_v22 = vrot.slane %v10033_v1, 1 }
  0xb2   : > { %v1535_v5 = vsel %vm1055_vm2, %v1532_v14, %v1534_v22  ;;  %v1537_v27 = vsel %vm1055_vm2, %v1534_v22, %v1536_v23  ;;  %v1897_v22 = vrot.slane %v1895_v13, 2 }
  0xb3   : > { %8565 = vmatpush3.bf16.msra.mxu0 %v9581_v7  ;;  %v10057_v7 = vld [vmem:[%s9720_s10 + $0x50] sm:$0xff]  }
  0xb4   : > { %8566 = vmatprep.subr.bf16.mxu0 %v9582_v8  ;;  %v1540_v29 = vrot.slane %v10057_v7, 1 }
  0xb6   : > { %8531 = vmatmul.mubr.msk.bf16.gmra.mrb[4].mxu0 %vm573_vm0, %v1064_v15  ;;  %v10066_v15 = vld [vmem:[%s9720_s10 + $0x58] sm:$0xff]  }
  0xb7   : > { %8534 = vmatprep.mubr.msk.bf16.mxu0 %vm573_vm0, %v1066_v30  ;;  %8567 = vmatpush3.bf16.msra.mxu0 %v9582_v8  ;;  %v1539_v8 = vsel %vm1055_vm2, %v1536_v23, %v1538_v28  ;;  %v1541_v30 = vsel %vm1055_vm2, %v1538_v28, %v1540_v29  ;;  %v1542_v17 = vrot.slane %v10066_v15, 1 }
  0xb8   : > { %8568 = vmatprep.subr.bf16.mxu0 %v9583_v31 }
  0xbb   : > { %8569 = vmatpush3.bf16.msra.mxu0 %v9583_v31  ;;  %v10070_v31 = vld [vmem:[%s9720_s10 + $0x60] sm:$0xff]  }
  0xbc   : > { %8606 = vmatprep.subr.bf16.mxu0 %v9587_v33  ;;  %v1544_v25 = vrot.slane %v10070_v31, 1 }
  0xbe   : > { %8535 = vmatmul.mubr.msk.bf16.gmra.mrb[8].mxu0 %vm573_vm0, %v1068_v34  ;;  %v10078_v34 = vld [vmem:[%s9720_s10 + $0x68] sm:$0xff]  }
  0xbf   : > { %8538 = vmatprep.mubr.msk.bf16.mxu0 %vm573_vm0, %v1070_v35  ;;  %v1545_v35 = vsel %vm1055_vm2, %v1542_v17, %v1544_v25  ;;  %v1546_v37 = vrot.slane %v10078_v34, 1 }
  0xc6   : > { %8539 = vmatmul.mubr.msk.bf16.gmra.mrb[12].mxu0 %vm573_vm0, %v1072_v40  ;;  %v1548_v40 = vrot.slane %v10082_v36, 1 }
  0xc7   : > { %8542 = vmatprep.mubr.msk.bf16.mxu0 %vm573_vm0, %v1074_v38  ;;  %v1547_v38 = vsel %vm1055_vm2, %v1544_v25, %v1546_v37 }
  0xc8   : > { %v1549_v41 = vsel %vm1055_vm2, %v1546_v37, %v1548_v40 }
  0xce   : > { %8543 = vmatmul.mubr.msk.bf16.gmra.mrb[16].mxu0 %vm573_vm0, %v1076_v42  ;;  %v10094_v42 = vld [vmem:[%s9720_s10 + $0x80] sm:$0xff]  }
  0xcf   : > { %8546 = vmatprep.mubr.msk.bf16.mxu0 %vm573_vm0, %v1078_v45  ;;  %v1550_v45 = vrot.slane %v10090_v39, 1  ;;  %v1552_v49 = vrot.slane %v10094_v42, 1 }
  0xd1   : > { %v1551_v54 = vsel %vm1055_vm2, %v1548_v40, %v1550_v45  ;;  %v1553_v62 = vsel %vm1055_vm2, %v1550_v45, %v1552_v49  ;;  %v9608_v40 = vld [vmem:[%s13964_s1 + $0xa8] sm:$0xff]   ;;  %v1922_v45 = vshll.u32 %v10033_v1, 16 }
  0xd6   : > { %8547 = vmatmul.mubr.msk.bf16.gmra.mrb[20].mxu0 %vm573_vm0, %v1080_v46  ;;  %v10102_v46 = vld [vmem:[%s9720_s10 + $0x88] sm:$0xff]  }
  0xd7   : > { %8550 = vmatprep.mubr.msk.bf16.mxu0 %vm573_vm0, %v1082_v55  ;;  %v10105_v55 = vld [vmem:[%s9720_s10 + $0x90] sm:$0xff]   ;;  %v1554_v47 = vrot.slane %v10102_v46, 1 }
  0xde   : > { %8551 = vmatmul.mubr.msk.bf16.gmra.mrb[24].mxu0 %vm573_vm0, %v1084_v48  ;;  %v1556_v48 = vrot.slane %v10105_v55, 1 }
  0xdf   : > { %8554 = vmatprep.mubr.msk.bf16.mxu0 %vm573_vm0, %v1086_v50  ;;  %v1866_v50 = vshrl.u32 %v9991_v53, 16  ;;  %v1883_v53 = vshrl.u32 %v10003_v60, 16 }
  0xe0   : > { %v1559_v14 = vsel %vm1055_vm2, %v1556_v48, %v1558_v2  ;;  %v10162_v2 = vld [vmem:[%s13964_s1 + $0xc0] sm:$0xff]  }
  0xe1   : > { %v1868_v44 = vrot.slane %v1866_v50, 1  ;;  %v1924_v50 = vrot.slane %v1922_v45, 2 }
  0xe6   : > { %8555 = vmatmul.mubr.msk.bf16.gmra.mrb[28].mxu0 %vm573_vm0, %v1088_v18  ;;  %v1555_v18 = vsel %vm1055_vm2, %v1552_v49, %v1554_v47 }
  0xe7   : > { %8558 = vmatprep.mubr.msk.bf16.mxu0 %vm573_vm0, %v1090_v32  ;;  %v1557_v32 = vsel %vm1055_vm2, %v1554_v47, %v1556_v48  ;;  %v9609_v47 = vld [vmem:[%s13964_s1 + $0xb0] sm:$0xff]  }
  0xee   : > { %8559 = vmatmul.mubr.msk.bf16.gmra.mrb[32].mxu0 %vm573_vm0, %v1092_v59  ;;  %v1876_v59 = vrot.slane %v1874_v3, 1 }
  0xef   : > { %8570 = vmatprep.mubr.msk.bf16.mxu0 %vm573_vm0, %v1525_v61  ;;  %v1879_v61 = vrot.slane %v1877_v51, 2 }
  0xf6   : > { %8571 = vmatmul.mubr.msk.bf16.vlgmr.msra.gmra.mrb[0].mxu0 %vm573_vm0, %v1527_v4  ;;  %v1872_v4 = vor.u32 %v1871_v58, %v1868_v44  ;;  %v1940_v44 = vshll.u32 %v10053_v26, 16 }
  0xf7   : > { %8607 = vmatpush3.bf16.msra.mxu0 %v9587_v33  ;;  %8574 = vmatprep.mubr.msk.bf16.mxu0 %vm573_vm0, %v1529_v10  ;;  %v1543_v33 = vsel %vm1055_vm2, %v1540_v29, %v1542_v17  ;;  %v1880_v10 = vor.u32 %v1879_v61, %v1876_v59  ;;  %v1910_v29 = vshrl.u32 %v10019_v11, 16  ;;  %v1946_v59 = vshrl.u32 %v10057_v7, 16 }
  0xf8   : > { %8608 = vmatprep.subr.bf16.mxu0 %v9592_v12  ;;  %v1949_v61 = vshll.u32 %v10057_v7, 16 }
  0xfa   : > { %v1951_v13 = vrot.slane %v1949_v61, 2  ;;  %v2012_v61 = vshll.u32 %v10102_v46, 16 }
  0xfb   : > { %8609 = vmatpush3.bf16.msra.mxu0 %v9592_v12  ;;  %v1892_v12 = vshrl.u32 %v10007_v63, 16 }
  0xfc   : > { %8610 = vmatprep.subr.bf16.mxu0 %v9597_v16 }
  0xfe   : > { %8575 = vmatmul.mubr.msk.bf16.gmra.mrb[4].mxu0 %vm573_vm0, %v1531_v6  ;;  %v1888_v6 = vrot.slane %v1886_v56, 2  ;;  %v1939_v56 = vrot.slane %v1937_v43, 1 }
  0xff   : > { %8578 = vmatprep.mubr.msk.bf16.mxu0 %vm573_vm0, %v1533_v19  ;;  %8611 = vmatpush3.bf16.msra.mxu0 %v9597_v16  ;;  %v1885_v16 = vrot.slane %v1883_v53, 1  ;;  %v1881_v19 = vsel %vm1864_vm3, %v1872_v4, %v1880_v10  ;;  %v1942_v4 = vrot.slane %v1940_v44, 2 }
 0x100   : > { %8612 = vmatprep.subr.bf16.mxu0 %v9602_v21 }
 0x101   : > { %v1889_v23 = vor.u32 %v1888_v6, %v1885_v16  ;;  %v1955_v16 = vshrl.u32 %v10066_v15, 16  ;;  %v1958_v6 = vshll.u32 %v10066_v15, 16 }
 0x103   : > { %8613 = vmatpush3.bf16.msra.mxu0 %v9602_v21  ;;  %v1894_v21 = vrot.slane %v1892_v12, 1  ;;  %v1948_v12 = vrot.slane %v1946_v59, 1  ;;  %v2009_v59 = vshrl.u32 %v10102_v46, 16 }
 0x104   : > { %8650 = vmatprep.subr.bf16.mxu0 %v10049_v24 }
 0x105   : > { %v1898_v28 = vor.u32 %v1897_v22, %v1894_v21  ;;  %v1964_v21 = vshrl.u32 %v10070_v31, 16  ;;  %v1967_v22 = vshll.u32 %v10070_v31, 16 }
 0x106   : > { %8579 = vmatmul.mubr.msk.bf16.gmra.mrb[8].mxu0 %vm573_vm0, %v1535_v5  ;;  %v1901_v5 = vshrl.u32 %v10015_v9, 16 }
 0x107   : > { %8582 = vmatprep.mubr.msk.bf16.mxu0 %vm573_vm0, %v1537_v27  ;;  %v1904_v27 = vshll.u32 %v10015_v9, 16 }
 0x108   : > { %v1903_v17 = vrot.slane %v1901_v5, 1  ;;  %v1957_v5 = vrot.slane %v1955_v16, 1 }
 0x109   : > { %v1906_v25 = vrot.slane %v1904_v27, 2  ;;  %v1960_v27 = vrot.slane %v1958_v6, 2 }
 0x10e   : > { %8583 = vmatmul.mubr.msk.bf16.gmra.mrb[12].mxu0 %vm573_vm0, %v1539_v8  ;;  %v1913_v8 = vshll.u32 %v10019_v11, 16 }
 0x10f   : > { %8586 = vmatprep.mubr.msk.bf16.mxu0 %vm573_vm0, %v1541_v30  ;;  %v1890_v30 = vsel %vm1864_vm3, %v1880_v10, %v1889_v23 }
 0x110   : > { %v1915_v37 = vrot.slane %v1913_v8, 2  ;;  %v1969_v8 = vrot.slane %v1967_v22, 2 }
 0x116   : > { %8587 = vmatmul.mubr.msk.bf16.gmra.mrb[16].mxu0 %vm573_vm0, %v1543_v33  ;;  %v1899_v33 = vsel %vm1864_vm3, %v1889_v23, %v1898_v28 }
 0x117   : > { %8590 = vmatprep.mubr.msk.bf16.mxu0 %vm573_vm0, %v1545_v35  ;;  %v1912_v35 = vrot.slane %v1910_v29, 1  ;;  %v1966_v29 = vrot.slane %v1964_v21, 1 }
 0x119   : > { %v1916_v49 = vor.u32 %v1915_v37, %v1912_v35  ;;  %v1982_v35 = vshrl.u32 %v10082_v36, 16  ;;  %v1985_v37 = vshll.u32 %v10082_v36, 16 }
 0x11e   : > { %8591 = vmatmul.mubr.msk.bf16.gmra.mrb[20].mxu0 %vm573_vm0, %v1547_v38  ;;  %v1907_v38 = vor.u32 %v1906_v25, %v1903_v17  ;;  %v1973_v17 = vshrl.u32 %v10078_v34, 16  ;;  %v1976_v25 = vshll.u32 %v10078_v34, 16 }
 0x11f   : > { %8594 = vmatprep.mubr.msk.bf16.mxu0 %vm573_vm0, %v1549_v41  ;;  %v1919_v41 = vshrl.u32 %v10033_v1, 16 }
 0x120   : > { %v1908_v48 = vsel %vm1864_vm3, %v1898_v28, %v1907_v38  ;;  %v1917_v0 = vsel %vm1864_vm3, %v1907_v38, %v1916_v49  ;;  %v1975_v38 = vrot.slane %v1973_v17, 1 }
 0x126   : > { %8595 = vmatmul.mubr.msk.bf16.gmra.mrb[24].mxu0 %vm573_vm0, %v1551_v54  ;;  %v1928_v54 = vshrl.u32 %v10037_v20, 16 }
 0x127   : > { %8598 = vmatprep.mubr.msk.bf16.mxu0 %vm573_vm0, %v1553_v62  ;;  %v1931_v62 = vshll.u32 %v10037_v20, 16 }
 0x128   : > { %v1930_v3 = vrot.slane %v1928_v54, 1  ;;  %v1987_v54 = vrot.slane %v1985_v37, 2 }
 0x129   : > { %v1933_v51 = vrot.slane %v1931_v62, 2 }
 0x12b   : > { %v1934_v58 = vor.u32 %v1933_v51, %v1930_v3 }
 0x12e   : > { %8599 = vmatmul.mubr.msk.bf16.gmra.mrb[28].mxu0 %vm573_vm0, %v1555_v18  ;;  %v9610_v18 = vld [vmem:[%s13964_s1 + $0xb8] sm:$0xff]  }
 0x12f   : > { %8602 = vmatprep.mubr.msk.bf16.mxu0 %vm573_vm0, %v1557_v32 }
 0x136   : > { %8603 = vmatmul.mubr.msk.bf16.gmra.mrb[32].mxu0 %vm573_vm0, %v1559_v14  ;;  %v1943_v14 = vor.u32 %v1942_v4, %v1939_v56  ;;  %v2018_v56 = vshrl.u32 %v10105_v55, 16  ;;  %v2021_v4 = vshll.u32 %v10105_v55, 16 }
 0x137   : > { %8614 = vmatprep.mubr.msk.bf16.mxu0 %vm573_vm0, %v1881_v19  ;;  %v1952_v19 = vor.u32 %v1951_v13, %v1948_v12  ;;  %v2011_v12 = vrot.slane %v2009_v59, 1  ;;  %v2014_v13 = vrot.slane %v2012_v61, 2  ;;  %v2668_v61 = vld [vmem:[%s9720_s10 + $0x10] sm:$0xc] }
 0x138   : > { %v1944_v23 = vsel %vm1864_vm3, %v1934_v58, %v1943_v14  ;;  %v2020_v6 = vrot.slane %v2018_v56, 1 }
 0x139   : > { %v1953_v28 = vsel %vm1864_vm3, %v1943_v14, %v1952_v19  ;;  %v10199_v14 = vld [vmem:[%s9720_s10 + $0x98] ss:$0 sps:$4 sm:$0x33]   ;;  %v2015_v21 = vor.u32 %v2014_v13, %v2011_v12  ;;  %v10293_v13 = vld [vmem:[%s9720_s10 + $0x20] sm:$0xff]  }
 0x13a   : > { %v2027_v22 = vshrl.u32 %v10199_v14, 16 }
 0x13e   : > { %8615 = vmatmul.mubr.msk.bf16.vlgmr.msra.gmra.mrb[0].mxu0 %vm573_vm0, %v1890_v30  ;;  %v1961_v30 = vor.u32 %v1960_v27, %v1957_v5  ;;  %v2326_v27 = vld [vmem:[%s9720_s10 + $0x8] sm:$0xc] }
 0x13f   : > { %8651 = vmatpush3.bf16.msra.mxu0 %v10049_v24  ;;  %8618 = vmatprep.mubr.msk.bf16.mxu0 %vm573_vm0, %v1899_v33  ;;  %v1921_v24 = vrot.slane %v1919_v41, 1  ;;  %v1970_v33 = vor.u32 %v1969_v8, %v1966_v29  ;;  %v1978_v41 = vrot.slane %v1976_v25, 2  ;;  %v2029_v29 = vrot.slane %v2027_v22, 1  ;;  %v10305_v22 = vld [vmem:[%s9720_s10 + $0x30] sm:$0xff]  }
 0x140   : > { %8652 = vmatprep.subr.bf16.mxu0 %v9608_v40  ;;  %v7778_v17 = vcombine.low %v2326_v27, %v9986_v52  ;;  %v2345_v52 = vrot.slane %v10007_v63, 2  ;;  %v9615_v63 = vld [vmem:[%s13964_s1 + $0xd0] sm:$0xff]   ;;  %v9625_v27 = vld [vmem:[%s13964_s1 + $0xe8] sm:$0xff]  }
 0x141   : > { %v1925_v32 = vor.u32 %v1924_v50, %v1921_v24  ;;  %v1971_v45 = vsel %vm1864_vm3, %v1961_v30, %v1970_v33  ;;  %v1979_v62 = vor.u32 %v1978_v41, %v1975_v38  ;;  %v2000_v50 = vshrl.u32 %v10094_v42, 16 }
 0x142   : > { %v2343_v38 = vrot.slane %v10003_v60, 2  ;;  %v2349_v60 = vrot.slane %v10019_v11, 2  ;;  %v2353_v11 = vrot.slane %v10037_v20, 2 }
 0x143   : > { %8653 = vmatpush3.bf16.msra.mxu0 %v9608_v40  ;;  %v1926_v53 = vsel %vm1864_vm3, %v1916_v49, %v1925_v32  ;;  %v1935_v10 = vsel %vm1864_vm3, %v1925_v32, %v1934_v58  ;;  %v1962_v40 = vsel %vm1864_vm3, %v1952_v19, %v1961_v30  ;;  %v1984_v49 = vrot.slane %v1982_v35, 1 }
 0x144   : > { %8654 = vmatprep.subr.bf16.mxu0 %v9609_v47  ;;  %v1980_v3 = vsel %vm1864_vm3, %v1970_v33, %v1979_v62  ;;  %v2002_v43 = vrot.slane %v2000_v50, 1  ;;  %v2023_v19 = vrot.slane %v2021_v4, 2  ;;  %v2340_v33 = vrot.slane %v7778_v17, 2  ;;  %v10284_v4 = vld [vmem:[%s9720_s10 + $0x18] sm:$0xff]   ;;  %v10323_v17 = vld [vmem:[%s9720_s10 + $0x40] sm:$0xff]  }
 0x145   : > { %v1988_v24 = vor.u32 %v1987_v54, %v1984_v49  ;;  %v2341_v35 = vrot.slane %v9994_v57, 2  ;;  %v9614_v57 = vld [vmem:[%s13964_s1 + $0xc8] sm:$0xff]   ;;  %v2347_v49 = vrot.slane %v10015_v9, 2  ;;  %v2351_v9 = vrot.slane %v10033_v1, 2 }
 0x146   : > { %8619 = vmatmul.mubr.msk.bf16.gmra.mrb[4].mxu0 %vm573_vm0, %v1908_v48  ;;  %v1994_v48 = vshll.u32 %v10090_v39, 16  ;;  %v2024_v5 = vor.u32 %v2023_v19, %v2020_v6  ;;  %v2355_v1 = vrot.slane %v10053_v26, 2  ;;  %v2357_v50 = vrot.slane %v10057_v7, 2  ;;  %v10297_v6 = vld [vmem:[%s9720_s10 + $0x28] sm:$0xff]  }
 0x147   : > { %8622 = vmatprep.mubr.msk.bf16.mxu0 %vm573_vm0, %v1917_v0  ;;  %8655 = vmatpush3.bf16.msra.mxu0 %v9609_v47  ;;  %v1991_v47 = vshrl.u32 %v10090_v39, 16  ;;  %v2003_v0 = vshll.u32 %v10094_v42, 16  ;;  %v1989_v32 = vsel %vm1864_vm3, %v1979_v62, %v1988_v24  ;;  %v2344_v41 = vsel %vm2339_vm4, %v2341_v35, %v2343_v38 }
 0x148   : > { %8656 = vmatprep.subr.bf16.mxu0 %v9610_v18  ;;  %v2025_v30 = vsel %vm1864_vm3, %v2015_v21, %v2024_v5  ;;  %v2348_v54 = vsel %vm2339_vm4, %v2345_v52, %v2347_v49  ;;  %v2350_v62 = vsel %vm2339_vm4, %v2347_v49, %v2349_v60  ;;  %v2356_v20 = vsel %vm2339_vm4, %v2353_v11, %v2355_v1 }
 0x149   : > { %v1993_v51 = vrot.slane %v1991_v47, 1  ;;  %v2005_v44 = vrot.slane %v2003_v0, 2  ;;  %v9620_v47 = vld [vmem:[%s13964_s1 + $0xe0] sm:$0xff]   ;;  %v2358_v0 = vsel %vm2339_vm4, %v2355_v1, %v2357_v50  ;;  %v2363_v26 = vrot.slane %v10078_v34, 2  ;;  %v10372_v1 = vld [vmem:[%s9720_s10 + $0x78] sm:$0xff]  }
 0x14a   : > { %v2365_v7 = vrot.slane %v10082_v36, 2  ;;  %v2371_v34 = vrot.slane %v10102_v46, 2  ;;  %v2373_v36 = vrot.slane %v10105_v55, 2  ;;  %v2375_v46 = vrot.slane %v10199_v14, 2 }
 0x14b   : > { %8657 = vmatpush3.bf16.msra.mxu0 %v9610_v18  ;;  %v1996_v18 = vrot.slane %v1994_v48, 2  ;;  %v2352_v48 = vsel %vm2339_vm4, %v2349_v60, %v2351_v9  ;;  %v2810_v19 = vrot.slane %v10293_v13, 2 }
 0x14c   : > { %8694 = vmatprep.subr.bf16.mxu0 %v10162_v2  ;;  %v2376_v12 = vsel %vm2339_vm4, %v2373_v36, %v2375_v46  ;;  %v9639_v46 = vld [vmem:[%s9720_s10 + $0xa0] ss:$0 sps:$4 sm:$0x33]  }
 0x14d   : > { %v1997_v58 = vor.u32 %v1996_v18, %v1993_v51  ;;  %v2361_v51 = vrot.slane %v10070_v31, 2  ;;  %v2367_v31 = vrot.slane %v10090_v39, 2 }
 0x14e   : > { %8623 = vmatmul.mubr.msk.bf16.gmra.mrb[8].mxu0 %vm573_vm0, %v1926_v53  ;;  %v2006_v53 = vor.u32 %v2005_v44, %v2002_v43  ;;  %v2369_v44 = vrot.slane %v10094_v42, 2  ;;  %v2374_v42 = vsel %vm2339_vm4, %v2371_v34, %v2373_v36  ;;  %v3158_v36 = vshrl.u32 %v10284_v4, 16 }
 0x14f   : > { %8626 = vmatprep.mubr.msk.bf16.mxu0 %vm573_vm0, %v1935_v10  ;;  %v1998_v10 = vsel %vm1864_vm3, %v1988_v24, %v1997_v58  ;;  %v2354_v24 = vsel %vm2339_vm4, %v2351_v9, %v2353_v11  ;;  %v2364_v43 = vsel %vm2339_vm4, %v2361_v51, %v2363_v26 }
 0x150   : > { %v2007_v16 = vsel %vm1864_vm3, %v1997_v58, %v2006_v53  ;;  %v2368_v58 = vsel %vm2339_vm4, %v2365_v7, %v2367_v31  ;;  %v2370_v59 = vsel %vm2339_vm4, %v2367_v31, %v2369_v44  ;;  %v2372_v39 = vsel %vm2339_vm4, %v2369_v44, %v2371_v34 }
 0x156   : > { %8627 = vmatmul.mubr.msk.bf16.gmra.mrb[12].mxu0 %vm573_vm0, %v1944_v23  ;;  %v2030_v23 = vshll.u32 %v10199_v14, 16  ;;  %v2812_v14 = vrot.slane %v10297_v6, 2 }
 0x157   : > { %8630 = vmatprep.mubr.msk.bf16.mxu0 %vm573_vm0, %v1953_v28  ;;  %v2016_v28 = vsel %vm1864_vm3, %v2006_v53, %v2015_v21  ;;  %v10276_v53 = vld [vmem:[%s9720_s10 + $0x14] sm:$0xf] }
 0x158   : > { %v2032_v8 = vrot.slane %v2030_v23, 2  ;;  %v10281_v56 = vcombine.low %v2668_v61, %v10276_v53  ;;  %v2813_v23 = vsel %vm2339_vm4, %v2810_v19, %v2812_v14  ;;  %v3161_v61 = vshll.u32 %v10284_v4, 16 }
 0x15a   : > { %v2033_v25 = vor.u32 %v2032_v8, %v2029_v29  ;;  %v2807_v55 = vrot.slane %v10281_v56, 2  ;;  %v9630_v8 = vld [vmem:[%s13964_s1 + $0xf0] sm:$0xff]   ;;  %v3153_v34 = vshll.u32 %v10281_v56, 16 }
 0x15c   : > { %v2034_v37 = vsel %vm1864_vm3, %v2024_v5, %v2033_v25  ;;  %v10309_v5 = vld [vmem:[%s9720_s10 + $0x38] sm:$0xff]  }
 0x15d   : > { %v2816_v29 = vrot.slane %v10309_v5, 2 }
 0x15e   : > { %8631 = vmatmul.mubr.msk.bf16.gmra.mrb[16].mxu0 %vm573_vm0, %v1962_v40  ;;  %v2342_v40 = vsel %vm2339_vm4, %v2340_v33, %v2341_v35  ;;  %v10327_v33 = vld [vmem:[%s9720_s10 + $0x48] sm:$0xff]   ;;  %v9635_v35 = vld [vmem:[%s13964_s1 + $0xf8] sm:$0xff]  }
 0x15f   : > { %8634 = vmatprep.mubr.msk.bf16.mxu0 %vm573_vm0, %v1971_v45  ;;  %v2346_v45 = vsel %vm2339_vm4, %v2343_v38, %v2345_v52  ;;  %v10339_v38 = vld [vmem:[%s13964_s1 + $0x100] sm:$0xff]  }
 0x166   : > { %8635 = vmatmul.mubr.msk.bf16.gmra.mrb[20].mxu0 %vm573_vm0, %v1980_v3  ;;  %v2359_v3 = vrot.slane %v10066_v15, 2  ;;  %v2366_v15 = vsel %vm2339_vm4, %v2363_v26, %v2365_v7 }
 0x167   : > { %8638 = vmatprep.mubr.msk.bf16.mxu0 %vm573_vm0, %v1989_v32 }
 0x168   : > { %v2360_v18 = vsel %vm2339_vm4, %v2357_v50, %v2359_v3  ;;  %v2362_v32 = vsel %vm2339_vm4, %v2359_v3, %v2361_v51  ;;  %v10380_v3 = vld [vmem:[%s9720_s10 + $0x80] sm:$0xff]  }
 0x16e   : > { %8639 = vmatmul.mubr.msk.bf16.gmra.mrb[24].mxu0 %vm573_vm0, %v1998_v10  ;;  %v2808_v10 = vrot.slane %v10284_v4, 2 }
 0x16f   : > { %8642 = vmatprep.mubr.msk.bf16.mxu0 %vm573_vm0, %v2007_v16 }
 0x170   : > { %v2809_v16 = vsel %vm2339_vm4, %v2807_v55, %v2808_v10  ;;  %v2811_v21 = vsel %vm2339_vm4, %v2808_v10, %v2810_v19  ;;  %v3155_v10 = vrot.slane %v3153_v34, 3  ;;  %v2842_v19 = vrot.slane %v9639_v46, 2 }
 0x176   : > { %8643 = vmatmul.mubr.msk.bf16.gmra.mrb[28].mxu0 %vm573_vm0, %v2016_v28  ;;  %v2814_v28 = vrot.slane %v10305_v22, 2 }
 0x177   : > { %8646 = vmatprep.mubr.msk.bf16.mxu0 %vm573_vm0, %v2025_v30 }
 0x178   : > { %v2815_v30 = vsel %vm2339_vm4, %v2812_v14, %v2814_v28  ;;  %v2817_v25 = vsel %vm2339_vm4, %v2814_v28, %v2816_v29  ;;  %v3170_v14 = vshll.u32 %v10293_v13, 16  ;;  %v3179_v28 = vshll.u32 %v10297_v6, 16 }
 0x17e   : > { %8647 = vmatmul.mubr.msk.bf16.gmra.mrb[32].mxu0 %vm573_vm0, %v2034_v37  ;;  %v2818_v37 = vrot.slane %v10323_v17, 2 }
 0x17f   : > { %8658 = vmatprep.mubr.msk.bf16.mxu0 %vm573_vm0, %v2342_v40  ;;  %v2820_v40 = vrot.slane %v10327_v33, 2 }
 0x180   : > { %v2819_v52 = vsel %vm2339_vm4, %v2816_v29, %v2818_v37 }
 0x186   : > { %8659 = vmatmul.mubr.msk.bf16.vlgmr.msra.gmra.mrb[0].mxu0 %vm573_vm0, %v2344_v41  ;;  %v10343_v41 = vld [vmem:[%s9720_s10 + $0x50] sm:$0xff]  }
 0x187   : > { %8695 = vmatpush3.bf16.msra.mxu0 %v10162_v2  ;;  %8662 = vmatprep.mubr.msk.bf16.mxu0 %vm573_vm0, %v2346_v45  ;;  %v9616_v2 = vld [vmem:[%s13964_s1 + $0xd8] sm:$0xff]   ;;  %v2821_v45 = vsel %vm2339_vm4, %v2818_v37, %v2820_v40  ;;  %v2822_v49 = vrot.slane %v10343_v41, 2  ;;  %v3181_v37 = vrot.slane %v3179_v28, 3  ;;  %v3221_v46 = vshrl.u32 %v10343_v41, 16 }
 0x188   : > { %8696 = vmatprep.subr.bf16.mxu0 %v9614_v57 }
 0x18b   : > { %8697 = vmatpush3.bf16.msra.mxu0 %v9614_v57  ;;  %v10347_v57 = vld [vmem:[%s9720_s10 + $0x58] sm:$0xff]  }
 0x18c   : > { %8698 = vmatprep.subr.bf16.mxu0 %v9615_v63  ;;  %v2824_v60 = vrot.slane %v10347_v57, 2 }
 0x18e   : > { %8663 = vmatmul.mubr.msk.bf16.gmra.mrb[4].mxu0 %vm573_vm0, %v2348_v54  ;;  %v10356_v54 = vld [vmem:[%s9720_s10 + $0x60] sm:$0xff]  }
 0x18f   : > { %8666 = vmatprep.mubr.msk.bf16.mxu0 %vm573_vm0, %v2350_v62  ;;  %8699 = vmatpush3.bf16.msra.mxu0 %v9615_v63  ;;  %v2823_v63 = vsel %vm2339_vm4, %v2820_v40, %v2822_v49  ;;  %v2825_v62 = vsel %vm2339_vm4, %v2822_v49, %v2824_v60  ;;  %v2826_v9 = vrot.slane %v10356_v54, 2 }
 0x190   : > { %8700 = vmatprep.subr.bf16.mxu0 %v9616_v2 }
 0x193   : > { %8701 = vmatpush3.bf16.msra.mxu0 %v9616_v2  ;;  %v10360_v2 = vld [vmem:[%s9720_s10 + $0x68] sm:$0xff]  }
 0x194   : > { %8738 = vmatprep.subr.bf16.mxu0 %v9620_v47  ;;  %v2828_v11 = vrot.slane %v10360_v2, 2 }
 0x196   : > { %8667 = vmatmul.mubr.msk.bf16.gmra.mrb[8].mxu0 %vm573_vm0, %v2352_v48  ;;  %v10368_v48 = vld [vmem:[%s9720_s10 + $0x70] sm:$0xff]  }
 0x197   : > { %8670 = vmatprep.mubr.msk.bf16.mxu0 %vm573_vm0, %v2354_v24  ;;  %v2829_v24 = vsel %vm2339_vm4, %v2826_v9, %v2828_v11  ;;  %v2830_v50 = vrot.slane %v10368_v48, 2 }
 0x19e   : > { %8671 = vmatmul.mubr.msk.bf16.gmra.mrb[12].mxu0 %vm573_vm0, %v2356_v20  ;;  %v2832_v20 = vrot.slane %v10372_v1, 2 }
 0x19f   : > { %8674 = vmatprep.mubr.msk.bf16.mxu0 %vm573_vm0, %v2358_v0  ;;  %v2831_v0 = vsel %vm2339_vm4, %v2828_v11, %v2830_v50 }
 0x1a0   : > { %v2833_v51 = vsel %vm2339_vm4, %v2830_v50, %v2832_v20 }
 0x1a6   : > { %8675 = vmatmul.mubr.msk.bf16.gmra.mrb[16].mxu0 %vm573_vm0, %v2360_v18  ;;  %v10384_v18 = vld [vmem:[%s9720_s10 + $0x88] sm:$0xff]  }
 0x1a7   : > { %8678 = vmatprep.mubr.msk.bf16.mxu0 %vm573_vm0, %v2362_v32  ;;  %v2834_v32 = vrot.slane %v10380_v3, 2  ;;  %v2836_v26 = vrot.slane %v10384_v18, 2 }
 0x1a9   : > { %v2835_v7 = vsel %vm2339_vm4, %v2832_v20, %v2834_v32  ;;  %v2837_v31 = vsel %vm2339_vm4, %v2834_v32, %v2836_v26  ;;  %v9641_v20 = vld [vmem:[%s13964_s1 + $0x108] sm:$0xff]   ;;  %v3206_v32 = vshll.u32 %v10323_v17, 16 }
 0x1ae   : > { %8679 = vmatmul.mubr.msk.bf16.gmra.mrb[20].mxu0 %vm573_vm0, %v2364_v43  ;;  %v10392_v43 = vld [vmem:[%s9720_s10 + $0x90] sm:$0xff]  }
 0x1af   : > { %8682 = vmatprep.mubr.msk.bf16.mxu0 %vm573_vm0, %v2366_v15  ;;  %v10395_v15 = vld [vmem:[%s9720_s10 + $0x98] sm:$0xff]   ;;  %v2838_v44 = vrot.slane %v10392_v43, 2 }
 0x1b6   : > { %8683 = vmatmul.mubr.msk.bf16.gmra.mrb[24].mxu0 %vm573_vm0, %v2368_v58  ;;  %v2840_v58 = vrot.slane %v10395_v15, 2 }
 0x1b7   : > { %8686 = vmatprep.mubr.msk.bf16.mxu0 %vm573_vm0, %v2370_v59  ;;  %v3150_v59 = vshrl.u32 %v10281_v56, 16  ;;  %v3167_v56 = vshrl.u32 %v10293_v13, 16 }
 0x1b8   : > { %v2843_v29 = vsel %vm2339_vm4, %v2840_v58, %v2842_v19 }
 0x1b9   : > { %v3152_v55 = vrot.slane %v3150_v59, 2  ;;  %v3208_v59 = vrot.slane %v3206_v32, 3 }
 0x1be   : > { %8687 = vmatmul.mubr.msk.bf16.gmra.mrb[28].mxu0 %vm573_vm0, %v2372_v39  ;;  %v2839_v39 = vsel %vm2339_vm4, %v2836_v26, %v2838_v44 }
 0x1bf   : > { %8690 = vmatprep.mubr.msk.bf16.mxu0 %vm573_vm0, %v2374_v42  ;;  %v2841_v42 = vsel %vm2339_vm4, %v2838_v44, %v2840_v58  ;;  %v9642_v44 = vld [vmem:[%s13964_s1 + $0x110] sm:$0xff]  }
 0x1c6   : > { %8691 = vmatmul.mubr.msk.bf16.gmra.mrb[32].mxu0 %vm573_vm0, %v2376_v12  ;;  %v3160_v12 = vrot.slane %v3158_v36, 2 }
 0x1c7   : > { %8702 = vmatprep.mubr.msk.bf16.mxu0 %vm573_vm0, %v2809_v16  ;;  %v3163_v16 = vrot.slane %v3161_v61, 3 }
 0x1ce   : > { %8703 = vmatmul.mubr.msk.bf16.vlgmr.msra.gmra.mrb[0].mxu0 %vm573_vm0, %v2811_v21  ;;  %v3156_v21 = vor.u32 %v3155_v10, %v3152_v55  ;;  %v3224_v55 = vshll.u32 %v10343_v41, 16 }
 0x1cf   : > { %8739 = vmatpush3.bf16.msra.mxu0 %v9620_v47  ;;  %8706 = vmatprep.mubr.msk.bf16.mxu0 %vm573_vm0, %v2813_v23  ;;  %v2827_v47 = vsel %vm2339_vm4, %v2824_v60, %v2826_v9  ;;  %v3164_v23 = vor.u32 %v3163_v16, %v3160_v12  ;;  %v3194_v60 = vshrl.u32 %v10309_v5, 16  ;;  %v3230_v12 = vshrl.u32 %v10347_v57, 16 }
 0x1d0   : > { %8740 = vmatprep.subr.bf16.mxu0 %v9625_v27  ;;  %v3233_v16 = vshll.u32 %v10347_v57, 16 }
 0x1d3   : > { %8741 = vmatpush3.bf16.msra.mxu0 %v9625_v27  ;;  %v3176_v27 = vshrl.u32 %v10297_v6, 16 }
 0x1d4   : > { %8742 = vmatprep.subr.bf16.mxu0 %v9630_v8 }
 0x1d6   : > { %8707 = vmatmul.mubr.msk.bf16.gmra.mrb[4].mxu0 %vm573_vm0, %v2815_v30  ;;  %v3172_v30 = vrot.slane %v3170_v14, 3  ;;  %v3226_v14 = vrot.slane %v3224_v55, 3 }
 0x1d7   : > { %8710 = vmatprep.mubr.msk.bf16.mxu0 %vm573_vm0, %v2817_v25  ;;  %8743 = vmatpush3.bf16.msra.mxu0 %v9630_v8  ;;  %v3169_v8 = vrot.slane %v3167_v56, 2  ;;  %v3165_v25 = vsel %vm3148_vm5, %v3156_v21, %v3164_v23  ;;  %v3223_v56 = vrot.slane %v3221_v46, 2 }
 0x1d8   : > { %8744 = vmatprep.subr.bf16.mxu0 %v9635_v35 }
 0x1d9   : > { %v3173_v40 = vor.u32 %v3172_v30, %v3169_v8  ;;  %v3227_v28 = vor.u32 %v3226_v14, %v3223_v56  ;;  %v3242_v8 = vshll.u32 %v10356_v54, 16  ;;  %v3305_v56 = vshll.u32 %v10395_v15, 16 }
 0x1db   : > { %8745 = vmatpush3.bf16.msra.mxu0 %v9635_v35  ;;  %v3178_v35 = vrot.slane %v3176_v27, 2  ;;  %v3235_v27 = vrot.slane %v3233_v16, 3 }
 0x1dc   : > { %8782 = vmatprep.subr.bf16.mxu0 %v10339_v38 }
 0x1dd   : > { %v3182_v49 = vor.u32 %v3181_v37, %v3178_v35  ;;  %v3251_v35 = vshll.u32 %v10360_v2, 16 }
 0x1de   : > { %8711 = vmatmul.mubr.msk.bf16.gmra.mrb[8].mxu0 %vm573_vm0, %v2819_v52  ;;  %v3185_v52 = vshrl.u32 %v10305_v22, 16 }
 0x1df   : > { %8714 = vmatprep.mubr.msk.bf16.mxu0 %vm573_vm0, %v2821_v45  ;;  %v3188_v45 = vshll.u32 %v10305_v22, 16 }
 0x1e0   : > { %v3187_v9 = vrot.slane %v3185_v52, 2  ;;  %v3244_v52 = vrot.slane %v3242_v8, 3  ;;  %v3307_v8 = vrot.slane %v3305_v56, 3 }
 0x1e1   : > { %v3190_v11 = vrot.slane %v3188_v45, 3 }
 0x1e6   : > { %8715 = vmatmul.mubr.msk.bf16.gmra.mrb[12].mxu0 %vm573_vm0, %v2823_v63  ;;  %v3197_v63 = vshll.u32 %v10309_v5, 16 }
 0x1e7   : > { %8718 = vmatprep.mubr.msk.bf16.mxu0 %vm573_vm0, %v2825_v62  ;;  %v3174_v62 = vsel %vm3148_vm5, %v3164_v23, %v3173_v40  ;;  %v3232_v23 = vrot.slane %v3230_v12, 2  ;;  %v3296_v12 = vshll.u32 %v10392_v43, 16 }
 0x1e8   : > { %v3199_v50 = vrot.slane %v3197_v63, 3 }
 0x1e9   : > { %v3236_v30 = vor.u32 %v3235_v27, %v3232_v23  ;;  %v3298_v23 = vrot.slane %v3296_v12, 3  ;;  %v10483_v27 = vld [vmem:[%s9720_s10 + $0xa0] ss:$0 sps:$4 sm:$0x77]  }
 0x1eb   : > { %v3237_v45 = vsel %vm3148_vm5, %v3227_v28, %v3236_v30 }
 0x1ee   : > { %8719 = vmatmul.mubr.msk.bf16.gmra.mrb[16].mxu0 %vm573_vm0, %v2827_v47  ;;  %v3183_v47 = vsel %vm3148_vm5, %v3173_v40, %v3182_v49 }
 0x1ef   : > { %8722 = vmatprep.mubr.msk.bf16.mxu0 %vm573_vm0, %v2829_v24  ;;  %v3196_v24 = vrot.slane %v3194_v60, 2  ;;  %v3253_v60 = vrot.slane %v3251_v35, 3  ;;  %v3314_v35 = vshll.u32 %v10483_v27, 16 }
 0x1f1   : > { %v3200_v26 = vor.u32 %v3199_v50, %v3196_v24  ;;  %v3269_v24 = vshll.u32 %v10372_v1, 16 }
 0x1f6   : > { %8723 = vmatmul.mubr.msk.bf16.gmra.mrb[20].mxu0 %vm573_vm0, %v2831_v0  ;;  %v3191_v0 = vor.u32 %v3190_v11, %v3187_v9  ;;  %v3260_v9 = vshll.u32 %v10368_v48, 16 }
 0x1f7   : > { %8726 = vmatprep.mubr.msk.bf16.mxu0 %vm573_vm0, %v2833_v51  ;;  %v3203_v51 = vshrl.u32 %v10323_v17, 16 }
 0x1f8   : > { %v3192_v58 = vsel %vm3148_vm5, %v3182_v49, %v3191_v0  ;;  %v3201_v34 = vsel %vm3148_vm5, %v3191_v0, %v3200_v26  ;;  %v3262_v0 = vrot.slane %v3260_v9, 3 }
 0x1fe   : > { %8727 = vmatmul.mubr.msk.bf16.gmra.mrb[24].mxu0 %vm573_vm0, %v2835_v7  ;;  %v3212_v7 = vshrl.u32 %v10327_v33, 16 }
 0x1ff   : > { %8730 = vmatprep.mubr.msk.bf16.mxu0 %vm573_vm0, %v2837_v31  ;;  %v3215_v31 = vshll.u32 %v10327_v33, 16 }
 0x200   : > { %v3214_v36 = vrot.slane %v3212_v7, 2 }
 0x201   : > { %v3217_v61 = vrot.slane %v3215_v31, 3  ;;  %v3275_v31 = vshrl.u32 %v10380_v3, 16 }
 0x203   : > { %v3218_v10 = vor.u32 %v3217_v61, %v3214_v36  ;;  %v3277_v36 = vrot.slane %v3275_v31, 2 }
 0x205   : > { %v3228_v37 = vsel %vm3148_vm5, %v3218_v10, %v3227_v28 }
 0x206   : > { %8731 = vmatmul.mubr.msk.bf16.gmra.mrb[28].mxu0 %vm573_vm0, %v2839_v39  ;;  %v9643_v39 = vld [vmem:[%s13964_s1 + $0x118] sm:$0xff]  }
 0x207   : > { %8734 = vmatprep.mubr.msk.bf16.mxu0 %vm573_vm0, %v2841_v42 }
 0x20e   : > { %8735 = vmatmul.mubr.msk.bf16.gmra.mrb[32].mxu0 %vm573_vm0, %v2843_v29  ;;  %v3239_v29 = vshrl.u32 %v10356_v54, 16 }
 0x20f   : > { %8746 = vmatprep.mubr.msk.bf16.mxu0 %vm573_vm0, %v3165_v25  ;;  %v3248_v25 = vshrl.u32 %v10360_v2, 16 }
 0x210   : > { %v3241_v40 = vrot.slane %v3239_v29, 2 }
 0x211   : > { %v3250_v49 = vrot.slane %v3248_v25, 2  ;;  %v3311_v25 = vshrl.u32 %v10483_v27, 16 }
 0x212   : > { %v3245_v63 = vor.u32 %v3244_v52, %v3241_v40  ;;  %v3610_v40 = vld [vmem:[%s9720_s10 + $0x10] sm:$0x8] }
 0x213   : > { %v3254_v11 = vor.u32 %v3253_v60, %v3250_v49  ;;  %v3316_v49 = vrot.slane %v3314_v35, 3 }
 0x214   : > { %v3246_v50 = vsel %vm3148_vm5, %v3236_v30, %v3245_v63 }
 0x216   : > { %8747 = vmatmul.mubr.msk.bf16.vlgmr.msra.gmra.mrb[0].mxu0 %vm573_vm0, %v3174_v62  ;;  %v3257_v62 = vshrl.u32 %v10368_v48, 16 }
 0x217   : > { %8783 = vmatpush3.bf16.msra.mxu0 %v10339_v38  ;;  %8750 = vmatprep.mubr.msk.bf16.mxu0 %vm573_vm0, %v3183_v47  ;;  %v3205_v38 = vrot.slane %v3203_v51, 2  ;;  %v3266_v47 = vshrl.u32 %v10372_v1, 16  ;;  %v3255_v51 = vsel %vm3148_vm5, %v3245_v63, %v3254_v11  ;;  %v7889_v63 = vcombine.low %v3610_v40, %v10276_v53 }
 0x218   : > { %8784 = vmatprep.subr.bf16.mxu0 %v9641_v20  ;;  %v3629_v53 = vrot.slane %v10297_v6, 3  ;;  %v3637_v6 = vrot.slane %v10327_v33, 3  ;;  %v3645_v33 = vrot.slane %v10360_v2, 3  ;;  %v3653_v2 = vrot.slane %v10384_v18, 3 }
 0x219   : > { %v3209_v42 = vor.u32 %v3208_v59, %v3205_v38  ;;  %v3268_v32 = vrot.slane %v3266_v47, 2  ;;  %v3284_v38 = vshrl.u32 %v10384_v18, 16  ;;  %v3287_v59 = vshll.u32 %v10384_v18, 16 }
 0x21a   : > { %v3624_v9 = vrot.slane %v7889_v63, 3 }
 0x21b   : > { %8785 = vmatpush3.bf16.msra.mxu0 %v9641_v20  ;;  %v3210_v19 = vsel %vm3148_vm5, %v3200_v26, %v3209_v42  ;;  %v3219_v21 = vsel %vm3148_vm5, %v3209_v42, %v3218_v10  ;;  %v3259_v20 = vrot.slane %v3257_v62, 2  ;;  %v3271_v26 = vrot.slane %v3269_v24, 3 }
 0x21c   : > { %8786 = vmatprep.subr.bf16.mxu0 %v9642_v44  ;;  %v3286_v42 = vrot.slane %v3284_v38, 2  ;;  %v3289_v46 = vrot.slane %v3287_v59, 3  ;;  %v3293_v10 = vshrl.u32 %v10392_v43, 16 }
 0x21d   : > { %v3263_v7 = vor.u32 %v3262_v0, %v3259_v20 }
 0x21e   : > { %8751 = vmatmul.mubr.msk.bf16.gmra.mrb[4].mxu0 %vm573_vm0, %v3192_v58  ;;  %v3272_v58 = vor.u32 %v3271_v26, %v3268_v32  ;;  %v3290_v16 = vor.u32 %v3289_v46, %v3286_v42 }
 0x21f   : > { %8754 = vmatprep.mubr.msk.bf16.mxu0 %vm573_vm0, %v3201_v34  ;;  %8787 = vmatpush3.bf16.msra.mxu0 %v9642_v44  ;;  %v3278_v44 = vshll.u32 %v10380_v3, 16  ;;  %v3264_v34 = vsel %vm3148_vm5, %v3254_v11, %v3263_v7  ;;  %v3625_v11 = vrot.slane %v10284_v4, 3  ;;  %v3631_v4 = vrot.slane %v10305_v22, 3 }
 0x220   : > { %8788 = vmatprep.subr.bf16.mxu0 %v9643_v39  ;;  %v3639_v22 = vrot.slane %v10343_v41, 3  ;;  %v3647_v41 = vrot.slane %v10368_v48, 3  ;;  %v3655_v48 = vrot.slane %v10392_v43, 3 }
 0x221   : > { %v3280_v61 = vrot.slane %v3278_v44, 3  ;;  %v3626_v24 = vsel %vm3623_vm6, %v3624_v9, %v3625_v11  ;;  %v3632_v32 = vsel %vm3623_vm6, %v3629_v53, %v3631_v4 }
 0x222   : > { %v3640_v44 = vsel %vm3623_vm6, %v3637_v6, %v3639_v22  ;;  %v3656_v42 = vsel %vm3623_vm6, %v3653_v2, %v3655_v48 }
 0x223   : > { %8789 = vmatpush3.bf16.msra.mxu0 %v9643_v39  ;;  %v3273_v39 = vsel %vm3148_vm5, %v3263_v7, %v3272_v58  ;;  %v3281_v55 = vor.u32 %v3280_v61, %v3277_v36 }
 0x225   : > { %v3282_v14 = vsel %vm3148_vm5, %v3272_v58, %v3281_v55  ;;  %v3291_v28 = vsel %vm3148_vm5, %v3281_v55, %v3290_v16  ;;  %v3952_v55 = vlaneseq }
 0x226   : > { %8755 = vmatmul.mubr.msk.bf16.gmra.mrb[8].mxu0 %vm573_vm0, %v3210_v19  ;;  %v3302_v19 = vshrl.u32 %v10395_v15, 16 }
 0x227   : > { %8758 = vmatprep.mubr.msk.bf16.mxu0 %vm573_vm0, %v3219_v21  ;;  %v3295_v21 = vrot.slane %v3293_v10, 2  ;;  %v10552_v10 = vshrl.u32 %v3952_v55, 7 }
 0x228   : > { %v3304_v29 = vrot.slane %v3302_v19, 2 }
 0x229   : > { %v3299_v30 = vor.u32 %v3298_v23, %v3295_v21  ;;  %v3955_v43 = vadd.s32 16, %v10552_v10  ;;  %v3954_v19 = vadd.s32 8, %v10552_v10  ;;  %v10586_v9 = vadd.s32 40, %v10552_v10 }
 0x22b   : > { %v3300_v52 = vsel %vm3148_vm5, %v3290_v16, %v3299_v30  ;;  %v3956_v16 = vadd.s32 24, %v10552_v10 }
 0x22d   : > { %v10564_v21 = vmul.u32.u64.low 3817748708, %v3956_v16  ;;  %v10565_v23 = vmul.u32.u64.high 3817748708, %v3956_v16, %v10564_v21 }
 0x22e   : > { %8759 = vmatmul.mubr.msk.bf16.gmra.mrb[12].mxu0 %vm573_vm0, %v3228_v37  ;;  %v3308_v37 = vor.u32 %v3307_v8, %v3304_v29  ;;  %v3959_v8 = vadd.s32 48, %v10552_v10 }
 0x22f   : > { %8762 = vmatprep.mubr.msk.bf16.mxu0 %vm573_vm0, %v3237_v45  ;;  %v3313_v45 = vrot.slane %v3311_v25, 2  ;;  %v3957_v25 = vadd.s32 32, %v10552_v10 }
 0x230   : > { %v3309_v60 = vsel %vm3148_vm5, %v3299_v30, %v3308_v37 }
 0x231   : > { %v3317_v62 = vor.u32 %v3316_v49, %v3313_v45  ;;  %v10579_v45 = vadd.s32 56, %v10552_v10 }
 0x233   : > { %v3318_v47 = vsel %vm3148_vm5, %v3308_v37, %v3317_v62  ;;  %v10573_v35 = vmul.u32.u64.low 3817748708, %v3959_v8  ;;  %v10574_v37 = vmul.u32.u64.high 3817748708, %v3959_v8, %v10573_v35 }
 0x234   : > { %v10582_v63 = vmul.u32.u64.low 3817748708, %v3957_v25  ;;  %v10583_v62 = vmul.u32.u64.high 3817748708, %v3957_v25, %v10582_v63 }
 0x235   : > { %v4900_v63 = vld [vmem:[%s13965_s2 + $0x8] sm:$0xff] }
 0x236   : > { %8763 = vmatmul.mubr.msk.bf16.gmra.mrb[16].mxu0 %vm573_vm0, %v3246_v50  ;;  %v3627_v50 = vrot.slane %v10293_v13, 3  ;;  %v3635_v13 = vrot.slane %v10323_v17, 3  ;;  %v3643_v17 = vrot.slane %v10356_v54, 3  ;;  %v3651_v54 = vrot.slane %v10380_v3, 3 }
 0x237   : > { %8766 = vmatprep.mubr.msk.bf16.mxu0 %vm573_vm0, %v3255_v51  ;;  %v3633_v51 = vrot.slane %v10309_v5, 3  ;;  %v3641_v5 = vrot.slane %v10347_v57, 3  ;;  %v3649_v57 = vrot.slane %v10372_v1, 3  ;;  %v3657_v1 = vrot.slane %v10395_v15, 3 }
 0x238   : > { %v3628_v20 = vsel %vm3623_vm6, %v3625_v11, %v3627_v50  ;;  %v3630_v0 = vsel %vm3623_vm6, %v3627_v50, %v3629_v53  ;;  %v3638_v31 = vsel %vm3623_vm6, %v3635_v13, %v3637_v6  ;;  %v3646_v59 = vsel %vm3623_vm6, %v3643_v17, %v3645_v33 }
 0x239   : > { %v3634_v26 = vsel %vm3623_vm6, %v3631_v4, %v3633_v51  ;;  %v3636_v7 = vsel %vm3623_vm6, %v3633_v51, %v3635_v13  ;;  %v3642_v58 = vsel %vm3623_vm6, %v3639_v22, %v3641_v5  ;;  %v3644_v38 = vsel %vm3623_vm6, %v3641_v5, %v3643_v17 }
 0x23a   : > { %v3650_v36 = vsel %vm3623_vm6, %v3647_v41, %v3649_v57  ;;  %v3652_v61 = vsel %vm3623_vm6, %v3649_v57, %v3651_v54  ;;  %v3658_v46 = vsel %vm3623_vm6, %v3655_v48, %v3657_v1  ;;  %v3659_v3 = vrot.slane %v10483_v27, 3 }
 0x23b   : > { %v10555_v15 = vmul.u32.u64.low 3817748708, %v3955_v43  ;;  %v10556_v12 = vmul.u32.u64.high 3817748708, %v3955_v43, %v10555_v15  ;;  %v10592_v50 = vmul.u32.u64.low 3817748708, %v10579_v45  ;;  %v10593_v53 = vmul.u32.u64.high 3817748708, %v10579_v45, %v10592_v50 }
 0x23c   : > { %v3660_v18 = vsel %vm3623_vm6, %v3657_v1, %v3659_v3  ;;  %v10599_v4 = vadd.s32 88, %v10552_v10  ;;  %v4061_v51 = vshrl.u32 %v10574_v37, 4 }
 0x23d   : > { %v4017_v27 = vshrl.u32 %v10556_v12, 4  ;;  %v10652_v12 = vadd.s32 112, %v10552_v10 }
 0x23e   : > { %8767 = vmatmul.mubr.msk.bf16.gmra.mrb[20].mxu0 %vm573_vm0, %v3264_v34  ;;  %v3648_v34 = vsel %vm3623_vm6, %v3645_v33, %v3647_v41  ;;  %v4039_v33 = vshrl.u32 %v10583_v62, 4  ;;  %v4062_v41 = vmul.u32 18, %v4061_v51 }
 0x23f   : > { %8770 = vmatprep.mubr.msk.bf16.mxu0 %vm573_vm0, %v3273_v39  ;;  %v3654_v39 = vsel %vm3623_vm6, %v3651_v54, %v3653_v2  ;;  %v4018_v30 = vmul.u32 18, %v4017_v27  ;;  %v10628_v54 = vadd.s32 72, %v10552_v10 }
 0x240   : > { %v10674_v35 = vmul.u32.u64.low 3817748708, %v10652_v12  ;;  %v10675_v37 = vmul.u32.u64.high 3817748708, %v10652_v12, %v10674_v35 }
 0x241   : > { %v4019_v49 = vsub.s32 %v3955_v43, %v4018_v30 }
 0x243   : > { %vm4387_vm7 = vcmp.ne.s32.totalorder %v4019_v49, 0  ;;  %vm4423_vm8 = vcmp.lt.s32.totalorder %v4019_v49, 0 }
 0x244   : > { %vm10615_vm9 = vmand %vm4423_vm8, %vm4387_vm7 }
 0x246   : > { %8771 = vmatmul.mubr.msk.bf16.gmra.mrb[24].mxu0 %vm573_vm0, %v3282_v14  ;;  %v10561_v56 = vmul.u32.u64.low 3817748708, %v10552_v10  ;;  %v10562_v14 = vmul.u32.u64.high 3817748708, %v10552_v10, %v10561_v56 }
 0x247   : > { %8774 = vmatprep.mubr.msk.bf16.mxu0 %vm573_vm0, %v3291_v28  ;;  %v10568_v28 = vmul.u32.u64.low 3817748708, %v3954_v19  ;;  %v10569_v29 = vmul.u32.u64.high 3817748708, %v3954_v19, %v10568_v28 }
 0x248   : > { %v3995_v40 = vshrl.u32 %v10562_v14, 4  ;;  %v10658_v56 = vmul.u32.u64.low 3817748708, %v10628_v54  ;;  %v10659_v14 = vmul.u32.u64.high 3817748708, %v10628_v54, %v10658_v56 }
 0x24a   : > { %v3996_v11 = vmul.u32 18, %v3995_v40  ;;  %v10992_v40 = vadd.s32 168, %v10552_v10 }
 0x24c   : > { %v3997_v13 = vsub.s32 %v10552_v10, %v3996_v11  ;;  %v10697_v11 = vadd.s32 120, %v10552_v10 }
 0x24e   : > { %8775 = vmatmul.mubr.msk.bf16.gmra.mrb[28].mxu0 %vm573_vm0, %v3300_v52  ;;  %v4028_v52 = vshrl.u32 %v10565_v23, 4  ;;  %vm4385_vm10 = vcmp.ne.s32.totalorder %v3997_v13, 0  ;;  %vm4421_vm11 = vcmp.lt.s32.totalorder %v3997_v13, 0 }
 0x24f   : > { %8778 = vmatprep.mubr.msk.bf16.mxu0 %vm573_vm0, %v3309_v60  ;;  %v4006_v60 = vshrl.u32 %v10569_v29, 4  ;;  %vm10630_vm1 = vmand %vm4421_vm11, %vm4385_vm10 }
 0x256   : > { %8779 = vmatmul.mubr.msk.bf16.gmra.mrb[32].mxu0 %vm573_vm0, %v3318_v47  ;;  %v10589_v47 = vadd.s32 80, %v10552_v10 }
 0x257   : > { %8790 = vmatprep.mubr.msk.bf16.mxu0 %vm573_vm0, %v3626_v24  ;;  %v4029_v24 = vmul.u32 18, %v4028_v52 }
 0x259   : > { %v4030_v22 = vsub.s32 %v3956_v16, %v4029_v24 }
 0x25b   : > { %vm4388_vm12 = vcmp.ne.s32.totalorder %v4030_v22, 0  ;;  %vm4424_vm13 = vcmp.lt.s32.totalorder %v4030_v22, 0 }
 0x25c   : > { %vm10641_vm3 = vmand %vm4424_vm13, %vm4388_vm12 }
 0x25e   : > { %8791 = vmatmul.mubr.msk.bf16.vlgmr.msra.gmra.mrb[0].mxu0 %vm573_vm0, %v3628_v20  ;;  %v10596_v20 = vadd.s32 64, %v10552_v10 }
 0x25f   : > { %8794 = vmatprep.mubr.msk.bf16.mxu0 %vm573_vm0, %v3630_v0  ;;  %v4007_v0 = vmul.u32 18, %v4006_v60  ;;  %v13973_v60 = vmov 0.0  }
 0x261   : > { %v4008_v17 = vsub.s32 %v3954_v19, %v4007_v0 }
 0x263   : > { %vm4386_vm14 = vcmp.ne.s32.totalorder %v4008_v17, 0  ;;  %vm4422_vm15 = vcmp.lt.s32.totalorder %v4008_v17, 0  ;;  %v4494_v3 = vadd.s32 18, %v4008_v17 }
 0x264   : > { %vm10646_vm4 = vmand %vm4422_vm15, %vm4386_vm14 }
 0x265   : > { %v4530_v28 = vsel %vm10646_vm4, %v4494_v3, %v4008_v17 }
 0x266   : > { %8795 = vmatmul.mubr.msk.bf16.gmra.mrb[4].mxu0 %vm573_vm0, %v3632_v32  ;;  %vm10703_vm12 = vcmp.lt.s32.totalorder %v4530_v28, 16 }
 0x267   : > { %8798 = vmatprep.mubr.msk.bf16.mxu0 %vm573_vm0, %v3634_v26  ;;  %v10603_v32 = vmul.u32.u64.low 3817748708, %v10586_v9  ;;  %v10604_v26 = vmul.u32.u64.high 3817748708, %v10586_v9, %v10603_v32 }
 0x269   : > { %v4050_v48 = vshrl.u32 %v10604_v26, 4 }
 0x26b   : > { %v4051_v23 = vmul.u32 18, %v4050_v48  ;;  %v10772_v48 = vadd.s32 144, %v10552_v10 }
 0x26d   : > { %v4052_v62 = vsub.s32 %v10586_v9, %v4051_v23 }
 0x26e   : > { %8799 = vmatmul.mubr.msk.bf16.gmra.mrb[8].mxu0 %vm573_vm0, %v3636_v7  ;;  %v10608_v6 = vmul.u32.u64.low 3817748708, %v10589_v47  ;;  %v10609_v7 = vmul.u32.u64.high 3817748708, %v10589_v47, %v10608_v6 }
 0x26f   : > { %8802 = vmatprep.mubr.msk.bf16.mxu0 %vm573_vm0, %v3638_v31  ;;  %v4495_v31 = vadd.s32 18, %v4019_v49  ;;  %v4498_v17 = vadd.s32 18, %v4052_v62 }
 0x271   : > { %v4531_v57 = vsel %vm10615_vm9, %v4495_v31, %v4019_v49  ;;  %v10684_v49 = vadd.s32 96, %v10552_v10 }
 0x272   : > { %vm10637_vm2 = vcmp.lt.s32.totalorder %v4531_v57, 16 }
 0x276   : > { %8803 = vmatmul.mubr.msk.bf16.gmra.mrb[12].mxu0 %vm573_vm0, %v3640_v44  ;;  %v10612_v5 = vmul.u32.u64.low 3817748708, %v10596_v20  ;;  %v10613_v44 = vmul.u32.u64.high 3817748708, %v10596_v20, %v10612_v5 }
 0x277   : > { %8806 = vmatprep.mubr.msk.bf16.mxu0 %vm573_vm0, %v3642_v58 }
 0x278   : > { %v4083_v15 = vshrl.u32 %v10613_v44, 4  ;;  %v4149_v44 = vshrl.u32 %v10675_v37, 4 }
 0x27a   : > { %v4150_v3 = vmul.u32 18, %v4149_v44 }
 0x27e   : > { %8807 = vmatmul.mubr.msk.bf16.gmra.mrb[16].mxu0 %vm573_vm0, %v3644_v38 }
 0x27f   : > { %8810 = vmatprep.mubr.msk.bf16.mxu0 %vm573_vm0, %v3646_v59  ;;  %v10621_v38 = vmul.u32.u64.low 3817748708, %v10599_v4  ;;  %v10622_v59 = vmul.u32.u64.high 3817748708, %v10599_v4, %v10621_v38 }
 0x281   : > { %v4116_v19 = vshrl.u32 %v10622_v59, 4 }
 0x283   : > { %v4117_v52 = vmul.u32 18, %v4116_v19 }
 0x285   : > { %v4118_v26 = vsub.s32 %v10599_v4, %v4117_v52 }
 0x286   : > { %8811 = vmatmul.mubr.msk.bf16.gmra.mrb[20].mxu0 %vm573_vm0, %v3648_v34  ;;  %v4072_v34 = vshrl.u32 %v10593_v53, 4 }
 0x287   : > { %8814 = vmatprep.mubr.msk.bf16.mxu0 %vm573_vm0, %v3650_v36  ;;  %v4040_v36 = vmul.u32 18, %v4039_v33  ;;  %v4504_v2 = vadd.s32 18, %v4118_v26 }
 0x288   : > { %v4073_v43 = vmul.u32 18, %v4072_v34 }
 0x289   : > { %v10654_v16 = vsub.s32 %v3957_v25, %v4040_v36  ;;  %v4084_v25 = vmul.u32 18, %v4083_v15 }
 0x28a   : > { %v10671_v30 = vsub.s32 %v10579_v45, %v4073_v43  ;;  %v10689_v45 = vsel %vm10637_vm2, 1.0, %v13973_v60  ;;  %vm4426_vm2 = vcmp.lt.s32.totalorder %v4052_v62, 0 }
 0x28b   : > { %vm4389_vm8 = vcmp.ne.s32.totalorder %v10654_v16, 0  ;;  %vm4425_vm9 = vcmp.lt.s32.totalorder %v10654_v16, 0  ;;  %v4497_v53 = vadd.s32 18, %v10654_v16  ;;  %v4085_v32 = vsub.s32 %v10596_v20, %v4084_v25 }
 0x28c   : > { %vm10714_vm13 = vmand %vm4425_vm9, %vm4389_vm8  ;;  %vm4392_vm14 = vcmp.ne.s32.totalorder %v10671_v30, 0  ;;  %vm4428_vm15 = vcmp.lt.s32.totalorder %v10671_v30, 0  ;;  %v10735_v20 = vadd.s32 104, %v10552_v10  ;;  %v4500_v5 = vadd.s32 18, %v10671_v30 }
 0x28d   : > { %vm4396_vm9 = vcmp.ne.s32.totalorder %v4118_v26, 0  ;;  %v4501_v34 = vadd.s32 18, %v4085_v32  ;;  %v10985_v25 = vadd.s32 184, %v10552_v10 }
 0x28e   : > { %8815 = vmatmul.mubr.msk.bf16.gmra.mrb[24].mxu0 %vm573_vm0, %v3652_v61  ;;  %v4493_v61 = vadd.s32 18, %v3997_v13 }
 0x28f   : > { %8818 = vmatprep.mubr.msk.bf16.mxu0 %vm573_vm0, %v3654_v39  ;;  %v10634_v39 = vsub.s32 %v3959_v8, %v4062_v41 }
 0x290   : > { %v4529_v21 = vsel %vm10630_vm1, %v4493_v61, %v3997_v13  ;;  %v10724_v13 = vmul.u32.u64.low 3817748708, %v10684_v49  ;;  %v10725_v6 = vmul.u32.u64.high 3817748708, %v10684_v49, %v10724_v13  ;;  %vm4390_vm1 = vcmp.ne.s32.totalorder %v4052_v62, 0 }
 0x291   : > { %vm4391_vm5 = vcmp.ne.s32.totalorder %v10634_v39, 0  ;;  %vm4427_vm6 = vcmp.lt.s32.totalorder %v10634_v39, 0  ;;  %v4499_v29 = vadd.s32 18, %v10634_v39  ;;  %vm10691_vm10 = vcmp.lt.s32.totalorder %v4529_v21, 16  ;;  %vm10743_vm8 = vmand %vm4426_vm2, %vm4390_vm1 }
 0x292   : > { %vm10677_vm7 = vmand %vm4427_vm6, %vm4391_vm5  ;;  %vm4393_vm6 = vcmp.ne.s32.totalorder %v4085_v32, 0  ;;  %v10750_v38 = vsel %vm10691_vm10, 1.0, %v13973_v60  ;;  %v4534_v55 = vsel %vm10743_vm8, %v4498_v17, %v4052_v62  ;;  %v4127_v15 = vshrl.u32 %v10725_v6, 4 }
 0x293   : > { %v4535_v51 = vsel %vm10677_vm7, %v4499_v29, %v10634_v39  ;;  %vm10737_vm5 = vmand %vm4428_vm15, %vm4392_vm14  ;;  %vm4429_vm7 = vcmp.lt.s32.totalorder %v4085_v32, 0  ;;  %v10768_v61 = vmul.u32.u64.low 3817748708, %v10735_v20  ;;  %v10769_v39 = vmul.u32.u64.high 3817748708, %v10735_v20, %v10768_v61  ;;  %v4906_v29 = vld [vmem:[%s13965_s2 + $0x38] sm:$0xff] }
 0x294   : > { %vm10752_vm14 = vcmp.lt.s32.totalorder %v4535_v51, 16  ;;  %vm10763_vm1 = vmand %vm4429_vm7, %vm4393_vm6  ;;  %v4128_v35 = vmul.u32 18, %v4127_v15  ;;  %v10880_v13 = vadd.s32 136, %v10552_v10 }
 0x295   : > { %v4537_v56 = vsel %vm10763_vm1, %v4501_v34, %v4085_v32  ;;  %v4138_v24 = vshrl.u32 %v10769_v39, 4  ;;  %v10869_v32 = vadd.s32 152, %v10552_v10  ;;  %v10922_v34 = vadd.s32 176, %v10552_v10 }
 0x296   : > { %8819 = vmatmul.mubr.msk.bf16.gmra.mrb[28].mxu0 %vm573_vm0, %v3656_v42  ;;  %v10782_v42 = vsel %vm10703_vm12, 1.0, %v13973_v60  ;;  %vm10823_vm12 = vcmp.lt.s32.totalorder %v4534_v55, 16  ;;  %vm10834_vm6 = vcmp.lt.s32.totalorder %v4537_v56, 16  ;;  %v10948_v55 = vadd.s32 160, %v10552_v10 }
 0x297   : > { %8822 = vmatprep.mubr.msk.bf16.mxu0 %vm573_vm0, %v3658_v46  ;;  %v4496_v46 = vadd.s32 18, %v4030_v22  ;;  %v10936_v61 = vmul.u32.u64.low 3817748708, %v10880_v13  ;;  %v10937_v39 = vmul.u32.u64.high 3817748708, %v10880_v13, %v10936_v61 }
 0x299   : > { %v4532_v27 = vsel %vm10641_vm3, %v4496_v46, %v4030_v22  ;;  %v4533_v22 = vsel %vm10714_vm13, %v4497_v53, %v10654_v16  ;;  %vm4432_vm13 = vcmp.lt.s32.totalorder %v4118_v26, 0  ;;  %v10800_v16 = vsel %vm10752_vm14, 1.0, %v13973_v60 }
 0x29a   : > { %vm10699_vm11 = vcmp.lt.s32.totalorder %v4532_v27, 16  ;;  %vm4569_vm10 = vcmp.lt.s32.totalorder %v4533_v22, 16  ;;  %vm10786_vm2 = vmand %vm4432_vm13, %vm4396_vm9  ;;  %v10814_v27 = vadd.s32 128, %v10552_v10  ;;  %v11064_v46 = vadd.s32 200, %v10552_v10 }
 0x29b   : > { %v10777_v1 = vsel %vm10699_vm11, 1.0, %v13973_v60  ;;  %v4540_v21 = vsel %vm10786_vm2, %v4504_v2, %v4118_v26  ;;  %v10817_v28 = vsel %vm4569_vm10, 1.0, %v13973_v60  ;;  %v10874_v26 = vsel %vm10823_vm12, 1.0, %v13973_v60  ;;  %v4904_v2 = vld [vmem:[%s13965_s2 + $0x28] sm:$0xff] }
 0x29c   : > { %vm10838_vm7 = vcmp.lt.s32.totalorder %v4540_v21, 16  ;;  %v10850_v50 = vmul.u32.u64.low 3817748708, %v10814_v27  ;;  %v10851_v53 = vmul.u32.u64.high 3817748708, %v10814_v27, %v10850_v50 }
 0x29d   : > { %v10903_v4 = vsel %vm10838_vm7, 1.0, %v13973_v60 }
 0x29e   : > { %8823 = vmatmul.mubr.msk.bf16.gmra.mrb[32].mxu0 %vm573_vm0, %v3660_v18  ;;  %v4105_v18 = vshrl.u32 %v10609_v7, 4  ;;  %v10728_v7 = vmul.u32.u64.low 3817748708, %v10697_v11  ;;  %v10729_v31 = vmul.u32.u64.high 3817748708, %v10697_v11, %v10728_v7  ;;  %v4171_v15 = vshrl.u32 %v10851_v53, 4 }
 0x29f   : > { %v4901_v7 = vld [vmem:[%s13965_s2 + $0x10] sm:$0xff]  ;;  %v11017_v53 = vadd.s32 208, %v10552_v10 }
 0x2a0   : > { %v4106_v8 = vmul.u32 18, %v4105_v18  ;;  %v4536_v18 = vsel %vm10737_vm5, %v4500_v5, %v10671_v30  ;;  %v10828_v30 = vsub.s32 %v10652_v12, %v4150_v3  ;;  %v4899_v12 = vld [vmem:[%s13965_s2] sm:$0xff] }
 0x2a1   : > { %vm10819_vm11 = vcmp.lt.s32.totalorder %v4536_v18, 16  ;;  %v10882_v6 = vpack.c.bf16 %v4900_v63, %v4899_v12 }
 0x2a2   : > { %v4107_v0 = vsub.s32 %v10589_v47, %v4106_v8  ;;  %v4094_v47 = vshrl.u32 %v10659_v14, 4  ;;  %v4160_v14 = vshrl.u32 %v10729_v31, 4  ;;  %v10858_v51 = vsel %vm10819_vm11, 1.0, %v13973_v60  ;;  %v4902_v31 = vld [vmem:[%s13965_s2 + $0x18] sm:$0xff] }
 0x2a3   : > { %vm4399_vm9 = vcmp.ne.s32.totalorder %v10828_v30, 0  ;;  %vm4435_vm13 = vcmp.lt.s32.totalorder %v10828_v30, 0  ;;  %v4507_v5 = vadd.s32 18, %v10828_v30  ;;  %v10925_v36 = vpack.c.bf16 %v4902_v31, %v4901_v7 }
 0x2a4   : > { %vm4395_vm3 = vcmp.ne.s32.totalorder %v4107_v0, 0  ;;  %vm4431_vm4 = vcmp.lt.s32.totalorder %v4107_v0, 0  ;;  %v4095_v33 = vmul.u32 18, %v4094_v47  ;;  %v4503_v57 = vadd.s32 18, %v4107_v0  ;;  %vm10908_vm14 = vmand %vm4435_vm13, %vm4399_vm9 }
 0x2a5   : > { %vm10758_vm15 = vmand %vm4431_vm4, %vm4395_vm3  ;;  %v4161_v52 = vmul.u32 18, %v4160_v14  ;;  %v10877_v47 = vsub.s32 %v10684_v49, %v4128_v35  ;;  %v10898_v49 = vsel %vm10834_vm6, 1.0, %v13973_v60  ;;  %v4543_v3 = vsel %vm10908_vm14, %v4507_v5, %v10828_v30 }
 0x2a6   : > { %v4096_v43 = vsub.s32 %v10628_v54, %v4095_v33  ;;  %v4539_v19 = vsel %vm10758_vm15, %v4503_v57, %v4107_v0  ;;  %v10810_v54 = vmul.u32.u64.low 3817748708, %v10772_v48  ;;  %v10811_v23 = vmul.u32.u64.high 3817748708, %v10772_v48, %v10810_v54 }
 0x2a7   : > { %vm10830_vm3 = vcmp.lt.s32.totalorder %v4539_v19, 16  ;;  %v13971_v0 = vmov 0.0|0.0   ;;  %v10913_v17 = vsub.s32 %v10697_v11, %v4161_v52  ;;  %v4139_v33 = vmul.u32 18, %v4138_v24  ;;  %v4903_v11 = vld [vmem:[%s13965_s2 + $0x20] sm:$0xff] }
 0x2a8   : > { %vm4394_vm4 = vcmp.ne.s32.totalorder %v4096_v43, 0  ;;  %vm4430_vm5 = vcmp.lt.s32.totalorder %v4096_v43, 0  ;;  %v4502_v62 = vadd.s32 18, %v4096_v43  ;;  %9064 = vmatprep.subr.bf16.mxu1 %v13971_v0  ;;  %9088 = vmatprep.subr.bf16.mxu0 %v13971_v0  ;;  %v10893_v22 = vsel %vm10830_vm3, 1.0, %v13973_v60 }
 0x2a9   : > { %vm10862_vm8 = vmand %vm4430_vm5, %vm4394_vm4  ;;  %v4193_v59 = vshrl.u32 %v10811_v23, 4  ;;  %9066 = vmatpush3.bf16.msra.mxu1 %v10882_v6  ;;  %v10918_v41 = vmul.u32.u64.low 3817748708, %v10869_v32  ;;  %v10919_v57 = vmul.u32.u64.high 3817748708, %v10869_v32, %v10918_v41  ;;  %vm4397_vm15 = vcmp.ne.s32.totalorder %v10877_v47, 0  ;;  %v4905_v23 = vld [vmem:[%s13965_s2 + $0x30] sm:$0xff] }
 0x2aa   : > { %v4538_v44 = vsel %vm10862_vm8, %v4502_v62, %v4096_v43  ;;  %9067 = vmatprep.subr.bf16.mxu1 %v13971_v0  ;;  %vm4433_vm1 = vcmp.lt.s32.totalorder %v10877_v47, 0  ;;  %v4505_v18 = vadd.s32 18, %v10877_v47  ;;  %vm4400_vm2 = vcmp.ne.s32.totalorder %v10913_v17, 0 }
 0x2ab   : > { %vm10939_vm10 = vcmp.lt.s32.totalorder %v4538_v44, 16  ;;  %v4194_v43 = vmul.u32 18, %v4193_v59  ;;  %v10953_v19 = vpack.c.bf16 %v4904_v2, %v4903_v11  ;;  %vm10955_vm11 = vmand %vm4433_vm1, %vm4397_vm15  ;;  %vm4436_vm12 = vcmp.lt.s32.totalorder %v10913_v17, 0 }
 0x2ac   : > { %v10961_v14 = vsub.s32 %v10735_v20, %v4139_v33  ;;  %v10964_v21 = vmul.u32.u64.low 3817748708, %v10922_v34  ;;  %v10965_v54 = vmul.u32.u64.high 3817748708, %v10922_v34, %v10964_v21  ;;  %v10977_v8 = vsel %vm10939_vm10, 1.0, %v13973_v60  ;;  %vm11001_vm4 = vmand %vm4436_vm12, %vm4400_vm2 }
 0x2ad   : > { %9069 = vmatpush3.bf16.msra.mxu1 %v10925_v36  ;;  %vm10979_vm3 = vcmp.lt.s32.totalorder %v4543_v3, 16  ;;  %v4508_v30 = vadd.s32 18, %v10913_v17  ;;  %v10988_v35 = vmul.u32.u64.low 3817748708, %v10948_v55  ;;  %v10989_v37 = vmul.u32.u64.high 3817748708, %v10948_v55, %v10988_v35 }
 0x2ae   : > { %9070 = vmatprep.subr.bf16.mxu1 %v13971_v0  ;;  %v4541_v52 = vsel %vm10955_vm11, %v4505_v18, %v10877_v47  ;;  %v11006_v63 = vsub.s32 %v10772_v48, %v4194_v43  ;;  %v4172_v62 = vmul.u32 18, %v4171_v15  ;;  %v11009_v24 = vpack.c.bf16 %v4906_v29, %v4905_v23 }
 0x2af   : > { %vm13970_vm5 = vmmov 0   ;;  %vm4398_vm6 = vcmp.ne.s32.totalorder %v10961_v14, 0  ;;  %vm4434_vm7 = vcmp.lt.s32.totalorder %v10961_v14, 0  ;;  %v4204_v50 = vshrl.u32 %v10919_v57, 4 }
 0x2b0   : > { %8842 = vmatprep.mubr.msk.f32.mxu1 %vm13970_vm5, %v13973_v60  ;;  %v4182_v48 = vshrl.u32 %v10937_v39, 4  ;;  %v11022_v9 = vmul.u32.u64.low 3817748708, %v10985_v25  ;;  %v11023_v47 = vmul.u32.u64.high 3817748708, %v10985_v25, %v11022_v9  ;;  %v11026_v7 = vadd.s32 192, %v10552_v10  ;;  %vm11049_vm13 = vmand %vm4434_vm7, %vm4398_vm6 }
 0x2b1   : > { %9072 = vmatpush3.bf16.msra.mxu1 %v10953_v19  ;;  %v4544_v31 = vsel %vm11001_vm4, %v4508_v30, %v10913_v17  ;;  %v4506_v5 = vadd.s32 18, %v10961_v14  ;;  %v11033_v44 = vmul.u32.u64.low 3817748708, %v10992_v40  ;;  %v11034_v58 = vmul.u32.u64.high 3817748708, %v10992_v40, %v11033_v44 }
 0x2b2   : > { %9073 = vmatprep.subr.bf16.mxu1 %v13971_v0  ;;  %vm4403_vm8 = vcmp.ne.s32.totalorder %v11006_v63, 0  ;;  %vm4439_vm9 = vcmp.lt.s32.totalorder %v11006_v63, 0  ;;  %v11039_v33 = vsub.s32 %v10814_v27, %v4172_v62  ;;  %v11042_v59 = vadd.s32 216, %v10552_v10 }
 0x2b3   : > { %v4205_v41 = vmul.u32 18, %v4204_v50  ;;  %v4237_v57 = vshrl.u32 %v10965_v54, 4  ;;  %v11055_v11 = vmul.u32.u64.low 3817748708, %v11017_v53  ;;  %v11056_v27 = vmul.u32.u64.high 3817748708, %v11017_v53, %v11055_v11  ;;  %vm11092_vm1 = vmand %vm4439_vm9, %vm4403_vm8 }
 0x2b4   : > { %v4183_v2 = vmul.u32 18, %v4182_v48  ;;  %v11060_v61 = vmul.u32.u64.low 3817748708, %v11026_v7  ;;  %v11061_v39 = vmul.u32.u64.high 3817748708, %v11026_v7, %v11060_v61  ;;  %v11069_v3 = vsel %vm10979_vm3, 1.0, %v13973_v60 }
 0x2b5   : > { %9075 = vmatpush3.bf16.msra.mxu1 %v11009_v24  ;;  %vm11071_vm14 = vcmp.lt.s32.totalorder %v4541_v52, 16  ;;  %vm11075_vm15 = vcmp.lt.s32.totalorder %v4544_v31, 16  ;;  %v4215_v15 = vshrl.u32 %v10989_v37, 4  ;;  %v4542_v56 = vsel %vm11049_vm13, %v4506_v5, %v10961_v14 }
 0x2b6   : > { %9076 = vmatprep.subr.bf16.mxu1 %v13971_v0  ;;  %v4511_v21 = vadd.s32 18, %v11006_v63  ;;  %v11085_v54 = vmul.u32.u64.low 3817748708, %v11042_v59  ;;  %v11086_v23 = vmul.u32.u64.high 3817748708, %v11042_v59, %v11085_v54  ;;  %vm4401_vm10 = vcmp.ne.s32.totalorder %v11039_v33, 0 }
 0x2b7   : > { %vm4437_vm2 = vcmp.lt.s32.totalorder %v11039_v33, 0  ;;  %v11099_v14 = vsub.s32 %v10869_v32, %v4205_v41  ;;  %v4238_v20 = vmul.u32 18, %v4237_v57  ;;  %v11102_v30 = vsub.s32 %v10880_v13, %v4183_v2 }
 0x2b8   : > { %v4248_v35 = vshrl.u32 %v11023_v47, 4  ;;  %v11106_v37 = vmul.u32.u64.low 3817748708, %v11064_v46  ;;  %v11107_v52 = vmul.u32.u64.high 3817748708, %v11064_v46, %v11106_v37  ;;  %v11112_v12 = vsel %vm11071_vm14, 1.0, %v13973_v60  ;;  %vm11135_vm12 = vmand %vm4437_vm2, %vm4401_vm10 }
 0x2b9   : > { %v4216_v62 = vmul.u32 18, %v4215_v15  ;;  %v4226_v50 = vshrl.u32 %v11034_v58, 4  ;;  %v11116_v32 = vadd.s32 240, %v10552_v10  ;;  %v11121_v13 = vsel %vm11075_vm15, 1.0, %v13973_v60 }
 0x2ba   : > { %vm11123_vm11 = vcmp.lt.s32.totalorder %v4542_v56, 16  ;;  %v4547_v9 = vsel %vm11092_vm1, %v4511_v21, %v11006_v63  ;;  %v4509_v47 = vadd.s32 18, %v11039_v33  ;;  %vm4404_vm3 = vcmp.ne.s32.totalorder %v11099_v14, 0 }
 0x2bb   : > { %vm4440_vm4 = vcmp.lt.s32.totalorder %v11099_v14, 0  ;;  %v11142_v5 = vsub.s32 %v10922_v34, %v4238_v20  ;;  %v4281_v44 = vshrl.u32 %v11056_v27, 4  ;;  %vm4402_vm6 = vcmp.ne.s32.totalorder %v11102_v30, 0 }
 0x2bc   : > { %vm4438_vm7 = vcmp.lt.s32.totalorder %v11102_v30, 0  ;;  %v4249_v63 = vmul.u32 18, %v4248_v35  ;;  %v4259_v58 = vshrl.u32 %v11061_v39, 4  ;;  %v11149_v17 = vsub.s32 %v10948_v55, %v4216_v62  ;;  %vm11168_vm9 = vmand %vm4440_vm4, %vm4404_vm3 }
 0x2bd   : > { %v4227_v41 = vmul.u32 18, %v4226_v50  ;;  %v11152_v57 = vmul.u32.u64.low 3817748708, %v11116_v32  ;;  %v11153_v11 = vmul.u32.u64.high 3817748708, %v11116_v32, %v11152_v57  ;;  %vm11155_vm8 = vcmp.lt.s32.totalorder %v4547_v9, 16  ;;  %vm11184_vm15 = vmand %vm4438_vm7, %vm4402_vm6 }
 0x2be   : > { %v4545_v27 = vsel %vm11135_vm12, %v4509_v47, %v11039_v33  ;;  %v4512_v2 = vadd.s32 18, %v11099_v14  ;;  %v4292_v61 = vshrl.u32 %v11086_v23, 4  ;;  %v4510_v39 = vadd.s32 18, %v11102_v30 }
 0x2bf   : > { %vm4407_vm13 = vcmp.ne.s32.totalorder %v11142_v5, 0  ;;  %vm4443_vm14 = vcmp.lt.s32.totalorder %v11142_v5, 0  ;;  %v4282_v18 = vmul.u32 18, %v4281_v44  ;;  %v11178_v33 = vsel %vm11123_vm11, 1.0, %v13973_v60 }
 0x2c0   : > { %v4250_v15 = vsub.s32 %v10985_v25, %v4249_v63  ;;  %v4260_v56 = vmul.u32 18, %v4259_v58  ;;  %v4270_v21 = vshrl.u32 %v11107_v52, 4  ;;  %v4515_v54 = vadd.s32 18, %v11142_v5  ;;  %vm11207_vm11 = vmand %vm4443_vm14, %vm4407_vm13 }
 0x2c1   : > { %vm4405_vm1 = vcmp.ne.s32.totalorder %v11149_v17, 0  ;;  %vm4441_vm10 = vcmp.lt.s32.totalorder %v11149_v17, 0  ;;  %v11194_v23 = vsub.s32 %v10992_v40, %v4227_v41  ;;  %v11199_v29 = vsel %vm11155_vm8, 1.0, %v13973_v60 }
 0x2c2   : > { %vm11201_vm2 = vcmp.lt.s32.totalorder %v4545_v27, 16  ;;  %v4293_v35 = vmul.u32 18, %v4292_v61  ;;  %v11212_v37 = vadd.s32 224, %v10552_v10  ;;  %v4548_v40 = vsel %vm11168_vm9, %v4512_v2, %v11099_v14  ;;  %vm11222_vm12 = vmand %vm4441_vm10, %vm4405_vm1 }
 0x2c3   : > { %v4546_v52 = vsel %vm11184_vm15, %v4510_v39, %v11102_v30  ;;  %v4513_v62 = vadd.s32 18, %v11149_v17  ;;  %v4283_v50 = vsub.s32 %v11017_v53, %v4282_v18  ;;  %vm4408_vm3 = vcmp.ne.s32.totalorder %v4250_v15, 0 }
 0x2c4   : > { %vm4444_vm4 = vcmp.lt.s32.totalorder %v4250_v15, 0  ;;  %v4261_v9 = vsub.s32 %v11026_v7, %v4260_v56  ;;  %v4271_v47 = vmul.u32 18, %v4270_v21  ;;  %v4551_v14 = vsel %vm11207_vm11, %v4515_v54, %v11142_v5 }
 0x2c5   : > { %v4516_v31 = vadd.s32 18, %v4250_v15  ;;  %vm4406_vm6 = vcmp.ne.s32.totalorder %v11194_v23, 0  ;;  %v4325_v30 = vshrl.u32 %v11153_v11, 4  ;;  %vm4442_vm7 = vcmp.lt.s32.totalorder %v11194_v23, 0  ;;  %vm11241_vm8 = vmand %vm4444_vm4, %vm4408_vm3 }
 0x2c6   : > { %v4294_v53 = vsub.s32 %v11042_v59, %v4293_v35  ;;  %v11235_v44 = vmul.u32.u64.low 3817748708, %v11212_v37  ;;  %v11236_v63 = vmul.u32.u64.high 3817748708, %v11212_v37, %v11235_v44  ;;  %v4549_v7 = vsel %vm11222_vm12, %v4513_v62, %v11149_v17  ;;  %vm11260_vm11 = vmand %vm4442_vm7, %vm4406_vm6 }
 0x2c7   : > { %vm4411_vm9 = vcmp.ne.s32.totalorder %v4283_v50, 0  ;;  %vm4447_vm13 = vcmp.lt.s32.totalorder %v4283_v50, 0  ;;  %v11246_v5 = vadd.s32 248, %v10552_v10  ;;  %v4514_v41 = vadd.s32 18, %v11194_v23 }
 0x2c8   : > { %vm4409_vm14 = vcmp.ne.s32.totalorder %v4261_v9, 0  ;;  %vm4445_vm15 = vcmp.lt.s32.totalorder %v4261_v9, 0  ;;  %v4272_v59 = vsub.s32 %v11064_v46, %v4271_v47  ;;  %vm11250_vm1 = vcmp.lt.s32.totalorder %v4548_v40, 16  ;;  %vm11266_vm12 = vmand %vm4447_vm13, %vm4411_vm9 }
 0x2c9   : > { %vm11254_vm10 = vcmp.lt.s32.totalorder %v4546_v52, 16  ;;  %v4519_v34 = vadd.s32 18, %v4283_v50  ;;  %v4326_v27 = vmul.u32 18, %v4325_v30  ;;  %v4552_v2 = vsel %vm11241_vm8, %v4516_v31, %v4250_v15  ;;  %vm11280_vm7 = vmand %vm4445_vm15, %vm4409_vm14 }
 0x2ca   : > { %v4517_v61 = vadd.s32 18, %v4261_v9  ;;  %vm4412_vm3 = vcmp.ne.s32.totalorder %v4294_v53, 0  ;;  %vm4448_vm4 = vcmp.lt.s32.totalorder %v4294_v53, 0  ;;  %vm11270_vm5 = vcmp.lt.s32.totalorder %v4551_v14, 16 }
 0x2cb   : > { %vm11274_vm6 = vcmp.lt.s32.totalorder %v4549_v7, 16  ;;  %v11285_v43 = vmul.u32.u64.low 3817748708, %v11246_v5  ;;  %v11286_v15 = vmul.u32.u64.high 3817748708, %v11246_v5, %v11285_v43  ;;  %v4550_v56 = vsel %vm11260_vm11, %v4514_v41, %v11194_v23  ;;  %vm11298_vm14 = vmand %vm4448_vm4, %vm4412_vm3 }
 0x2cc   : > { %v4520_v21 = vadd.s32 18, %v4294_v53  ;;  %vm4410_vm8 = vcmp.ne.s32.totalorder %v4272_v59, 0  ;;  %vm4446_vm9 = vcmp.lt.s32.totalorder %v4272_v59, 0  ;;  %v11294_v54 = vsel %vm11201_vm2, 1.0, %v13973_v60 }
 0x2cd   : > { %vm4588_vm13 = vcmp.lt.s32.totalorder %v4552_v2, 16  ;;  %v4555_v25 = vsel %vm11266_vm12, %v4519_v34, %v4283_v50  ;;  %v4327_v40 = vsub.s32 %v11116_v32, %v4326_v27  ;;  %v11306_v23 = vsel %vm11250_vm1, 1.0, %v13973_v60  ;;  %vm11327_vm15 = vmand %vm4446_vm9, %vm4410_vm8 }
 0x2ce   : > { %v4553_v20 = vsel %vm11280_vm7, %v4517_v61, %v4261_v9  ;;  %v4518_v52 = vadd.s32 18, %v4272_v59  ;;  %v4303_v62 = vshrl.u32 %v11236_v63, 4  ;;  %v11314_v50 = vsel %vm11254_vm10, 1.0, %v13973_v60 }
 0x2cf   : > { %v11319_v32 = vsel %vm11270_vm5, 1.0, %v13973_v60  ;;  %v11324_v48 = vsel %vm11274_vm6, 1.0, %v13973_v60  ;;  %vm4586_vm2 = vcmp.lt.s32.totalorder %v4550_v56, 16  ;;  %v11332_v47 = vsel %vm4588_vm13, 1.0, %v13973_v60 }
 0x2d0   : > { %vm4591_vm1 = vcmp.lt.s32.totalorder %v4555_v25, 16  ;;  %v4556_v14 = vsel %vm11298_vm14, %v4520_v21, %v4294_v53  ;;  %v11337_v31 = vadd.s32 232, %v10552_v10  ;;  %vm4589_vm5 = vcmp.lt.s32.totalorder %v4553_v20, 16 }
 0x2d1   : > { %vm4415_vm10 = vcmp.ne.s32.totalorder %v4327_v40, 0  ;;  %vm4451_vm11 = vcmp.lt.s32.totalorder %v4327_v40, 0  ;;  %v11340_v30 = vadd.s32 272, %v10552_v10  ;;  %v11343_v44 = vsel %vm4586_vm2, 1.0, %v13973_v60 }
 0x2d2   : > { %v4554_v63 = vsel %vm11327_vm15, %v4518_v52, %v4272_v59  ;;  %v4304_v7 = vmul.u32 18, %v4303_v62  ;;  %v11348_v58 = vadd.s32 256, %v10552_v10  ;;  %v11353_v41 = vsel %vm4591_vm1, 1.0, %v13973_v60  ;;  %vm11363_vm3 = vmand %vm4451_vm11, %vm4415_vm10 }
 0x2d3   : > { %vm4592_vm12 = vcmp.lt.s32.totalorder %v4556_v14, 16  ;;  %v4523_v57 = vadd.s32 18, %v4327_v40  ;;  %v11356_v17 = vadd.s32 280, %v10552_v10  ;;  %v11361_v34 = vsel %vm4589_vm5, 1.0, %v13973_v60 }
 0x2d4   : > { %v4336_v27 = vshrl.u32 %v11286_v15, 4  ;;  %v11369_v2 = vmul.u32.u64.low 3817748708, %v11337_v31  ;;  %v11370_v46 = vmul.u32.u64.high 3817748708, %v11337_v31, %v11369_v2  ;;  %vm4590_vm4 = vcmp.lt.s32.totalorder %v4554_v63, 16 }
 0x2d5   : > { %v11379_v18 = vadd.s32 264, %v10552_v10  ;;  %v11384_v15 = vsel %vm4592_vm12, 1.0, %v13973_v60  ;;  %v4305_v56 = vsub.s32 %v11212_v37, %v4304_v7  ;;  %v4559_v20 = vsel %vm11363_vm3, %v4523_v57, %v4327_v40 }
 0x2d6   : > { %v11388_v21 = vmul.u32.u64.low 3817748708, %v11340_v30  ;;  %v11389_v25 = vmul.u32.u64.high 3817748708, %v11340_v30, %v11388_v21  ;;  %v11399_v52 = vsel %vm4590_vm4, 1.0, %v13973_v60  ;;  %v4337_v62 = vmul.u32 18, %v4336_v27 }
 0x2d7   : > { %v11402_v37 = vmul.u32.u64.low 3817748708, %v11348_v58  ;;  %v11403_v9 = vmul.u32.u64.high 3817748708, %v11348_v58, %v11402_v37  ;;  %vm11410_vm6 = vcmp.lt.s32.totalorder %v4559_v20, 16  ;;  %vm4413_vm7 = vcmp.ne.s32.totalorder %v4305_v56, 0 }
 0x2d8   : > { %vm4449_vm8 = vcmp.lt.s32.totalorder %v4305_v56, 0  ;;  %v4521_v20 = vadd.s32 18, %v4305_v56 }
 0x2d9   : > { %vm11436_vm9 = vmand %vm4449_vm8, %vm4413_vm7 }
 0x331   : > { %v11350_v53 = vpop.f32.mrb[0].mxu0 }
 0x332   : > { %v11358_v11 = vpop.f32.mrb[1].mxu0  ;;  %v4675_v61 = vmul.f32 %v11350_v53, %v10689_v45 }
 0x333   : > { %v4673_v55 = vmul.f32 %v10750_v38, %v11358_v11  ;;  %v11376_v39 = vpop.f32.mrb[2].mxu0 }
 0x334   : > { %14079 = vst [vmem:[#allocation2_spill] sm:$0xff] %v11376_v39  ;;  %v11381_v43 = vpop.f32.mrb[3].mxu0  ;;  %v4676_v38 = vmul.f32 %v11376_v39, %v10777_v1  ;;  %v4788_v14 = vmul.f32 %v11350_v53, %v4675_v61  ;;  %v4712_v57 = vsel %vm573_vm0, %v4675_v61, 0.0 }
 0x335   : > { %v4786_v45 = vmul.f32 %v4673_v55, %v11358_v11  ;;  %v4674_v35 = vmul.f32 %v10782_v42, %v11381_v43  ;;  %v4709_v63 = vsel %vm573_vm0, %v4673_v55, 0.0 }
 0x336   : > { %v4789_v27 = vmul.f32 %v11376_v39, %v4676_v38  ;;  %v4714_v0 = vsel %vm573_vm0, %v4676_v38, 0.0 }
 0x337   : > { %v4710_v1 = vsel %vm573_vm0, %v4674_v35, 0.0  ;;  %v4787_v42 = vmul.f32 %v4674_v35, %v11381_v43  ;;  %v4822_v59 = vsel %vm573_vm0, %v4786_v45, 0.0 }
 0x338   : > { %v4711_v7 = vadd.f32 %v4710_v1, %v4709_v63  ;;  %v4314_v63 = vshrl.u32 %v11370_v46, 4  ;;  %v4825_v1 = vsel %vm573_vm0, %v4788_v14, 0.0  ;;  %v4827_v40 = vsel %vm573_vm0, %v4789_v27, 0.0 }
 0x339   : > { %v4823_v2 = vsel %vm573_vm0, %v4787_v42, 0.0  ;;  %v11418_v55 = vpop.f32.mrb[4].mxu0  ;;  %v11432_v42 = vsel %vm11410_vm6, 1.0, %v13973_v60 }
 0x33a   : > { %v4713_v21 = vadd.f32 %v4712_v57, %v4711_v7  ;;  %v4824_v37 = vadd.f32 %v4823_v2, %v4822_v59  ;;  %v11420_v35 = vpop.f32.mrb[5].mxu0  ;;  %v4679_v38 = vmul.f32 %v11418_v55, %v10800_v16  ;;  %v4315_v27 = vmul.u32 18, %v4314_v63 }
 0x33b   : > { %14082 = vst [vmem:[#allocation3_spill] sm:$0xff] %v11420_v35  ;;  %v4677_v61 = vmul.f32 %v10817_v28, %v11420_v35  ;;  %v11427_v45 = vpop.f32.mrb[6].mxu0  ;;  %v11445_v28 = vsub.s32 %v11246_v5, %v4337_v62 }
 0x33c   : > { %v4826_v46 = vadd.f32 %v4825_v1, %v4824_v37  ;;  %v4715_v14 = vadd.f32 %v4714_v0, %v4713_v21  ;;  %v11442_v57 = vpop.f32.mrb[7].mxu0  ;;  %v4680_v16 = vmul.f32 %v11427_v45, %v10858_v51  ;;  %v4557_v0 = vsel %vm11436_vm9, %v4521_v20, %v4305_v56 }
 0x33d   : > { %v4716_v59 = vsel %vm573_vm0, %v4677_v61, 0.0  ;;  %v4790_v2 = vmul.f32 %v4677_v61, %v11420_v35  ;;  %v4678_v60 = vmul.f32 %v10874_v26, %v11442_v57  ;;  %v4369_v21 = vshrl.u32 %v11389_v25, 4 }
 0x33e   : > { %v4717_v39 = vadd.f32 %v4716_v59, %v4715_v14  ;;  %v4828_v37 = vadd.f32 %v4827_v40, %v4826_v46  ;;  %v4792_v1 = vmul.f32 %v11418_v55, %v4679_v38  ;;  %v4720_v46 = vsel %vm573_vm0, %v4679_v38, 0.0 }
 0x33f   : > { %v4829_v5 = vsel %vm573_vm0, %v4790_v2, 0.0  ;;  %v4718_v62 = vsel %vm573_vm0, %v4678_v60, 0.0  ;;  %v4791_v26 = vmul.f32 %v4678_v60, %v11442_v57  ;;  %vm11464_vm13 = vcmp.lt.s32.totalorder %v4557_v0, 16 }
 0x340   : > { %v4830_v61 = vadd.f32 %v4829_v5, %v4828_v37  ;;  %v4719_v35 = vadd.f32 %v4718_v62, %v4717_v39  ;;  %v11469_v56 = vmul.u32.u64.low 3817748708, %v11356_v17  ;;  %v11470_v20 = vmul.u32.u64.high 3817748708, %v11356_v17, %v11469_v56 }
 0x341   : > { %v11462_v14 = vpop.f32.mrb[8].mxu0  ;;  %v4793_v25 = vmul.f32 %v11427_v45, %v4680_v16  ;;  %v4831_v7 = vsel %vm573_vm0, %v4791_v26, 0.0  ;;  %vm4416_vm14 = vcmp.ne.s32.totalorder %v11445_v28, 0  ;;  %vm4452_vm2 = vcmp.lt.s32.totalorder %v11445_v28, 0 }
 0x342   : > { %v4721_v63 = vadd.f32 %v4720_v46, %v4719_v35  ;;  %v11474_v39 = vpop.f32.mrb[9].mxu0  ;;  %v4722_v60 = vsel %vm573_vm0, %v4680_v16, 0.0  ;;  %v4832_v38 = vadd.f32 %v4831_v7, %v4830_v61  ;;  %v11484_v2 = vadd.s32 18, %v11445_v28  ;;  %vm11545_vm5 = vmand %vm4452_vm2, %vm4416_vm14 }
 0x343   : > { %v4681_v40 = vmul.f32 %v10898_v49, %v11474_v39  ;;  %v11481_v59 = vpop.f32.mrb[10].mxu0  ;;  %v4833_v35 = vsel %vm573_vm0, %v4792_v1, 0.0  ;;  %v4683_v37 = vmul.f32 %v11462_v14, %v10893_v22  ;;  %v14087_v62 = vmov 0.0  }
 0x344   : > { %v4723_v0 = vadd.f32 %v4722_v60, %v4721_v63  ;;  %v11489_v5 = vpop.f32.mrb[11].mxu0  ;;  %v11494_v16 = vsel %vm11464_vm13, 1.0, %v14087_v62  ;;  %v4834_v61 = vadd.f32 %v4833_v35, %v4832_v38  ;;  %v4835_v1 = vsel %vm573_vm0, %v4793_v25, 0.0 }
 0x345   : > { %v4724_v49 = vsel %vm573_vm0, %v4681_v40, 0.0  ;;  %v4794_v26 = vmul.f32 %v4681_v40, %v11474_v39  ;;  %v4682_v46 = vmul.f32 %v10977_v8, %v11489_v5  ;;  %v4684_v22 = vmul.f32 %v11481_v59, %v10903_v4 }
 0x346   : > { %v4725_v56 = vadd.f32 %v4724_v49, %v4723_v0  ;;  %v11504_v63 = vsub.s32 %v11337_v31, %v4315_v27  ;;  %v4836_v51 = vadd.f32 %v4835_v1, %v4834_v61  ;;  %v4796_v40 = vmul.f32 %v11462_v14, %v4683_v37 }
 0x347   : > { %v4837_v7 = vsel %vm573_vm0, %v4794_v26, 0.0  ;;  %v4726_v60 = vsel %vm573_vm0, %v4682_v46, 0.0  ;;  %v4795_v38 = vmul.f32 %v4682_v46, %v11489_v5  ;;  %v4728_v0 = vsel %vm573_vm0, %v4683_v37, 0.0 }
 0x348   : > { %v4727_v35 = vadd.f32 %v4726_v60, %v4725_v56  ;;  %v11511_v8 = vmul.u32.u64.low 3817748708, %v11379_v18  ;;  %v11512_v25 = vmul.u32.u64.high 3817748708, %v11379_v18, %v11511_v8  ;;  %v4838_v4 = vadd.f32 %v4837_v7, %v4836_v51 }
 0x349   : > { %v4839_v31 = vsel %vm573_vm0, %v4795_v38, 0.0  ;;  %v11516_v27 = vpop.f32.mrb[12].mxu0  ;;  %v4370_v61 = vmul.u32 18, %v4369_v21  ;;  %v4797_v49 = vmul.f32 %v11481_v59, %v4684_v22  ;;  %vm4414_vm15 = vcmp.ne.s32.totalorder %v11504_v63, 0 }
 0x34a   : > { %14088 = vst [vmem:[#allocation4_spill] sm:$0xff] %v11516_v27  ;;  %v4729_v26 = vadd.f32 %v4728_v0, %v4727_v35  ;;  %v11519_v1 = vpop.f32.mrb[13].mxu0  ;;  %v4347_v46 = vshrl.u32 %v11403_v9, 4  ;;  %v4730_v56 = vsel %vm573_vm0, %v4684_v22, 0.0  ;;  %v4840_v60 = vadd.f32 %v4839_v31, %v4838_v4 }
 0x34b   : > { %v4685_v37 = vmul.f32 %v11112_v12, %v11519_v1  ;;  %v11526_v51 = vpop.f32.mrb[14].mxu0  ;;  %vm4450_vm1 = vcmp.lt.s32.totalorder %v11504_v63, 0  ;;  %v4841_v21 = vsel %vm573_vm0, %v4796_v40, 0.0  ;;  %v4687_v7 = vmul.f32 %v11516_v27, %v11069_v3 }
 0x34c   : > { %v4731_v38 = vadd.f32 %v4730_v56, %v4729_v26  ;;  %v11532_v35 = vpop.f32.mrb[15].mxu0  ;;  %v11535_v9 = vadd.s32 18, %v11504_v63  ;;  %v4842_v22 = vadd.f32 %v4841_v21, %v4840_v60  ;;  %v4843_v40 = vsel %vm573_vm0, %v4797_v49, 0.0  ;;  %vm11562_vm10 = vmand %vm4450_vm1, %vm4414_vm15 }
 0x34d   : > { %14089 = vst [vmem:[#allocation5_spill] sm:$0xff] %v11532_v35  ;;  %v4732_v8 = vsel %vm573_vm0, %v4685_v37, 0.0  ;;  %v4798_v12 = vmul.f32 %v4685_v37, %v11519_v1  ;;  %v4686_v0 = vmul.f32 %v11178_v33, %v11532_v35  ;;  %v4688_v31 = vmul.f32 %v11526_v51, %v11121_v13 }
 0x34e   : > { %v4733_v4 = vadd.f32 %v4732_v8, %v4731_v38  ;;  %v11553_v26 = vsub.s32 %v11340_v30, %v4370_v61  ;;  %v4844_v56 = vadd.f32 %v4843_v40, %v4842_v22  ;;  %v4800_v13 = vmul.f32 %v11516_v27, %v4687_v7 }
 0x34f   : > { %v4845_v33 = vsel %vm573_vm0, %v4798_v12, 0.0  ;;  %v4734_v60 = vsel %vm573_vm0, %v4686_v0, 0.0  ;;  %v4799_v37 = vmul.f32 %v4686_v0, %v11532_v35  ;;  %v4560_v30 = vsel %vm11545_vm5, %v11484_v2, %v11445_v28 }
 0x350   : > { %v4735_v21 = vadd.f32 %v4734_v60, %v4733_v4  ;;  %v4348_v61 = vmul.u32 18, %v4347_v46  ;;  %v4736_v38 = vsel %vm573_vm0, %v4687_v7, 0.0  ;;  %v4846_v22 = vadd.f32 %v4845_v33, %v4844_v56 }
 0x351   : > { %v4847_v8 = vsel %vm573_vm0, %v4799_v37, 0.0  ;;  %v11573_v12 = vpop.f32.mrb[16].mxu0  ;;  %v4380_v0 = vshrl.u32 %v11470_v20, 4  ;;  %v4801_v40 = vmul.f32 %v11526_v51, %v4688_v31  ;;  %vm4419_vm11 = vcmp.ne.s32.totalorder %v11553_v26, 0 }
 0x352   : > { %v4737_v35 = vadd.f32 %v4736_v38, %v4735_v21  ;;  %v11577_v27 = vpop.f32.mrb[17].mxu0  ;;  %v4738_v46 = vsel %vm573_vm0, %v4688_v31, 0.0  ;;  %v4848_v7 = vadd.f32 %v4847_v8, %v4846_v22  ;;  %vm4455_vm12 = vcmp.lt.s32.totalorder %v11553_v26, 0 }
 0x353   : > { %v4689_v56 = vmul.f32 %v11294_v54, %v11577_v27  ;;  %v11587_v33 = vpop.f32.mrb[18].mxu0  ;;  %v4849_v20 = vsel %vm573_vm0, %v4800_v13, 0.0  ;;  %v4691_v60 = vmul.f32 %v11573_v12, %v11199_v29  ;;  %v11596_v38 = vsub.s32 %v11348_v58, %v4348_v61  ;;  %vm11655_vm7 = vmand %vm4455_vm12, %vm4419_vm11 }
 0x354   : > { %v4739_v37 = vadd.f32 %v4738_v46, %v4737_v35  ;;  %v11593_v21 = vpop.f32.mrb[19].mxu0  ;;  %v4850_v31 = vadd.f32 %v4849_v20, %v4848_v7  ;;  %v4851_v4 = vsel %vm573_vm0, %v4801_v40, 0.0  ;;  %v4692_v29 = vmul.f32 %v11587_v33, %v11306_v23 }
 0x355   : > { %v4740_v22 = vsel %vm573_vm0, %v4689_v56, 0.0  ;;  %v4802_v54 = vmul.f32 %v4689_v56, %v11577_v27  ;;  %v4690_v8 = vmul.f32 %v11314_v50, %v11593_v21  ;;  %v4358_v35 = vshrl.u32 %v11512_v25, 4 }
 0x356   : > { %v4741_v13 = vadd.f32 %v4740_v22, %v4739_v37  ;;  %v4852_v46 = vadd.f32 %v4851_v4, %v4850_v31  ;;  %v4804_v56 = vmul.f32 %v11573_v12, %v4691_v60  ;;  %v11611_v50 = vadd.s32 18, %v11553_v26 }
 0x357   : > { %v4853_v58 = vsel %vm573_vm0, %v4802_v54, 0.0  ;;  %v4742_v61 = vsel %vm573_vm0, %v4690_v8, 0.0  ;;  %v4803_v7 = vmul.f32 %v4690_v8, %v11593_v21  ;;  %v4381_v40 = vmul.u32 18, %v4380_v0 }
 0x358   : > { %v4743_v20 = vadd.f32 %v4742_v61, %v4741_v13  ;;  %v4744_v37 = vsel %vm573_vm0, %v4691_v60, 0.0  ;;  %v4854_v22 = vadd.f32 %v4853_v58, %v4852_v46  ;;  %vm4417_vm3 = vcmp.ne.s32.totalorder %v11596_v38, 0 }
 0x359   : > { %v4855_v23 = vsel %vm573_vm0, %v4803_v7, 0.0  ;;  %v11615_v25 = vpop.f32.mrb[20].mxu0  ;;  %v4805_v4 = vmul.f32 %v11587_v33, %v4692_v29  ;;  %vm4453_vm4 = vcmp.lt.s32.totalorder %v11596_v38, 0  ;;  %v4359_v8 = vmul.u32 18, %v4358_v35 }
 0x35a   : > { %v4745_v31 = vadd.f32 %v4744_v37, %v4743_v20  ;;  %v11619_v54 = vpop.f32.mrb[21].mxu0  ;;  %v4746_v13 = vsel %vm573_vm0, %v4692_v29, 0.0  ;;  %v4856_v0 = vadd.f32 %v4855_v23, %v4854_v22  ;;  %v11628_v58 = vadd.s32 18, %v11596_v38  ;;  %vm11666_vm8 = vmand %vm4453_vm4, %vm4417_vm3 }
 0x35b   : > { %v4693_v60 = vmul.f32 %v11324_v48, %v11619_v54  ;;  %v11625_v46 = vpop.f32.mrb[22].mxu0  ;;  %v4857_v61 = vsel %vm573_vm0, %v4804_v56, 0.0  ;;  %v4695_v7 = vmul.f32 %v11615_v25, %v11319_v32  ;;  %v11636_v35 = vsub.s32 %v11356_v17, %v4381_v40 }
 0x35c   : > { %v4747_v20 = vadd.f32 %v4746_v13, %v4745_v31  ;;  %v11633_v37 = vpop.f32.mrb[23].mxu0  ;;  %v4858_v29 = vadd.f32 %v4857_v61, %v4856_v0  ;;  %vm11647_vm6 = vcmp.lt.s32.totalorder %v4560_v30, 16  ;;  %v4859_v56 = vsel %vm573_vm0, %v4805_v4, 0.0 }
 0x35d   : > { %v4748_v22 = vsel %vm573_vm0, %v4693_v60, 0.0  ;;  %v4806_v48 = vmul.f32 %v4693_v60, %v11619_v54  ;;  %v4694_v23 = vmul.f32 %v11343_v44, %v11633_v37  ;;  %v4696_v3 = vmul.f32 %v11625_v46, %v11332_v47 }
 0x35e   : > { %v4749_v44 = vadd.f32 %v4748_v22, %v4747_v20  ;;  %v11671_v2 = vsub.s32 %v11379_v18, %v4359_v8  ;;  %v4860_v30 = vadd.f32 %v4859_v56, %v4858_v29  ;;  %v4808_v47 = vmul.f32 %v11615_v25, %v4695_v7 }
 0x35f   : > { %v4861_v40 = vsel %vm573_vm0, %v4806_v48, 0.0  ;;  %v4750_v4 = vsel %vm573_vm0, %v4694_v23, 0.0  ;;  %v4807_v31 = vmul.f32 %v4694_v23, %v11633_v37  ;;  %v14100_v0 = vsel %vm11562_vm10, %v11535_v9, %v11504_v63 }
 0x360   : > { %v4751_v13 = vadd.f32 %v4750_v4, %v4749_v44  ;;  %vm11682_vm9 = vcmp.lt.s32.totalorder %v14100_v0, 16  ;;  %v4563_v18 = vsel %vm11655_vm7, %v11611_v50, %v11553_v26  ;;  %v4752_v8 = vsel %vm573_vm0, %v4695_v7, 0.0 }
 0x361   : > { %v4862_v61 = vadd.f32 %v4861_v40, %v4860_v30  ;;  %v4863_v20 = vsel %vm573_vm0, %v4807_v31, 0.0  ;;  %v11692_v29 = vpop.f32.mrb[24].mxu0  ;;  %v4561_v63 = vsel %vm11666_vm8, %v11628_v58, %v11596_v38  ;;  %v4809_v9 = vmul.f32 %v11625_v46, %v4696_v3 }
 0x362   : > { %v4753_v49 = vadd.f32 %v4752_v8, %v4751_v13  ;;  %v11699_v22 = vpop.f32.mrb[25].mxu0  ;;  %vm4420_vm13 = vcmp.ne.s32.totalorder %v11636_v35, 0  ;;  %vm4456_vm14 = vcmp.lt.s32.totalorder %v11636_v35, 0  ;;  %v4754_v26 = vsel %vm573_vm0, %v4696_v3, 0.0 }
 0x363   : > { %v4864_v50 = vadd.f32 %v4863_v20, %v4862_v61  ;;  %v4697_v7 = vmul.f32 %v11361_v34, %v11699_v22  ;;  %v11706_v48 = vpop.f32.mrb[26].mxu0  ;;  %vm4418_vm2 = vcmp.ne.s32.totalorder %v11671_v2, 0  ;;  %v4865_v38 = vsel %vm573_vm0, %v4808_v47, 0.0  ;;  %vm11750_vm5 = vmand %vm4456_vm14, %vm4420_vm13 }
 0x364   : > { %v4699_v58 = vmul.f32 %v11692_v29, %v11353_v41  ;;  %v4755_v23 = vadd.f32 %v4754_v26, %v4753_v49  ;;  %v11712_v17 = vpop.f32.mrb[27].mxu0  ;;  %vm4454_vm15 = vcmp.lt.s32.totalorder %v11671_v2, 0  ;;  %v4867_v28 = vsel %vm573_vm0, %v4809_v9, 0.0 }
 0x365   : > { %v4866_v56 = vadd.f32 %v4865_v38, %v4864_v50  ;;  %v4756_v44 = vsel %vm573_vm0, %v4697_v7, 0.0  ;;  %v4810_v3 = vmul.f32 %v4697_v7, %v11699_v22  ;;  %v4698_v34 = vmul.f32 %v11399_v52, %v11712_v17  ;;  %vm11735_vm1 = vmand %vm4454_vm15, %vm4418_vm2 }
 0x366   : > { %v4757_v30 = vadd.f32 %v4756_v44, %v4755_v23  ;;  %v4700_v40 = vmul.f32 %v11706_v48, %v11384_v15  ;;  %v4526_v41 = vadd.s32 18, %v11671_v2  ;;  %v4812_v0 = vmul.f32 %v11692_v29, %v4699_v58 }
 0x367   : > { %v4868_v4 = vadd.f32 %v4867_v28, %v4866_v56  ;;  %v4869_v31 = vsel %vm573_vm0, %v4810_v3, 0.0  ;;  %v4758_v47 = vsel %vm573_vm0, %v4698_v34, 0.0  ;;  %v4811_v13 = vmul.f32 %v4698_v34, %v11712_v17 }
 0x368   : > { %v4759_v8 = vadd.f32 %v4758_v47, %v4757_v30  ;;  %v7943_v52 = vsel %vm11647_vm6, 1.0, %v14087_v62  ;;  %v4528_v61 = vadd.s32 18, %v11636_v35  ;;  %v4760_v20 = vsel %vm573_vm0, %v4699_v58, 0.0 }
 0x369   : > { %v4870_v9 = vadd.f32 %v4869_v31, %v4868_v4  ;;  %v4871_v49 = vsel %vm573_vm0, %v4811_v13, 0.0  ;;  %v11741_v26 = vpop.f32.mrb[28].mxu0  ;;  %v7941_v32 = vsel %vm11682_vm9, 1.0, %v14087_v62  ;;  %v4813_v7 = vmul.f32 %v11706_v48, %v4700_v40 }
 0x36a   : > { %v4761_v38 = vadd.f32 %v4760_v20, %v4759_v8  ;;  %v11755_v58 = vpop.f32.mrb[29].mxu0  ;;  %vm11757_vm10 = vcmp.lt.s32.totalorder %v4563_v18, 16  ;;  %vm11761_vm11 = vcmp.lt.s32.totalorder %v4561_v63, 16  ;;  %v4762_v56 = vsel %vm573_vm0, %v4700_v40, 0.0 }
 0x36b   : > { %v4872_v44 = vadd.f32 %v4871_v49, %v4870_v9  ;;  %v4701_v3 = vmul.f32 %v11494_v16, %v11755_v58  ;;  %v11768_v34 = vpop.f32.mrb[30].mxu0  ;;  %v4562_v28 = vsel %vm11735_vm1, %v4526_v41, %v11671_v2  ;;  %v4873_v18 = vsel %vm573_vm0, %v4812_v0, 0.0 }
 0x36c   : > { %v4703_v63 = vmul.f32 %v11741_v26, %v11432_v42  ;;  %v4763_v30 = vadd.f32 %v4762_v56, %v4761_v38  ;;  %v11776_v4 = vpop.f32.mrb[31].mxu0  ;;  %v4564_v40 = vsel %vm11750_vm5, %v4528_v61, %v11636_v35  ;;  %v4875_v2 = vsel %vm573_vm0, %v4813_v7, 0.0 }
 0x36d   : > { %v4874_v31 = vadd.f32 %v4873_v18, %v4872_v44  ;;  %v4764_v16 = vsel %vm573_vm0, %v4701_v3, 0.0  ;;  %v4814_v47 = vmul.f32 %v4701_v3, %v11755_v58  ;;  %v4702_v13 = vmul.f32 %v7941_v32, %v11776_v4 }
 0x36e   : > { %v4765_v41 = vadd.f32 %v4764_v16, %v4763_v30  ;;  %v4704_v0 = vmul.f32 %v11768_v34, %v7943_v52  ;;  %vm11786_vm12 = vcmp.lt.s32.totalorder %v4562_v28, 16  ;;  %v4816_v20 = vmul.f32 %v11741_v26, %v4703_v63 }
 0x36f   : > { %v4876_v8 = vadd.f32 %v4875_v2, %v4874_v31  ;;  %v4877_v15 = vsel %vm573_vm0, %v4814_v47, 0.0  ;;  %v4766_v35 = vsel %vm573_vm0, %v4702_v13, 0.0  ;;  %v4815_v61 = vmul.f32 %v4702_v13, %v11776_v4 }
 0x370   : > { %v4767_v9 = vadd.f32 %v4766_v35, %v4765_v41  ;;  %v7944_v49 = vsel %vm11761_vm11, 1.0, %v14087_v62  ;;  %vm4600_vm3 = vcmp.lt.s32.totalorder %v4564_v40, 16  ;;  %v4768_v52 = vsel %vm573_vm0, %v4703_v63, 0.0 }
 0x371   : > { %v4878_v32 = vadd.f32 %v4877_v15, %v4876_v8  ;;  %v4879_v50 = vsel %vm573_vm0, %v4815_v61, 0.0  ;;  %v11799_v7 = vpop.f32.mrb[32].mxu0  ;;  %v7946_v38 = vsel %vm11757_vm10, 1.0, %v14087_v62  ;;  %v4817_v56 = vmul.f32 %v11768_v34, %v4704_v0 }
 0x372   : > { %v4769_v44 = vadd.f32 %v4768_v52, %v4767_v9  ;;  %v11805_v3 = vpop.f32.mrb[33].mxu0  ;;  %v7945_v60 = vsel %vm11786_vm12, 1.0, %v14087_v62  ;;  %v4770_v28 = vsel %vm573_vm0, %v4704_v0, 0.0  ;;  %v7947_v40 = vsel %vm4600_vm3, 1.0, %v14087_v62 }
 0x373   : > { %v4880_v18 = vadd.f32 %v4879_v50, %v4878_v32  ;;  %v4705_v63 = vmul.f32 %v7944_v49, %v11805_v3  ;;  %v11812_v30 = vpop.f32.mrb[34].mxu0  ;;  %v4881_v23 = vsel %vm573_vm0, %v4816_v20, 0.0  ;;  %v4707_v31 = vmul.f32 %v11799_v7, %v7946_v38 }
 0x374   : > { %v4771_v16 = vadd.f32 %v4770_v28, %v4769_v44  ;;  %v11817_v47 = vpop.f32.mrb[35].mxu0  ;;  %v4883_v42 = vsel %vm573_vm0, %v4817_v56, 0.0  ;;  %v4708_v15 = vmul.f32 %v11812_v30, %v7947_v40  ;;  %vm14113_vm4 = vmmov 0  }
 0x375   : > { %v4882_v13 = vadd.f32 %v4881_v23, %v4880_v18  ;;  %v4772_v2 = vsel %vm573_vm0, %v4705_v63, 0.0  ;;  %v4818_v41 = vmul.f32 %v4705_v63, %v11805_v3  ;;  %v4706_v0 = vmul.f32 %v7945_v60, %v11817_v47 }
 0x376   : > { %v4773_v8 = vadd.f32 %v4772_v2, %v4771_v16  ;;  %v4820_v49 = vmul.f32 %v11799_v7, %v4707_v31  ;;  %v4776_v32 = vsel %vm573_vm0, %v4707_v31, 0.0  ;;  %v4821_v56 = vmul.f32 %v11812_v30, %v4708_v15 }
 0x377   : > { %v4884_v35 = vadd.f32 %v4883_v42, %v4882_v13  ;;  %v4885_v61 = vsel %vm573_vm0, %v4818_v41, 0.0  ;;  %v4774_v20 = vsel %vm573_vm0, %v4706_v0, 0.0  ;;  %v4819_v9 = vmul.f32 %v4706_v0, %v11817_v47 }
 0x378   : > { %v4775_v52 = vadd.f32 %v4774_v20, %v4773_v8  ;;  %v4778_v60 = vsel %vm573_vm0, %v4708_v15, 0.0  ;;  %v4889_v18 = vsel %vm573_vm0, %v4820_v49, 0.0  ;;  %v4891_v23 = vsel %vm573_vm0, %v4821_v56, 0.0 }
 0x379   : > { %v4886_v50 = vadd.f32 %v4885_v61, %v4884_v35  ;;  %v4887_v38 = vsel %vm573_vm0, %v4819_v9, 0.0  ;;  %v14114_v61 = vmov 0.0|0.0   ;;  %vm5602_vm6 = vcmask 261120  }
 0x37a   : > { %v4777_v44 = vadd.f32 %v4776_v32, %v4775_v52 }
 0x37b   : > { %v4888_v28 = vadd.f32 %v4887_v38, %v4886_v50  ;;  %v14115_v38 = vld [vmem:[#allocation2_spill] sm:$0xff] }
 0x37c   : > { %v4779_v63 = vadd.f32 %v4778_v60, %v4777_v44  ;;  %v14116_v44 = vld [vmem:[#allocation3_spill] sm:$0xff] }
 0x37d   : > { %v4890_v40 = vadd.f32 %v4889_v18, %v4888_v28 }
 0x37e   : > { %v4780_v16 = vrot.slane %v4779_v63, 4 }
 0x37f   : > { %v4892_v13 = vadd.f32 %v4891_v23, %v4890_v40 }
 0x380   : > { %v4781_v2 = vadd.f32 %v4780_v16, %v4779_v63 }
 0x381   : > { %v4893_v31 = vrot.slane %v4892_v13, 4 }
 0x382   : > { %v4782_v41 = vrot.slane %v4781_v2, 2 }
 0x383   : > { %v4894_v8 = vadd.f32 %v4893_v31, %v4892_v13 }
 0x384   : > { %v4783_v0 = vadd.f32 %v4782_v41, %v4781_v2 }
 0x385   : > { %v4895_v15 = vrot.slane %v4894_v8, 2 }
 0x386   : > { %v4784_v42 = vrot.slane %v4783_v0, 1 }
 0x387   : > { %v4896_v20 = vadd.f32 %v4895_v15, %v4894_v8 }
 0x388   : > { %v4785_v35 = vadd.f32 %v4784_v42, %v4783_v0 }
 0x389   : > { %v4897_v9 = vrot.slane %v4896_v20, 1 }
 0x38a   : > { %8843 = vmatmul.mubr.msk.f32.vlgmr.msra.gmra.mrb[0].mxu1 %vm573_vm0, %v4785_v35 }
 0x38b   : > { %9078 = vmatpush3.bf16.msra.mxu1 %v10882_v6  ;;  %8861 = vmatprep.mubr.msk.f32.mxu1 %vm14113_vm4, %v14087_v62  ;;  %v4898_v49 = vadd.f32 %v4897_v9, %v4896_v20  ;;  %v5294_v6 = vld [vmem:[%s13968_s5 + $0x260] sm:$0xff] }
 0x38c   : > { %9079 = vmatprep.subr.bf16.mxu1 %v14114_v61 }
 0x38f   : > { %9081 = vmatpush3.bf16.msra.mxu1 %v10925_v36  ;;  %v5059_v36 = vsub.s32 0, %v10552_v10 }
 0x390   : > { %9082 = vmatprep.subr.bf16.mxu1 %v14114_v61 }
 0x393   : > { %9084 = vmatpush3.bf16.msra.mxu1 %v10953_v19 }
 0x394   : > { %9085 = vmatprep.subr.bf16.mxu1 %v14114_v61 }
 0x397   : > { %9087 = vmatpush3.bf16.msra.mxu1 %v11009_v24 }
 0x398   : > { %9144 = vmatprep.subr.bf16.mxu1 %v14114_v61 }
 0x39a   : > { %8862 = vmatmul.mubr.msk.f32.vlgmr.msra.gmra.mrb[2].mxu1 %vm573_vm0, %v4898_v49 }
 0x39b   : > { %6176 = vmatprep.mubr.f32.mxu1 %v5294_v6 }
 0x45d   : > { %v4976_v62 = vpop.f32.mrb[0].mxu1 }
 0x45e   : > { %v11850_v52 = vrot.slane %v4976_v62, %v5059_v36  ;;  %v8844_v19 = vpop.f32.mrb[1].mxu1  ;;  %v5053_v2 = vmul.f32 %v4976_v62, %v4976_v62 }
 0x460   : > { %v5061_v32 = vsub.f32 %v11358_v11, %v11850_v52  ;;  %v5062_v24 = vsub.f32 %v11381_v43, %v11850_v52  ;;  %v5063_v50 = vsub.f32 %v11350_v53, %v11850_v52  ;;  %v5064_v56 = vsub.f32 %v14115_v38, %v11850_v52 }
 0x461   : > { %v5065_v10 = vsub.f32 %v14116_v44, %v11850_v52  ;;  %v5066_v60 = vsub.f32 %v11442_v57, %v11850_v52  ;;  %v5067_v28 = vsub.f32 %v11418_v55, %v11850_v52  ;;  %v5068_v11 = vsub.f32 %v11427_v45, %v11850_v52  ;;  %v14117_v55 = vld [vmem:[#allocation5_spill] sm:$0xff]  ;;  %v14118_v45 = vld [vmem:[#allocation4_spill] sm:$0xff] }
 0x462   : > { %v5069_v43 = vsub.f32 %v11474_v39, %v11850_v52  ;;  %v5070_v53 = vsub.f32 %v11489_v5, %v11850_v52  ;;  %v5071_v18 = vsub.f32 %v11462_v14, %v11850_v52  ;;  %v5072_v63 = vsub.f32 %v11481_v59, %v11850_v52 }
 0x463   : > { %v5073_v57 = vsub.f32 %v11519_v1, %v11850_v52  ;;  %v5074_v40 = vsub.f32 %v14117_v55, %v11850_v52  ;;  %v5075_v23 = vsub.f32 %v14118_v45, %v11850_v52  ;;  %v5076_v39 = vsub.f32 %v11526_v51, %v11850_v52 }
 0x464   : > { %v5077_v5 = vsub.f32 %v11577_v27, %v11850_v52  ;;  %v5078_v14 = vsub.f32 %v11593_v21, %v11850_v52  ;;  %v5079_v59 = vsub.f32 %v11573_v12, %v11850_v52  ;;  %v5080_v1 = vsub.f32 %v11587_v33, %v11850_v52 }
 0x465   : > { %v5081_v16 = vsub.f32 %v11619_v54, %v11850_v52  ;;  %v5082_v13 = vsub.f32 %v11633_v37, %v11850_v52  ;;  %v5083_v51 = vsub.f32 %v11615_v25, %v11850_v52  ;;  %v5084_v27 = vsub.f32 %v11625_v46, %v11850_v52 }
 0x466   : > { %v5085_v21 = vsub.f32 %v11699_v22, %v11850_v52  ;;  %v5086_v12 = vsub.f32 %v11712_v17, %v11850_v52  ;;  %v5087_v33 = vsub.f32 %v11692_v29, %v11850_v52  ;;  %v5088_v54 = vsub.f32 %v11706_v48, %v11850_v52 }
 0x467   : > { %v5089_v37 = vsub.f32 %v11755_v58, %v11850_v52  ;;  %v5090_v25 = vsub.f32 %v11776_v4, %v11850_v52  ;;  %v5091_v46 = vsub.f32 %v11741_v26, %v11850_v52  ;;  %v5092_v22 = vsub.f32 %v11768_v34, %v11850_v52  ;;  %v5097_v34 = vld [vmem:[%s13966_s3] sm:$0x1] }
 0x468   : > { %v5093_v17 = vsub.f32 %v11805_v3, %v11850_v52  ;;  %v5094_v29 = vsub.f32 %v11817_v47, %v11850_v52  ;;  %v5095_v48 = vsub.f32 %v11799_v7, %v11850_v52  ;;  %v5096_v58 = vsub.f32 %v11812_v30, %v11850_v52 }
 0x46d   : > { %v5049_v4 = vpop.f32.mrb[2].mxu1 }
 0x46e   : > { %v5054_v41 = vsub.f32 %v5049_v4, %v5053_v2  ;;  %v8863_v31 = vpop.f32.mrb[3].mxu1 }
 0x470   : > { %v5055_v26 = vadd.f32 1e-05, %v5054_v41 }
 0x472   : > { %9646 = vrsqrt.f32 %v5055_v26 }
 0x47c   : > { %v9647_v3 = vpop.eup %9646 }
 0x47d   : > { %v5098_v0 = vmul.f32 %v9647_v3, %v5097_v34 }
 0x47f   : > { %v5102_v42 = vrot.slane %v5098_v0, %v5059_v36 }
 0x481   : > { %v5103_v47 = vmul.f32 %v5102_v42, %v5061_v32  ;;  %v5104_v8 = vmul.f32 %v5102_v42, %v5062_v24  ;;  %v5105_v35 = vmul.f32 %v5102_v42, %v5063_v50  ;;  %v5106_v7 = vmul.f32 %v5102_v42, %v5064_v56 }
 0x482   : > { %v5107_v15 = vmul.f32 %v5102_v42, %v5065_v10  ;;  %v5108_v20 = vmul.f32 %v5102_v42, %v5066_v60  ;;  %v5109_v30 = vmul.f32 %v5102_v42, %v5067_v28  ;;  %v5110_v9 = vmul.f32 %v5102_v42, %v5068_v11  ;;  %v11930_v10 = vld [vmem:[%s13967_s4] ss:$0 sm:$0xff] }
 0x483   : > { %v5111_v49 = vmul.f32 %v5102_v42, %v5069_v43  ;;  %v5112_v6 = vmul.f32 %v5102_v42, %v5070_v53  ;;  %v5113_v62 = vmul.f32 %v5102_v42, %v5071_v18  ;;  %v5114_v52 = vmul.f32 %v5102_v42, %v5072_v63 }
 0x484   : > { %v5115_v19 = vmul.f32 %v5102_v42, %v5073_v57  ;;  %v5116_v38 = vmul.f32 %v5102_v42, %v5074_v40  ;;  %v5117_v44 = vmul.f32 %v5102_v42, %v5075_v23  ;;  %v5118_v55 = vmul.f32 %v5102_v42, %v5076_v39 }
 0x485   : > { %v5119_v45 = vmul.f32 %v5102_v42, %v5077_v5  ;;  %v5120_v2 = vmul.f32 %v5102_v42, %v5078_v14  ;;  %v5121_v4 = vmul.f32 %v5102_v42, %v5079_v59  ;;  %v5122_v36 = vmul.f32 %v5102_v42, %v5080_v1 }
 0x486   : > { %v5123_v32 = vmul.f32 %v5102_v42, %v5081_v16  ;;  %v5124_v24 = vmul.f32 %v5102_v42, %v5082_v13  ;;  %v5125_v50 = vmul.f32 %v5102_v42, %v5083_v51  ;;  %v5126_v56 = vmul.f32 %v5102_v42, %v5084_v27 }
 0x487   : > { %v5127_v60 = vmul.f32 %v5102_v42, %v5085_v21  ;;  %v5128_v28 = vmul.f32 %v5102_v42, %v5086_v12  ;;  %v5129_v11 = vmul.f32 %v5102_v42, %v5087_v33  ;;  %v5130_v43 = vmul.f32 %v5102_v42, %v5088_v54 }
 0x488   : > { %v5131_v53 = vmul.f32 %v5102_v42, %v5089_v37  ;;  %v5132_v18 = vmul.f32 %v5102_v42, %v5090_v25  ;;  %v5133_v63 = vmul.f32 %v5102_v42, %v5091_v46  ;;  %v5134_v57 = vmul.f32 %v5102_v42, %v5092_v22 }
 0x489   : > { %v11932_v40 = vmul.f32 %v5102_v42, %v5093_v17  ;;  %v11934_v23 = vmul.f32 %v5102_v42, %v5094_v29  ;;  %v11936_v39 = vmul.f32 %v5102_v42, %v5095_v48  ;;  %v11938_v5 = vmul.f32 %v5102_v42, %v5096_v58 }
 0x48a   : > { %v11941_v14 = vadd.f32 %v11930_v10, %v5103_v47  ;;  %v11944_v59 = vadd.f32 %v11930_v10, %v5104_v8  ;;  %v11947_v1 = vadd.f32 %v11930_v10, %v5105_v35  ;;  %v11950_v16 = vadd.f32 %v11930_v10, %v5106_v7 }
 0x48b   : > { %v11953_v13 = vadd.f32 %v11930_v10, %v5107_v15  ;;  %v5151_v51 = vadd.f32 %v11930_v10, %v5108_v20  ;;  %v5152_v27 = vadd.f32 %v11930_v10, %v5109_v30  ;;  %v5153_v21 = vadd.f32 %v11930_v10, %v5110_v9 }
 0x48c   : > { %v5154_v12 = vadd.f32 %v11930_v10, %v5111_v49  ;;  %v5155_v33 = vadd.f32 %v11930_v10, %v5112_v6  ;;  %v5156_v54 = vadd.f32 %v11930_v10, %v5113_v62  ;;  %v5157_v37 = vadd.f32 %v11930_v10, %v5114_v52 }
 0x48d   : > { %v5158_v25 = vadd.f32 %v11930_v10, %v5115_v19  ;;  %v5159_v46 = vadd.f32 %v11930_v10, %v5116_v38  ;;  %v5160_v22 = vadd.f32 %v11930_v10, %v5117_v44  ;;  %v5161_v17 = vadd.f32 %v11930_v10, %v5118_v55 }
 0x48e   : > { %v5162_v29 = vadd.f32 %v11930_v10, %v5119_v45  ;;  %v5163_v48 = vadd.f32 %v11930_v10, %v5120_v2  ;;  %v5164_v58 = vadd.f32 %v11930_v10, %v5121_v4  ;;  %v5165_v41 = vadd.f32 %v11930_v10, %v5122_v36 }
 0x48f   : > { %v5166_v31 = vadd.f32 %v11930_v10, %v5123_v32  ;;  %v5167_v26 = vadd.f32 %v11930_v10, %v5124_v24  ;;  %v5168_v34 = vadd.f32 %v11930_v10, %v5125_v50  ;;  %v5169_v3 = vadd.f32 %v11930_v10, %v5126_v56 }
 0x490   : > { %v5170_v0 = vadd.f32 %v11930_v10, %v5127_v60  ;;  %v5171_v42 = vadd.f32 %v11930_v10, %v5128_v28  ;;  %v5172_v47 = vadd.f32 %v11930_v10, %v5129_v11  ;;  %v5173_v8 = vadd.f32 %v11930_v10, %v5130_v43 }
 0x491   : > { %v5174_v35 = vadd.f32 %v11930_v10, %v5131_v53  ;;  %v5175_v7 = vadd.f32 %v11930_v10, %v5132_v18  ;;  %v5176_v15 = vadd.f32 %v11930_v10, %v5133_v63  ;;  %v5177_v20 = vadd.f32 %v11930_v10, %v5134_v57 }
 0x492   : > { %v5182_v30 = vmax.f32 %v11941_v14, 0.0  ;;  %v5183_v9 = vmax.f32 %v11944_v59, 0.0  ;;  %v5184_v49 = vmax.f32 %v11947_v1, 0.0  ;;  %v5185_v6 = vmax.f32 %v11950_v16, 0.0 }
 0x493   : > { %v5186_v62 = vmax.f32 %v11953_v13, 0.0  ;;  %v5187_v52 = vmax.f32 %v5151_v51, 0.0  ;;  %v5188_v19 = vmax.f32 %v5152_v27, 0.0  ;;  %v5189_v38 = vmax.f32 %v5153_v21, 0.0 }
 0x494   : > { %v5190_v44 = vmax.f32 %v5154_v12, 0.0  ;;  %v5191_v55 = vmax.f32 %v5155_v33, 0.0  ;;  %v5192_v45 = vmax.f32 %v5156_v54, 0.0  ;;  %v5193_v2 = vmax.f32 %v5157_v37, 0.0 }
 0x495   : > { %v5194_v4 = vmax.f32 %v5158_v25, 0.0  ;;  %v5195_v36 = vmax.f32 %v5159_v46, 0.0  ;;  %v5196_v32 = vmax.f32 %v5160_v22, 0.0  ;;  %v5197_v24 = vmax.f32 %v5161_v17, 0.0 }
 0x496   : > { %v5198_v50 = vmax.f32 %v5162_v29, 0.0  ;;  %v5199_v56 = vmax.f32 %v5163_v48, 0.0  ;;  %v5200_v60 = vmax.f32 %v5164_v58, 0.0  ;;  %v5201_v28 = vmax.f32 %v5165_v41, 0.0 }
 0x497   : > { %v5202_v11 = vmax.f32 %v5166_v31, 0.0  ;;  %v5203_v43 = vmax.f32 %v5167_v26, 0.0  ;;  %v5204_v53 = vmax.f32 %v5168_v34, 0.0  ;;  %v5205_v18 = vmax.f32 %v5169_v3, 0.0 }
 0x498   : > { %v5206_v63 = vmax.f32 %v5170_v0, 0.0  ;;  %v5207_v57 = vmax.f32 %v5171_v42, 0.0  ;;  %v5208_v14 = vmax.f32 %v5172_v47, 0.0  ;;  %v5209_v59 = vmax.f32 %v5173_v8, 0.0 }
 0x499   : > { %v5210_v1 = vmax.f32 %v5174_v35, 0.0  ;;  %v5211_v16 = vmax.f32 %v5175_v7, 0.0  ;;  %v5212_v13 = vmax.f32 %v5176_v15, 0.0  ;;  %v5213_v51 = vmax.f32 %v5177_v20, 0.0  ;;  %v5303_v20 = vld [vmem:[%s13968_s5 + $0x2a8] sm:$0xff] }
 0x49a   : > { %v9089_v27 = vpack.c.bf16 %v5183_v9, %v5182_v30  ;;  %v9092_v21 = vpack.c.bf16 %v5185_v6, %v5184_v49  ;;  %v9095_v12 = vpack.c.bf16 %v5187_v52, %v5186_v62  ;;  %v9098_v33 = vpack.c.bf16 %v5189_v38, %v5188_v19  ;;  %v5302_v30 = vld [vmem:[%s13968_s5 + $0x2a0] sm:$0xff]  ;;  %v5305_v49 = vld [vmem:[%s13968_s5 + $0x2b8] sm:$0xff]  ;;  %v5308_v62 = vld [vmem:[%s13968_s5 + $0x2d0] sm:$0xff] }
 0x49b   : > { %v9101_v54 = vpack.c.bf16 %v5191_v55, %v5190_v44  ;;  %v9104_v37 = vpack.c.bf16 %v5193_v2, %v5192_v45  ;;  %v9107_v25 = vpack.c.bf16 %v5195_v36, %v5194_v4  ;;  %v9110_v46 = vpack.c.bf16 %v5197_v24, %v5196_v32  ;;  %v5306_v9 = vld [vmem:[%s13968_s5 + $0x2c0] sm:$0xff]  ;;  %v5309_v6 = vld [vmem:[%s13968_s5 + $0x2d8] sm:$0xff]  ;;  %v5312_v52 = vld [vmem:[%s13968_s5 + $0x2f0] sm:$0xff] }
 0x49c   : > { %9090 = vmatpush1.bf16.msra.mxu0 %v9089_v27  ;;  %9160 = vmatpush1.bf16.msra.mxu1 %v9089_v27  ;;  %v9113_v22 = vpack.c.bf16 %v5199_v56, %v5198_v50  ;;  %v9116_v17 = vpack.c.bf16 %v5201_v28, %v5200_v60  ;;  %v9119_v29 = vpack.c.bf16 %v5203_v43, %v5202_v11  ;;  %v5311_v19 = vld [vmem:[%s13968_s5 + $0x2e8] sm:$0xff]  ;;  %v5314_v44 = vld [vmem:[%s13968_s5 + $0x300] sm:$0xff]  ;;  %v5317_v45 = vld [vmem:[%s13968_s5 + $0x318] sm:$0xff] }
 0x49d   : > { %9091 = vmatprep.subr.bf16.mxu0 %v14114_v61  ;;  %9145 = vmatprep.subr.bf16.mxu1 %v14114_v61  ;;  %v9122_v48 = vpack.c.bf16 %v5205_v18, %v5204_v53  ;;  %v9125_v58 = vpack.c.bf16 %v5207_v57, %v5206_v63  ;;  %v9128_v41 = vpack.c.bf16 %v5209_v59, %v5208_v14  ;;  %v5315_v38 = vld [vmem:[%s13968_s5 + $0x308] sm:$0xff]  ;;  %v5318_v55 = vld [vmem:[%s13968_s5 + $0x320] sm:$0xff]  ;;  %v5321_v2 = vld [vmem:[%s13968_s5 + $0x338] sm:$0xff] }
 0x49e   : > { %v11989_v31 = vpack.c.bf16 %v5211_v16, %v5210_v1  ;;  %v11991_v26 = vpack.c.bf16 %v5213_v51, %v5212_v13  ;;  %v5178_v34 = vadd.f32 %v11930_v10, %v11932_v40  ;;  %v5179_v3 = vadd.f32 %v11930_v10, %v11934_v23  ;;  %v5297_v23 = vld [vmem:[%s13968_s5 + $0x278] sm:$0xff]  ;;  %v5320_v4 = vld [vmem:[%s13968_s5 + $0x330] sm:$0xff]  ;;  %v5323_v32 = vld [vmem:[%s13968_s5 + $0x348] sm:$0xff] }
 0x49f   : > { %v5180_v0 = vadd.f32 %v11930_v10, %v11936_v39  ;;  %v5181_v42 = vadd.f32 %v11930_v10, %v11938_v5  ;;  %v5293_v10 = vld [vmem:[%s13968_s5 + $0x258] sm:$0xff]  ;;  %v5300_v39 = vld [vmem:[%s13968_s5 + $0x290] sm:$0xff]  ;;  %v5299_v5 = vld [vmem:[%s13968_s5 + $0x288] sm:$0xff] }
 0x4a0   : > { %9093 = vmatpush1.bf16.msra.mxu0 %v9092_v21  ;;  %9161 = vmatpush1.bf16.msra.mxu1 %v9092_v21  ;;  %v5214_v47 = vmax.f32 %v5178_v34, 0.0  ;;  %v5215_v8 = vmax.f32 %v5179_v3, 0.0  ;;  %v5324_v36 = vld [vmem:[%s13968_s5 + $0x350] sm:$0xff]  ;;  %v5327_v24 = vld [vmem:[%s13968_s5 + $0x368] sm:$0xff]  ;;  %v5326_v50 = vld [vmem:[%s13968_s5 + $0x360] sm:$0xff] }
 0x4a1   : > { %9094 = vmatprep.subr.bf16.mxu0 %v14114_v61  ;;  %9146 = vmatprep.subr.bf16.mxu1 %v14114_v61  ;;  %v5216_v35 = vmax.f32 %v5180_v0, 0.0  ;;  %v5217_v7 = vmax.f32 %v5181_v42, 0.0  ;;  %v5330_v56 = vld [vmem:[%s13968_s5 + $0x380] sm:$0xff]  ;;  %v5329_v60 = vld [vmem:[%s13968_s5 + $0x378] sm:$0xff]  ;;  %v5332_v11 = vld [vmem:[%s13968_s5 + $0x390] sm:$0xff] }
 0x4a2   : > { %v9136_v40 = vpack.c.bf16 %v5215_v8, %v5214_v47  ;;  %v5333_v28 = vld [vmem:[%s13968_s5 + $0x398] sm:$0xff]  ;;  %v5336_v43 = vld [vmem:[%s13968_s5 + $0x3b0] sm:$0xff]  ;;  %v5335_v53 = vld [vmem:[%s13968_s5 + $0x3a8] sm:$0xff] }
 0x4a3   : > { %v12003_v15 = vpack.c.bf16 %v5217_v7, %v5216_v35  ;;  %v5339_v18 = vld [vmem:[%s13968_s5 + $0x3c8] sm:$0xff]  ;;  %v5338_v63 = vld [vmem:[%s13968_s5 + $0x3c0] sm:$0xff]  ;;  %v5341_v14 = vld [vmem:[%s13968_s5 + $0x3d8] sm:$0xff] }
 0x4a4   : > { %9096 = vmatpush1.bf16.msra.mxu0 %v9095_v12  ;;  %9162 = vmatpush1.bf16.msra.mxu1 %v9095_v12  ;;  %v5342_v57 = vld [vmem:[%s13968_s5 + $0x3e0] sm:$0xff]  ;;  %v5345_v59 = vld [vmem:[%s13968_s5 + $0x3f8] sm:$0xff]  ;;  %v5344_v1 = vld [vmem:[%s13968_s5 + $0x3f0] sm:$0xff] }
 0x4a5   : > { %9097 = vmatprep.subr.bf16.mxu0 %v14114_v61  ;;  %9147 = vmatprep.subr.bf16.mxu1 %v14114_v61  ;;  %v5348_v16 = vld [vmem:[%s13968_s5 + $0x410] sm:$0xff]  ;;  %v5347_v13 = vld [vmem:[%s13968_s5 + $0x408] sm:$0xff]  ;;  %v5350_v27 = vld [vmem:[%s13968_s5 + $0x420] sm:$0xff] }
 0x4a6   : > { %v5351_v51 = vld [vmem:[%s13968_s5 + $0x428] sm:$0xff]  ;;  %v5354_v21 = vld [vmem:[%s13968_s5 + $0x440] sm:$0xff]  ;;  %v5353_v12 = vld [vmem:[%s13968_s5 + $0x438] sm:$0xff] }
 0x4a7   : > { %v5374_v34 = vld [vmem:[%s13968_s5 + $0x4e0] sm:$0xff]  ;;  %v5377_v0 = vld [vmem:[%s13968_s5 + $0x4f8] sm:$0xff]  ;;  %v5380_v47 = vld [vmem:[%s13968_s5 + $0x510] sm:$0xff] }
 0x4a8   : > { %9099 = vmatpush1.bf16.msra.mxu0 %v9098_v33  ;;  %9163 = vmatpush1.bf16.msra.mxu1 %v9098_v33  ;;  %v5357_v33 = vld [vmem:[%s13968_s5 + $0x458] sm:$0xff]  ;;  %v5378_v3 = vld [vmem:[%s13968_s5 + $0x500] sm:$0xff]  ;;  %v5384_v8 = vld [vmem:[%s13968_s5 + $0x530] sm:$0xff] }
 0x4a9   : > { %9100 = vmatprep.subr.bf16.mxu0 %v14114_v61  ;;  %9148 = vmatprep.subr.bf16.mxu1 %v14114_v61  ;;  %v5381_v42 = vld [vmem:[%s13968_s5 + $0x518] sm:$0xff]  ;;  %v5383_v35 = vld [vmem:[%s13968_s5 + $0x528] sm:$0xff] }
 0x4aa   : > { %v5387_v7 = vld [vmem:[%s13968_s5 + $0x548] sm:$0xff] }
 0x4ac   : > { %9102 = vmatpush1.bf16.msra.mxu0 %v9101_v54  ;;  %9164 = vmatpush1.bf16.msra.mxu1 %v9101_v54  ;;  %v5356_v54 = vld [vmem:[%s13968_s5 + $0x450] sm:$0xff] }
 0x4ad   : > { %9103 = vmatprep.subr.bf16.mxu0 %v14114_v61  ;;  %9149 = vmatprep.subr.bf16.mxu1 %v14114_v61 }
 0x4b0   : > { %9105 = vmatpush1.bf16.msra.mxu0 %v9104_v37  ;;  %9165 = vmatpush1.bf16.msra.mxu1 %v9104_v37  ;;  %v5360_v37 = vld [vmem:[%s13968_s5 + $0x470] sm:$0xff] }
 0x4b1   : > { %9106 = vmatprep.subr.bf16.mxu0 %v14114_v61  ;;  %9150 = vmatprep.subr.bf16.mxu1 %v14114_v61 }
 0x4b4   : > { %9108 = vmatpush1.bf16.msra.mxu0 %v9107_v25  ;;  %9166 = vmatpush1.bf16.msra.mxu1 %v9107_v25  ;;  %v5359_v25 = vld [vmem:[%s13968_s5 + $0x468] sm:$0xff] }
 0x4b5   : > { %9109 = vmatprep.subr.bf16.mxu0 %v14114_v61  ;;  %9151 = vmatprep.subr.bf16.mxu1 %v14114_v61 }
 0x4b8   : > { %9111 = vmatpush1.bf16.msra.mxu0 %v9110_v46  ;;  %9167 = vmatpush1.bf16.msra.mxu1 %v9110_v46  ;;  %v5363_v46 = vld [vmem:[%s13968_s5 + $0x488] sm:$0xff] }
 0x4b9   : > { %9112 = vmatprep.subr.bf16.mxu0 %v14114_v61  ;;  %9152 = vmatprep.subr.bf16.mxu1 %v14114_v61 }
 0x4bc   : > { %9114 = vmatpush1.bf16.msra.mxu0 %v9113_v22  ;;  %9168 = vmatpush1.bf16.msra.mxu1 %v9113_v22  ;;  %v5362_v22 = vld [vmem:[%s13968_s5 + $0x480] sm:$0xff] }
 0x4bd   : > { %9115 = vmatprep.subr.bf16.mxu0 %v14114_v61  ;;  %9153 = vmatprep.subr.bf16.mxu1 %v14114_v61 }
 0x4c0   : > { %9117 = vmatpush1.bf16.msra.mxu0 %v9116_v17  ;;  %9169 = vmatpush1.bf16.msra.mxu1 %v9116_v17  ;;  %v5366_v17 = vld [vmem:[%s13968_s5 + $0x4a0] sm:$0xff] }
 0x4c1   : > { %9118 = vmatprep.subr.bf16.mxu0 %v14114_v61  ;;  %9154 = vmatprep.subr.bf16.mxu1 %v14114_v61 }
 0x4c4   : > { %9120 = vmatpush1.bf16.msra.mxu0 %v9119_v29  ;;  %9170 = vmatpush1.bf16.msra.mxu1 %v9119_v29  ;;  %v5365_v29 = vld [vmem:[%s13968_s5 + $0x498] sm:$0xff] }
 0x4c5   : > { %9121 = vmatprep.subr.bf16.mxu0 %v14114_v61  ;;  %9155 = vmatprep.subr.bf16.mxu1 %v14114_v61 }
 0x4c8   : > { %9123 = vmatpush1.bf16.msra.mxu0 %v9122_v48  ;;  %9171 = vmatpush1.bf16.msra.mxu1 %v9122_v48  ;;  %v5369_v48 = vld [vmem:[%s13968_s5 + $0x4b8] sm:$0xff] }
 0x4c9   : > { %9124 = vmatprep.subr.bf16.mxu0 %v14114_v61  ;;  %9156 = vmatprep.subr.bf16.mxu1 %v14114_v61 }
 0x4cc   : > { %9126 = vmatpush1.bf16.msra.mxu0 %v9125_v58  ;;  %9172 = vmatpush1.bf16.msra.mxu1 %v9125_v58  ;;  %v5368_v58 = vld [vmem:[%s13968_s5 + $0x4b0] sm:$0xff] }
 0x4cd   : > { %9127 = vmatprep.subr.bf16.mxu0 %v14114_v61  ;;  %9157 = vmatprep.subr.bf16.mxu1 %v14114_v61 }
 0x4d0   : > { %9129 = vmatpush1.bf16.msra.mxu0 %v9128_v41  ;;  %9173 = vmatpush1.bf16.msra.mxu1 %v9128_v41  ;;  %v5372_v41 = vld [vmem:[%s13968_s5 + $0x4d0] sm:$0xff] }
 0x4d1   : > { %9130 = vmatprep.subr.bf16.mxu0 %v14114_v61  ;;  %9158 = vmatprep.subr.bf16.mxu1 %v14114_v61 }
 0x4d4   : > { %9132 = vmatpush1.bf16.msra.mxu0 %v11989_v31  ;;  %9174 = vmatpush1.bf16.msra.mxu1 %v11989_v31  ;;  %v5371_v31 = vld [vmem:[%s13968_s5 + $0x4c8] sm:$0xff] }
 0x4d5   : > { %9133 = vmatprep.subr.bf16.mxu0 %v14114_v61  ;;  %9159 = vmatprep.subr.bf16.mxu1 %v14114_v61  ;;  %v5296_v61 = vld [vmem:[%s13968_s5 + $0x270] sm:$0xff] }
 0x4d8   : > { %9135 = vmatpush1.bf16.msra.mxu0 %v11991_v26  ;;  %9175 = vmatpush1.bf16.msra.mxu1 %v11991_v26  ;;  %v5375_v26 = vld [vmem:[%s13968_s5 + $0x4e8] sm:$0xff] }
 0x4d9   : > { %9137 = vmatprep.subr.bf16.mxu1 %v9136_v40 }
 0x4db   : > { %6177 = vmatmul.mubr.f32.vlgmr.msra.gmra.mrb[4].mxu1 %v5293_v10  ;;  %v5389_v10 = vld [vmem:[%s13968_s5 + $0x558] sm:$0xff] }
 0x4dc   : > { %9139 = vmatpush3.bf16.msra.mxu1 %v9136_v40  ;;  %6181 = vmatprep.mubr.f32.mxu1 %v5297_v23  ;;  %v5386_v40 = vld [vmem:[%s13968_s5 + $0x540] sm:$0xff]  ;;  %v5393_v23 = vld [vmem:[%s13968_s5 + $0x578] sm:$0xff] }
 0x4dd   : > { %9141 = vmatprep.subr.bf16.mxu1 %v12003_v15 }
 0x4df   : > { %6182 = vmatmul.mubr.f32.gmra.mrb[6].mxu1 %v5296_v61  ;;  %v5392_v61 = vld [vmem:[%s13968_s5 + $0x570] sm:$0xff] }
 0x4e0   : > { %9143 = vmatpush3.bf16.msra.mxu1 %v12003_v15  ;;  %6186 = vmatprep.mubr.f32.mxu1 %v5300_v39  ;;  %v5390_v15 = vld [vmem:[%s13968_s5 + $0x560] sm:$0xff]  ;;  %v5396_v39 = vld [vmem:[%s13968_s5 + $0x590] sm:$0xff] }
 0x4e3   : > { %6187 = vmatmul.mubr.f32.gmra.mrb[8].mxu1 %v5299_v5  ;;  %v5395_v5 = vld [vmem:[%s13968_s5 + $0x588] sm:$0xff] }
 0x4e4   : > { %6191 = vmatprep.mubr.f32.mxu1 %v5303_v20  ;;  %v5399_v20 = vld [vmem:[%s13968_s5 + $0x5a8] sm:$0xff] }
 0x4e7   : > { %6192 = vmatmul.mubr.f32.gmra.mrb[10].mxu1 %v5302_v30  ;;  %v5398_v30 = vld [vmem:[%s13968_s5 + $0x5a0] sm:$0xff] }
 0x4e8   : > { %6196 = vmatprep.mubr.f32.mxu1 %v5306_v9  ;;  %v5402_v9 = vld [vmem:[%s13968_s5 + $0x5c0] sm:$0xff] }
 0x4eb   : > { %6197 = vmatmul.mubr.f32.gmra.mrb[12].mxu1 %v5305_v49  ;;  %v5401_v49 = vld [vmem:[%s13968_s5 + $0x5b8] sm:$0xff] }
 0x4ec   : > { %6201 = vmatprep.mubr.f32.mxu1 %v5309_v6  ;;  %v5405_v6 = vld [vmem:[%s13968_s5 + $0x5d8] sm:$0xff] }
 0x4ef   : > { %6202 = vmatmul.mubr.f32.gmra.mrb[14].mxu1 %v5308_v62  ;;  %v5404_v62 = vld [vmem:[%s13968_s5 + $0x5d0] sm:$0xff] }
 0x4f0   : > { %6206 = vmatprep.mubr.f32.mxu1 %v5312_v52  ;;  %v5408_v52 = vld [vmem:[%s13968_s5 + $0x5f0] sm:$0xff] }
 0x4f3   : > { %6207 = vmatmul.mubr.f32.gmra.mrb[16].mxu1 %v5311_v19  ;;  %v5407_v19 = vld [vmem:[%s13968_s5 + $0x5e8] sm:$0xff] }
 0x4f4   : > { %6211 = vmatprep.mubr.f32.mxu1 %v5315_v38  ;;  %v5411_v38 = vld [vmem:[%s13968_s5 + $0x608] sm:$0xff] }
 0x4f7   : > { %6212 = vmatmul.mubr.f32.gmra.mrb[18].mxu1 %v5314_v44  ;;  %v5410_v44 = vld [vmem:[%s13968_s5 + $0x600] sm:$0xff] }
 0x4f8   : > { %6216 = vmatprep.mubr.f32.mxu1 %v5318_v55  ;;  %v5414_v55 = vld [vmem:[%s13968_s5 + $0x620] sm:$0xff] }
 0x4fb   : > { %6217 = vmatmul.mubr.f32.gmra.mrb[20].mxu1 %v5317_v45  ;;  %v5413_v45 = vld [vmem:[%s13968_s5 + $0x618] sm:$0xff] }
 0x4fc   : > { %6221 = vmatprep.mubr.f32.mxu1 %v5321_v2  ;;  %v5417_v2 = vld [vmem:[%s13968_s5 + $0x638] sm:$0xff] }
 0x4ff   : > { %6222 = vmatmul.mubr.f32.gmra.mrb[22].mxu1 %v5320_v4  ;;  %v5416_v4 = vld [vmem:[%s13968_s5 + $0x630] sm:$0xff] }
 0x500   : > { %6226 = vmatprep.mubr.f32.mxu1 %v5324_v36  ;;  %v5420_v36 = vld [vmem:[%s13968_s5 + $0x650] sm:$0xff] }
 0x503   : > { %6227 = vmatmul.mubr.f32.gmra.mrb[24].mxu1 %v5323_v32  ;;  %v5419_v32 = vld [vmem:[%s13968_s5 + $0x648] sm:$0xff] }
 0x504   : > { %6231 = vmatprep.mubr.f32.mxu1 %v5327_v24  ;;  %v5423_v24 = vld [vmem:[%s13968_s5 + $0x668] sm:$0xff] }
 0x507   : > { %6232 = vmatmul.mubr.f32.gmra.mrb[26].mxu1 %v5326_v50  ;;  %v5422_v50 = vld [vmem:[%s13968_s5 + $0x660] sm:$0xff] }
 0x508   : > { %6236 = vmatprep.mubr.f32.mxu1 %v5330_v56  ;;  %v5426_v56 = vld [vmem:[%s13968_s5 + $0x680] sm:$0xff] }
 0x50b   : > { %6237 = vmatmul.mubr.f32.gmra.mrb[28].mxu1 %v5329_v60  ;;  %v5425_v60 = vld [vmem:[%s13968_s5 + $0x678] sm:$0xff] }
 0x50c   : > { %6241 = vmatprep.mubr.f32.mxu1 %v5333_v28  ;;  %v5429_v28 = vld [vmem:[%s13968_s5 + $0x698] sm:$0xff] }
 0x50f   : > { %6242 = vmatmul.mubr.f32.gmra.mrb[30].mxu1 %v5332_v11  ;;  %v5428_v11 = vld [vmem:[%s13968_s5 + $0x690] sm:$0xff] }
 0x510   : > { %6246 = vmatprep.mubr.f32.mxu1 %v5336_v43  ;;  %v5432_v43 = vld [vmem:[%s13968_s5 + $0x6b0] sm:$0xff] }
 0x513   : > { %6247 = vmatmul.mubr.f32.gmra.mrb[32].mxu1 %v5335_v53  ;;  %v5431_v53 = vld [vmem:[%s13968_s5 + $0x6a8] sm:$0xff] }
 0x514   : > { %6251 = vmatprep.mubr.f32.mxu1 %v5339_v18  ;;  %v5435_v18 = vld [vmem:[%s13968_s5 + $0x6c8] sm:$0xff] }
 0x517   : > { %6252 = vmatmul.mubr.f32.gmra.mrb[34].mxu1 %v5338_v63  ;;  %v5434_v63 = vld [vmem:[%s13968_s5 + $0x6c0] sm:$0xff] }
 0x518   : > { %6256 = vmatprep.mubr.f32.mxu1 %v5342_v57  ;;  %v5438_v57 = vld [vmem:[%s13968_s5 + $0x6e0] sm:$0xff] }
 0x51b   : > { %6257 = vmatmul.mubr.f32.gmra.mrb[36].mxu1 %v5341_v14  ;;  %v5437_v14 = vld [vmem:[%s13968_s5 + $0x6d8] sm:$0xff] }
 0x51c   : > { %6261 = vmatprep.mubr.f32.mxu1 %v5345_v59  ;;  %v5441_v59 = vld [vmem:[%s13968_s5 + $0x6f8] sm:$0xff] }
 0x51f   : > { %6262 = vmatmul.mubr.f32.gmra.mrb[38].mxu1 %v5344_v1  ;;  %v5440_v1 = vld [vmem:[%s13968_s5 + $0x6f0] sm:$0xff] }
 0x520   : > { %6266 = vmatprep.mubr.f32.mxu1 %v5348_v16  ;;  %v5444_v16 = vld [vmem:[%s13968_s5 + $0x710] sm:$0xff] }
 0x523   : > { %6267 = vmatmul.mubr.f32.gmra.mrb[40].mxu1 %v5347_v13  ;;  %v5443_v13 = vld [vmem:[%s13968_s5 + $0x708] sm:$0xff] }
 0x524   : > { %6271 = vmatprep.mubr.f32.mxu1 %v5351_v51  ;;  %v5447_v51 = vld [vmem:[%s13968_s5 + $0x728] sm:$0xff] }
 0x527   : > { %6272 = vmatmul.mubr.f32.gmra.mrb[42].mxu1 %v5350_v27  ;;  %v5446_v27 = vld [vmem:[%s13968_s5 + $0x720] sm:$0xff] }
 0x528   : > { %6276 = vmatprep.mubr.f32.mxu1 %v5354_v21  ;;  %v5450_v21 = vld [vmem:[%s13968_s5 + $0x740] sm:$0xff] }
 0x52b   : > { %6277 = vmatmul.mubr.f32.gmra.mrb[44].mxu1 %v5353_v12  ;;  %v5449_v12 = vld [vmem:[%s13968_s5 + $0x738] sm:$0xff] }
 0x52c   : > { %6281 = vmatprep.mubr.f32.mxu1 %v5357_v33  ;;  %v5453_v33 = vld [vmem:[%s13968_s5 + $0x758] sm:$0xff] }
 0x52f   : > { %6282 = vmatmul.mubr.f32.gmra.mrb[46].mxu1 %v5356_v54  ;;  %v5452_v54 = vld [vmem:[%s13968_s5 + $0x750] sm:$0xff] }
 0x530   : > { %6286 = vmatprep.mubr.f32.mxu1 %v5360_v37  ;;  %v5456_v37 = vld [vmem:[%s13968_s5 + $0x770] sm:$0xff] }
 0x533   : > { %6287 = vmatmul.mubr.f32.gmra.mrb[48].mxu1 %v5359_v25 }
 0x534   : > { %6291 = vmatprep.mubr.f32.mxu1 %v5363_v46 }
 0x537   : > { %6292 = vmatmul.mubr.f32.gmra.mrb[50].mxu1 %v5362_v22  ;;  %v5455_v22 = vld [vmem:[%s13968_s5 + $0x768] sm:$0xff] }
 0x538   : > { %6296 = vmatprep.mubr.f32.mxu1 %v5366_v17  ;;  %v5459_v17 = vld [vmem:[%s13968_s5 + $0x788] sm:$0xff] }
 0x53b   : > { %6297 = vmatmul.mubr.f32.gmra.mrb[52].mxu1 %v5365_v29 }
 0x53c   : > { %6301 = vmatprep.mubr.f32.mxu1 %v5369_v48 }
 0x53f   : > { %6302 = vmatmul.mubr.f32.gmra.mrb[54].mxu1 %v5368_v58  ;;  %v5458_v58 = vld [vmem:[%s13968_s5 + $0x780] sm:$0xff] }
 0x540   : > { %6306 = vmatprep.mubr.f32.mxu1 %v5372_v41  ;;  %v5462_v41 = vld [vmem:[%s13968_s5 + $0x7a0] sm:$0xff] }
 0x543   : > { %6307 = vmatmul.mubr.f32.gmra.mrb[56].mxu1 %v5371_v31 }
 0x544   : > { %6311 = vmatprep.mubr.f32.mxu1 %v5375_v26 }
 0x547   : > { %6312 = vmatmul.mubr.f32.gmra.mrb[58].mxu1 %v5374_v34  ;;  %v5461_v34 = vld [vmem:[%s13968_s5 + $0x798] sm:$0xff] }
 0x548   : > { %6316 = vmatprep.mubr.f32.mxu1 %v5378_v3  ;;  %v5465_v3 = vld [vmem:[%s13968_s5 + $0x7b8] sm:$0xff] }
 0x54b   : > { %6317 = vmatmul.mubr.f32.gmra.mrb[60].mxu1 %v5377_v0 }
 0x54c   : > { %6321 = vmatprep.mubr.f32.mxu1 %v5381_v42 }
 0x54f   : > { %6322 = vmatmul.mubr.f32.gmra.mrb[62].mxu1 %v5380_v47  ;;  %v5464_v47 = vld [vmem:[%s13968_s5 + $0x7b0] sm:$0xff] }
 0x550   : > { %6326 = vmatprep.mubr.f32.mxu1 %v5384_v8  ;;  %v5468_v8 = vld [vmem:[%s13968_s5 + $0x7d0] sm:$0xff] }
 0x553   : > { %6327 = vmatmul.mubr.f32.gmra.mrb[64].mxu1 %v5383_v35 }
 0x554   : > { %6331 = vmatprep.mubr.f32.mxu1 %v5387_v7 }
 0x557   : > { %6332 = vmatmul.mubr.f32.gmra.mrb[66].mxu1 %v5386_v40  ;;  %v5467_v40 = vld [vmem:[%s13968_s5 + $0x7c8] sm:$0xff] }
 0x558   : > { %6336 = vmatprep.mubr.f32.mxu1 %v5390_v15  ;;  %v5471_v15 = vld [vmem:[%s13968_s5 + $0x7e8] sm:$0xff] }
 0x55b   : > { %6337 = vmatmul.mubr.f32.gmra.mrb[68].mxu1 %v5389_v10 }
 0x55c   : > { %6341 = vmatprep.mubr.f32.mxu1 %v5393_v23 }
 0x55f   : > { %6342 = vmatmul.mubr.f32.gmra.mrb[70].mxu1 %v5392_v61  ;;  %v5470_v61 = vld [vmem:[%s13968_s5 + $0x7e0] sm:$0xff] }
 0x560   : > { %6346 = vmatprep.mubr.f32.mxu1 %v5396_v39  ;;  %v5474_v39 = vld [vmem:[%s13968_s5 + $0x800] sm:$0xff] }
 0x563   : > { %6347 = vmatmul.mubr.f32.gmra.mrb[72].mxu1 %v5395_v5 }
 0x564   : > { %6351 = vmatprep.mubr.f32.mxu1 %v5399_v20  ;;  %v5219_v20 = vld [vmem:[%s13968_s5 + $0x8] sm:$0xff] }
 0x565   : > { %6051 = vmatprep.mubr.f32.mxu0 %v5219_v20  ;;  %v5500_v20 = vld [vmem:[%s13968_s5 + $0x8d0] sm:$0xff] }
 0x567   : > { %6352 = vmatmul.mubr.f32.gmra.mrb[74].mxu1 %v5398_v30 }
 0x568   : > { %6356 = vmatprep.mubr.f32.mxu1 %v5402_v9  ;;  %v5218_v9 = vld [vmem:[%s13968_s5] sm:$0xff] }
 0x569   : > { %6052 = vmatmul.mubr.f32.vlgmr.msra.gmra.mrb[36].mxu0 %v5218_v9 }
 0x56b   : > { %6357 = vmatmul.mubr.f32.gmra.mrb[76].mxu1 %v5401_v49  ;;  %v5473_v49 = vld [vmem:[%s13968_s5 + $0x7f8] sm:$0xff] }
 0x56c   : > { %6361 = vmatprep.mubr.f32.mxu1 %v5405_v6  ;;  %v5477_v6 = vld [vmem:[%s13968_s5 + $0x818] sm:$0xff] }
 0x56f   : > { %6362 = vmatmul.mubr.f32.gmra.mrb[78].mxu1 %v5404_v62 }
 0x570   : > { %6366 = vmatprep.mubr.f32.mxu1 %v5408_v52  ;;  %v5222_v52 = vld [vmem:[%s13968_s5 + $0x20] sm:$0xff] }
 0x571   : > { %6056 = vmatprep.mubr.f32.mxu0 %v5222_v52  ;;  %v5248_v52 = vld [vmem:[%s13968_s5 + $0xf0] sm:$0xff] }
 0x573   : > { %6367 = vmatmul.mubr.f32.gmra.mrb[80].mxu1 %v5407_v19 }
 0x574   : > { %6371 = vmatprep.mubr.f32.mxu1 %v5411_v38  ;;  %v5221_v38 = vld [vmem:[%s13968_s5 + $0x18] sm:$0xff] }
 0x575   : > { %6057 = vmatmul.mubr.f32.gmra.mrb[38].mxu0 %v5221_v38  ;;  %v5507_v38 = vld [vmem:[%s13968_s5 + $0x908] sm:$0xff] }
 0x577   : > { %6372 = vmatmul.mubr.f32.gmra.mrb[82].mxu1 %v5410_v44  ;;  %v5476_v44 = vld [vmem:[%s13968_s5 + $0x810] sm:$0xff] }
 0x578   : > { %6376 = vmatprep.mubr.f32.mxu1 %v5414_v55  ;;  %v5480_v55 = vld [vmem:[%s13968_s5 + $0x830] sm:$0xff] }
 0x57b   : > { %6377 = vmatmul.mubr.f32.gmra.mrb[84].mxu1 %v5413_v45 }
 0x57c   : > { %6381 = vmatprep.mubr.f32.mxu1 %v5417_v2  ;;  %v5225_v2 = vld [vmem:[%s13968_s5 + $0x38] sm:$0xff] }
 0x57d   : > { %6061 = vmatprep.mubr.f32.mxu0 %v5225_v2 }
 0x57f   : > { %6382 = vmatmul.mubr.f32.gmra.mrb[86].mxu1 %v5416_v4 }
 0x580   : > { %6386 = vmatprep.mubr.f32.mxu1 %v5420_v36  ;;  %v5224_v36 = vld [vmem:[%s13968_s5 + $0x30] sm:$0xff] }
 0x581   : > { %6062 = vmatmul.mubr.f32.gmra.mrb[40].mxu0 %v5224_v36  ;;  %v5506_v36 = vld [vmem:[%s13968_s5 + $0x900] sm:$0xff] }
 0x583   : > { %6387 = vmatmul.mubr.f32.gmra.mrb[88].mxu1 %v5419_v32  ;;  %v5479_v32 = vld [vmem:[%s13968_s5 + $0x828] sm:$0xff] }
 0x584   : > { %6391 = vmatprep.mubr.f32.mxu1 %v5423_v24  ;;  %v5483_v24 = vld [vmem:[%s13968_s5 + $0x848] sm:$0xff] }
 0x587   : > { %6392 = vmatmul.mubr.f32.gmra.mrb[90].mxu1 %v5422_v50 }
 0x588   : > { %6396 = vmatprep.mubr.f32.mxu1 %v5426_v56  ;;  %v5228_v56 = vld [vmem:[%s13968_s5 + $0x50] sm:$0xff] }
 0x589   : > { %6066 = vmatprep.mubr.f32.mxu0 %v5228_v56  ;;  %v5255_v56 = vld [vmem:[%s13968_s5 + $0x128] sm:$0xff] }
 0x58b   : > { %6397 = vmatmul.mubr.f32.gmra.mrb[92].mxu1 %v5425_v60 }
 0x58c   : > { %6401 = vmatprep.mubr.f32.mxu1 %v5429_v28  ;;  %v5227_v28 = vld [vmem:[%s13968_s5 + $0x48] sm:$0xff] }
 0x58d   : > { %6067 = vmatmul.mubr.f32.gmra.mrb[42].mxu0 %v5227_v28  ;;  %v5254_v28 = vld [vmem:[%s13968_s5 + $0x120] sm:$0xff] }
 0x58f   : > { %6402 = vmatmul.mubr.f32.gmra.mrb[94].mxu1 %v5428_v11  ;;  %v5482_v11 = vld [vmem:[%s13968_s5 + $0x840] sm:$0xff] }
 0x590   : > { %6406 = vmatprep.mubr.f32.mxu1 %v5432_v43  ;;  %v5486_v43 = vld [vmem:[%s13968_s5 + $0x860] sm:$0xff] }
 0x593   : > { %6407 = vmatmul.mubr.f32.gmra.mrb[96].mxu1 %v5431_v53 }
 0x594   : > { %6411 = vmatprep.mubr.f32.mxu1 %v5435_v18  ;;  %v5231_v18 = vld [vmem:[%s13968_s5 + $0x68] sm:$0xff] }
 0x595   : > { %6071 = vmatprep.mubr.f32.mxu0 %v5231_v18 }
 0x597   : > { %6412 = vmatmul.mubr.f32.gmra.mrb[98].mxu1 %v5434_v63 }
 0x598   : > { %6416 = vmatprep.mubr.f32.mxu1 %v5438_v57  ;;  %v5230_v57 = vld [vmem:[%s13968_s5 + $0x60] sm:$0xff] }
 0x599   : > { %6072 = vmatmul.mubr.f32.gmra.mrb[44].mxu0 %v5230_v57 }
 0x59b   : > { %6417 = vmatmul.mubr.f32.gmra.mrb[100].mxu1 %v5437_v14  ;;  %v5485_v14 = vld [vmem:[%s13968_s5 + $0x858] sm:$0xff] }
 0x59c   : > { %6421 = vmatprep.mubr.f32.mxu1 %v5441_v59  ;;  %v5489_v59 = vld [vmem:[%s13968_s5 + $0x878] sm:$0xff] }
 0x59f   : > { %6422 = vmatmul.mubr.f32.gmra.mrb[102].mxu1 %v5440_v1 }
 0x5a0   : > { %6426 = vmatprep.mubr.f32.mxu1 %v5444_v16  ;;  %v5234_v16 = vld [vmem:[%s13968_s5 + $0x80] sm:$0xff] }
 0x5a1   : > { %6076 = vmatprep.mubr.f32.mxu0 %v5234_v16  ;;  %v5516_v16 = vld [vmem:[%s13968_s5 + $0x950] sm:$0xff] }
 0x5a3   : > { %6427 = vmatmul.mubr.f32.gmra.mrb[104].mxu1 %v5443_v13 }
 0x5a4   : > { %6431 = vmatprep.mubr.f32.mxu1 %v5447_v51  ;;  %v5233_v51 = vld [vmem:[%s13968_s5 + $0x78] sm:$0xff] }
 0x5a5   : > { %6077 = vmatmul.mubr.f32.gmra.mrb[46].mxu0 %v5233_v51  ;;  %v5261_v51 = vld [vmem:[%s13968_s5 + $0x158] sm:$0xff] }
 0x5a7   : > { %6432 = vmatmul.mubr.f32.gmra.mrb[106].mxu1 %v5446_v27  ;;  %v5488_v27 = vld [vmem:[%s13968_s5 + $0x870] sm:$0xff] }
 0x5a8   : > { %6436 = vmatprep.mubr.f32.mxu1 %v5450_v21  ;;  %v5492_v21 = vld [vmem:[%s13968_s5 + $0x890] sm:$0xff] }
 0x5ab   : > { %6437 = vmatmul.mubr.f32.gmra.mrb[108].mxu1 %v5449_v12 }
 0x5ac   : > { %6441 = vmatprep.mubr.f32.mxu1 %v5453_v33  ;;  %v5237_v33 = vld [vmem:[%s13968_s5 + $0x98] sm:$0xff] }
 0x5ad   : > { %6081 = vmatprep.mubr.f32.mxu0 %v5237_v33  ;;  %v5515_v33 = vld [vmem:[%s13968_s5 + $0x948] sm:$0xff] }
 0x5ae   : > { %v12361_v25 = vpop.f32.mrb[4].mxu1 }
 0x5af   : > { %v6180_v46 = vpop.f32.mrb[5].mxu1  ;;  %6442 = vmatmul.mubr.f32.gmra.mrb[110].mxu1 %v5452_v54 }
 0x5b0   : > { %6446 = vmatprep.mubr.f32.mxu1 %v5456_v37  ;;  %v5236_v37 = vld [vmem:[%s13968_s5 + $0x90] sm:$0xff]  ;;  %v5491_v46 = vld [vmem:[%s13968_s5 + $0x888] sm:$0xff] }
 0x5b1   : > { %6082 = vmatmul.mubr.f32.gmra.mrb[48].mxu0 %v5236_v37 }
 0x5b2   : > { %v12369_v29 = vpop.f32.mrb[6].mxu1 }
 0x5b3   : > { %v6185_v48 = vpop.f32.mrb[7].mxu1  ;;  %6447 = vmatmul.mubr.f32.gmra.mrb[112].mxu1 %v5455_v22  ;;  %v5495_v22 = vld [vmem:[%s13968_s5 + $0x8a8] sm:$0xff] }
 0x5b4   : > { %6451 = vmatprep.mubr.f32.mxu1 %v5459_v17  ;;  %v5240_v48 = vld [vmem:[%s13968_s5 + $0xb0] sm:$0xff] }
 0x5b5   : > { %6086 = vmatprep.mubr.f32.mxu0 %v5240_v48  ;;  %v5263_v48 = vld [vmem:[%s13968_s5 + $0x168] sm:$0xff] }
 0x5b6   : > { %v12377_v31 = vpop.f32.mrb[8].mxu1 }
 0x5b7   : > { %v6190_v26 = vpop.f32.mrb[9].mxu1  ;;  %6452 = vmatmul.mubr.f32.gmra.mrb[114].mxu1 %v5458_v58 }
 0x5b8   : > { %6456 = vmatprep.mubr.f32.mxu1 %v5462_v41  ;;  %v5239_v41 = vld [vmem:[%s13968_s5 + $0xa8] sm:$0xff]  ;;  %v5494_v26 = vld [vmem:[%s13968_s5 + $0x8a0] sm:$0xff] }
 0x5b9   : > { %6087 = vmatmul.mubr.f32.gmra.mrb[50].mxu0 %v5239_v41  ;;  %v5522_v41 = vld [vmem:[%s13968_s5 + $0x980] sm:$0xff] }
 0x5ba   : > { %v12385_v0 = vpop.f32.mrb[10].mxu1 }
 0x5bb   : > { %v6195_v42 = vpop.f32.mrb[11].mxu1  ;;  %6457 = vmatmul.mubr.f32.gmra.mrb[116].mxu1 %v5461_v34  ;;  %v5498_v34 = vld [vmem:[%s13968_s5 + $0x8c0] sm:$0xff] }
 0x5bc   : > { %6461 = vmatprep.mubr.f32.mxu1 %v5465_v3  ;;  %v5243_v42 = vld [vmem:[%s13968_s5 + $0xc8] sm:$0xff] }
 0x5bd   : > { %6091 = vmatprep.mubr.f32.mxu0 %v5243_v42 }
 0x5be   : > { %v12393_v35 = vpop.f32.mrb[12].mxu1 }
 0x5bf   : > { %v6200_v7 = vpop.f32.mrb[13].mxu1  ;;  %6462 = vmatmul.mubr.f32.gmra.mrb[118].mxu1 %v5464_v47 }
 0x5c0   : > { %6466 = vmatprep.mubr.f32.mxu1 %v5468_v8  ;;  %v5242_v8 = vld [vmem:[%s13968_s5 + $0xc0] sm:$0xff]  ;;  %v5497_v7 = vld [vmem:[%s13968_s5 + $0x8b8] sm:$0xff] }
 0x5c1   : > { %6092 = vmatmul.mubr.f32.gmra.mrb[52].mxu0 %v5242_v8  ;;  %v5521_v8 = vld [vmem:[%s13968_s5 + $0x978] sm:$0xff] }
 0x5c2   : > { %v12401_v10 = vpop.f32.mrb[14].mxu1 }
 0x5c3   : > { %v6205_v23 = vpop.f32.mrb[15].mxu1  ;;  %6467 = vmatmul.mubr.f32.gmra.mrb[120].mxu1 %v5467_v40  ;;  %v5501_v40 = vld [vmem:[%s13968_s5 + $0x8d8] sm:$0xff] }
 0x5c4   : > { %6471 = vmatprep.mubr.f32.mxu1 %v5471_v15  ;;  %v5246_v23 = vld [vmem:[%s13968_s5 + $0xe0] sm:$0xff] }
 0x5c5   : > { %6096 = vmatprep.mubr.f32.mxu0 %v5246_v23  ;;  %v5270_v23 = vld [vmem:[%s13968_s5 + $0x1a0] sm:$0xff] }
 0x5c6   : > { %v12409_v5 = vpop.f32.mrb[16].mxu1 }
 0x5c7   : > { %v6210_v30 = vpop.f32.mrb[17].mxu1  ;;  %6472 = vmatmul.mubr.f32.gmra.mrb[122].mxu1 %v5470_v61 }
 0x5c8   : > { %6476 = vmatprep.mubr.f32.mxu1 %v5474_v39  ;;  %v5245_v39 = vld [vmem:[%s13968_s5 + $0xd8] sm:$0xff]  ;;  %v5504_v30 = vld [vmem:[%s13968_s5 + $0x8f0] sm:$0xff] }
 0x5c9   : > { %6097 = vmatmul.mubr.f32.gmra.mrb[54].mxu0 %v5245_v39  ;;  %v5269_v39 = vld [vmem:[%s13968_s5 + $0x198] sm:$0xff] }
 0x5ca   : > { %v12423_v62 = vpop.f32.mrb[18].mxu1 }
 0x5cb   : > { %v6215_v19 = vpop.f32.mrb[19].mxu1  ;;  %6477 = vmatmul.mubr.f32.gmra.mrb[124].mxu1 %v5473_v49  ;;  %v5249_v49 = vld [vmem:[%s13968_s5 + $0xf8] sm:$0xff] }
 0x5cc   : > { %6481 = vmatprep.mubr.f32.mxu1 %v5477_v6  ;;  %6101 = vmatprep.mubr.f32.mxu0 %v5249_v49  ;;  %v5503_v19 = vld [vmem:[%s13968_s5 + $0x8e8] sm:$0xff] }
 0x5cd   : > { %6102 = vmatmul.mubr.f32.gmra.mrb[56].mxu0 %v5248_v52 }
 0x5ce   : > { %v12437_v45 = vpop.f32.mrb[20].mxu1 }
 0x5cf   : > { %v6220_v4 = vpop.f32.mrb[21].mxu1  ;;  %6482 = vmatmul.mubr.f32.gmra.mrb[126].mxu1 %v5476_v44 }
 0x5d0   : > { %6486 = vmatprep.mubr.f32.mxu1 %v5480_v55  ;;  %v5252_v55 = vld [vmem:[%s13968_s5 + $0x110] sm:$0xff]  ;;  %v5251_v4 = vld [vmem:[%s13968_s5 + $0x108] sm:$0xff] }
 0x5d1   : > { %6106 = vmatprep.mubr.f32.mxu0 %v5252_v55  ;;  %v5531_v55 = vld [vmem:[%s13968_s5 + $0x9c8] sm:$0xff] }
 0x5d2   : > { %v12451_v50 = vpop.f32.mrb[22].mxu1  ;;  %6107 = vmatmul.mubr.f32.gmra.mrb[58].mxu0 %v5251_v4  ;;  %v5276_v4 = vld [vmem:[%s13968_s5 + $0x1d0] sm:$0xff] }
 0x5d3   : > { %v6225_v60 = vpop.f32.mrb[23].mxu1  ;;  %6487 = vmatmul.mubr.f32.gmra.mrb[128].mxu1 %v5479_v32  ;;  %v5510_v32 = vld [vmem:[%s13968_s5 + $0x920] sm:$0xff]  ;;  %6111 = vmatprep.mubr.f32.mxu0 %v5255_v56 }
 0x5d4   : > { %6491 = vmatprep.mubr.f32.mxu1 %v5483_v24  ;;  %v5530_v56 = vld [vmem:[%s13968_s5 + $0x9c0] sm:$0xff] }
 0x5d6   : > { %v12465_v53 = vpop.f32.mrb[24].mxu1  ;;  %6112 = vmatmul.mubr.f32.gmra.mrb[60].mxu0 %v5254_v28 }
 0x5d7   : > { %v6230_v63 = vpop.f32.mrb[25].mxu1  ;;  %6492 = vmatmul.mubr.f32.gmra.mrb[130].mxu1 %v5482_v11  ;;  %v5509_v11 = vld [vmem:[%s13968_s5 + $0x918] sm:$0xff] }
 0x5d8   : > { %6496 = vmatprep.mubr.f32.mxu1 %v5486_v43  ;;  %v5513_v43 = vld [vmem:[%s13968_s5 + $0x938] sm:$0xff]  ;;  %v5258_v63 = vld [vmem:[%s13968_s5 + $0x140] sm:$0xff] }
 0x5d9   : > { %6116 = vmatprep.mubr.f32.mxu0 %v5258_v63  ;;  %v5278_v63 = vld [vmem:[%s13968_s5 + $0x1e0] sm:$0xff] }
 0x5da   : > { %v12479_v1 = vpop.f32.mrb[26].mxu1 }
 0x5db   : > { %v6235_v13 = vpop.f32.mrb[27].mxu1  ;;  %6497 = vmatmul.mubr.f32.gmra.mrb[132].mxu1 %v5485_v14  ;;  %v5257_v14 = vld [vmem:[%s13968_s5 + $0x138] sm:$0xff] }
 0x5dc   : > { %6501 = vmatprep.mubr.f32.mxu1 %v5489_v59  ;;  %v5512_v59 = vld [vmem:[%s13968_s5 + $0x930] sm:$0xff]  ;;  %6117 = vmatmul.mubr.f32.gmra.mrb[62].mxu0 %v5257_v14  ;;  %v5537_v14 = vld [vmem:[%s13968_s5 + $0x9f8] sm:$0xff] }
 0x5dd   : > { %6121 = vmatprep.mubr.f32.mxu0 %v5261_v51 }
 0x5de   : > { %v12493_v12 = vpop.f32.mrb[28].mxu1 }
 0x5df   : > { %v6240_v54 = vpop.f32.mrb[29].mxu1  ;;  %6502 = vmatmul.mubr.f32.gmra.mrb[134].mxu1 %v5488_v27 }
 0x5e0   : > { %6506 = vmatprep.mubr.f32.mxu1 %v5492_v21  ;;  %v5260_v21 = vld [vmem:[%s13968_s5 + $0x150] sm:$0xff]  ;;  %v5519_v54 = vld [vmem:[%s13968_s5 + $0x968] sm:$0xff] }
 0x5e1   : > { %6122 = vmatmul.mubr.f32.gmra.mrb[64].mxu0 %v5260_v21  ;;  %v5536_v21 = vld [vmem:[%s13968_s5 + $0x9f0] sm:$0xff] }
 0x5e2   : > { %v12507_v17 = vpop.f32.mrb[30].mxu1 }
 0x5e3   : > { %v6245_v58 = vpop.f32.mrb[31].mxu1  ;;  %6507 = vmatmul.mubr.f32.gmra.mrb[136].mxu1 %v5491_v46  ;;  %v5264_v46 = vld [vmem:[%s13968_s5 + $0x170] sm:$0xff] }
 0x5e4   : > { %6511 = vmatprep.mubr.f32.mxu1 %v5495_v22  ;;  %6126 = vmatprep.mubr.f32.mxu0 %v5264_v46  ;;  %v5518_v58 = vld [vmem:[%s13968_s5 + $0x960] sm:$0xff]  ;;  %v5285_v46 = vld [vmem:[%s13968_s5 + $0x218] sm:$0xff] }
 0x5e5   : > { %6127 = vmatmul.mubr.f32.gmra.mrb[66].mxu0 %v5263_v48  ;;  %v5284_v48 = vld [vmem:[%s13968_s5 + $0x210] sm:$0xff] }
 0x5e6   : > { %v12521_v3 = vpop.f32.mrb[32].mxu1 }
 0x5e7   : > { %v6250_v47 = vpop.f32.mrb[33].mxu1  ;;  %6512 = vmatmul.mubr.f32.gmra.mrb[138].mxu1 %v5494_v26 }
 0x5e8   : > { %6516 = vmatprep.mubr.f32.mxu1 %v5498_v34  ;;  %v5267_v34 = vld [vmem:[%s13968_s5 + $0x188] sm:$0xff]  ;;  %v5266_v47 = vld [vmem:[%s13968_s5 + $0x180] sm:$0xff] }
 0x5e9   : > { %6131 = vmatprep.mubr.f32.mxu0 %v5267_v34 }
 0x5ea   : > { %v12535_v15 = vpop.f32.mrb[34].mxu1  ;;  %6132 = vmatmul.mubr.f32.gmra.mrb[68].mxu0 %v5266_v47 }
 0x5eb   : > { %v6255_v61 = vpop.f32.mrb[35].mxu1  ;;  %6517 = vmatmul.mubr.f32.gmra.mrb[140].mxu1 %v5497_v7  ;;  %v5525_v7 = vld [vmem:[%s13968_s5 + $0x998] sm:$0xff]  ;;  %6136 = vmatprep.mubr.f32.mxu0 %v5270_v23  ;;  %v5546_v23 = vld [vmem:[%s13968_s5 + $0xa40] sm:$0xff] }
 0x5ec   : > { %6521 = vmatprep.mubr.f32.mxu1 %v5501_v40 }
 0x5ee   : > { %v12549_v9 = vpop.f32.mrb[36].mxu1  ;;  %6137 = vmatmul.mubr.f32.gmra.mrb[70].mxu0 %v5269_v39  ;;  %v5291_v39 = vld [vmem:[%s13968_s5 + $0x248] sm:$0xff] }
 0x5ef   : > { %v6260_v6 = vpop.f32.mrb[37].mxu1  ;;  %6522 = vmatmul.mubr.f32.gmra.mrb[142].mxu1 %v5500_v20  ;;  %v5524_v20 = vld [vmem:[%s13968_s5 + $0x990] sm:$0xff] }
 0x5f0   : > { %6526 = vmatprep.mubr.f32.mxu1 %v5504_v30  ;;  %v5528_v30 = vld [vmem:[%s13968_s5 + $0x9b0] sm:$0xff]  ;;  %v5273_v6 = vld [vmem:[%s13968_s5 + $0x1b8] sm:$0xff] }
 0x5f1   : > { %6141 = vmatprep.mubr.f32.mxu0 %v5273_v6  ;;  %v5545_v6 = vld [vmem:[%s13968_s5 + $0xa38] sm:$0xff] }
 0x5f2   : > { %v12563_v44 = vpop.f32.mrb[38].mxu1 }
 0x5f3   : > { %v6265_v2 = vpop.f32.mrb[39].mxu1  ;;  %6527 = vmatmul.mubr.f32.gmra.mrb[144].mxu1 %v5503_v19  ;;  %v5272_v19 = vld [vmem:[%s13968_s5 + $0x1b0] sm:$0xff] }
 0x5f4   : > { %6531 = vmatprep.mubr.f32.mxu1 %v5507_v38  ;;  %v5527_v38 = vld [vmem:[%s13968_s5 + $0x9a8] sm:$0xff]  ;;  %6142 = vmatmul.mubr.f32.gmra.mrb[72].mxu0 %v5272_v19 }
 0x5f5   : > { %6146 = vmatprep.mubr.f32.mxu0 %v5276_v4  ;;  %v5552_v4 = vld [vmem:[%s13968_s5 + $0xa70] sm:$0xff] }
 0x5f6   : > { %v12577_v24 = vpop.f32.mrb[40].mxu1 }
 0x5f7   : > { %v6270_v60 = vpop.f32.mrb[41].mxu1  ;;  %6532 = vmatmul.mubr.f32.gmra.mrb[146].mxu1 %v5506_v36 }
 0x5f8   : > { %6536 = vmatprep.mubr.f32.mxu1 %v5510_v32  ;;  %v5275_v32 = vld [vmem:[%s13968_s5 + $0x1c8] sm:$0xff]  ;;  %v5534_v60 = vld [vmem:[%s13968_s5 + $0x9e0] sm:$0xff] }
 0x5f9   : > { %6147 = vmatmul.mubr.f32.gmra.mrb[74].mxu0 %v5275_v32 }
 0x5fa   : > { %v12591_v18 = vpop.f32.mrb[42].mxu1 }
 0x5fb   : > { %v6275_v57 = vpop.f32.mrb[43].mxu1  ;;  %6537 = vmatmul.mubr.f32.gmra.mrb[148].mxu1 %v5509_v11  ;;  %v5279_v11 = vld [vmem:[%s13968_s5 + $0x1e8] sm:$0xff] }
 0x5fc   : > { %6541 = vmatprep.mubr.f32.mxu1 %v5513_v43  ;;  %6151 = vmatprep.mubr.f32.mxu0 %v5279_v11  ;;  %v5533_v57 = vld [vmem:[%s13968_s5 + $0x9d8] sm:$0xff] }
 0x5fd   : > { %6152 = vmatmul.mubr.f32.gmra.mrb[76].mxu0 %v5278_v63  ;;  %v5554_v63 = vld [vmem:[%s13968_s5 + $0xa80] sm:$0xff] }
 0x5fe   : > { %v12605_v13 = vpop.f32.mrb[44].mxu1 }
 0x5ff   : > { %v6280_v27 = vpop.f32.mrb[45].mxu1  ;;  %6542 = vmatmul.mubr.f32.gmra.mrb[150].mxu1 %v5512_v59 }
 0x600   : > { %6546 = vmatprep.mubr.f32.mxu1 %v5516_v16  ;;  %v5282_v16 = vld [vmem:[%s13968_s5 + $0x200] sm:$0xff]  ;;  %v5281_v27 = vld [vmem:[%s13968_s5 + $0x1f8] sm:$0xff] }
 0x601   : > { %6156 = vmatprep.mubr.f32.mxu0 %v5282_v16 }
 0x602   : > { %v12619_v37 = vpop.f32.mrb[46].mxu1  ;;  %6157 = vmatmul.mubr.f32.gmra.mrb[78].mxu0 %v5281_v27  ;;  %v5561_v27 = vld [vmem:[%s13968_s5 + $0xab8] sm:$0xff] }
 0x603   : > { %v6285_v22 = vpop.f32.mrb[47].mxu1  ;;  %6547 = vmatmul.mubr.f32.gmra.mrb[152].mxu1 %v5515_v33  ;;  %v5540_v33 = vld [vmem:[%s13968_s5 + $0xa10] sm:$0xff]  ;;  %6161 = vmatprep.mubr.f32.mxu0 %v5285_v46 }
 0x604   : > { %6551 = vmatprep.mubr.f32.mxu1 %v5519_v54  ;;  %v5560_v46 = vld [vmem:[%s13968_s5 + $0xab0] sm:$0xff] }
 0x606   : > { %v12633_v26 = vpop.f32.mrb[48].mxu1  ;;  %6162 = vmatmul.mubr.f32.gmra.mrb[80].mxu0 %v5284_v48 }
 0x607   : > { %v6290_v42 = vpop.f32.mrb[49].mxu1  ;;  %6552 = vmatmul.mubr.f32.gmra.mrb[154].mxu1 %v5518_v58  ;;  %v5539_v58 = vld [vmem:[%s13968_s5 + $0xa08] sm:$0xff] }
 0x608   : > { %6556 = vmatprep.mubr.f32.mxu1 %v5522_v41  ;;  %v5543_v41 = vld [vmem:[%s13968_s5 + $0xa28] sm:$0xff]  ;;  %v5288_v42 = vld [vmem:[%s13968_s5 + $0x230] sm:$0xff] }
 0x609   : > { %6166 = vmatprep.mubr.f32.mxu0 %v5288_v42  ;;  %v5567_v42 = vld [vmem:[%s13968_s5 + $0xae8] sm:$0xff] }
 0x60a   : > { %v12647_v40 = vpop.f32.mrb[50].mxu1 }
 0x60b   : > { %v6295_v61 = vpop.f32.mrb[51].mxu1  ;;  %6557 = vmatmul.mubr.f32.gmra.mrb[156].mxu1 %v5521_v8  ;;  %v5287_v8 = vld [vmem:[%s13968_s5 + $0x228] sm:$0xff] }
 0x60c   : > { %6561 = vmatprep.mubr.f32.mxu1 %v5525_v7  ;;  %v5542_v7 = vld [vmem:[%s13968_s5 + $0xa20] sm:$0xff]  ;;  %6167 = vmatmul.mubr.f32.gmra.mrb[82].mxu0 %v5287_v8 }
 0x60d   : > { %6171 = vmatprep.mubr.f32.mxu0 %v5291_v39 }
 0x60e   : > { %v12661_v49 = vpop.f32.mrb[52].mxu1 }
 0x60f   : > { %v6300_v52 = vpop.f32.mrb[53].mxu1  ;;  %6562 = vmatmul.mubr.f32.gmra.mrb[158].mxu1 %v5524_v20 }
 0x610   : > { %6566 = vmatprep.mubr.f32.mxu1 %v5528_v30  ;;  %v5290_v30 = vld [vmem:[%s13968_s5 + $0x240] sm:$0xff]  ;;  %v5549_v52 = vld [vmem:[%s13968_s5 + $0xa58] sm:$0xff] }
 0x611   : > { %6172 = vmatmul.mubr.f32.gmra.mrb[84].mxu0 %v5290_v30  ;;  %v5569_v30 = vld [vmem:[%s13968_s5 + $0xaf8] sm:$0xff] }
 0x612   : > { %v12675_v2 = vpop.f32.mrb[54].mxu1 }
 0x613   : > { %v6305_v36 = vpop.f32.mrb[55].mxu1  ;;  %6567 = vmatmul.mubr.f32.gmra.mrb[160].mxu1 %v5527_v38 }
 0x614   : > { %6571 = vmatprep.mubr.f32.mxu1 %v5531_v55  ;;  %v5548_v55 = vld [vmem:[%s13968_s5 + $0xa50] sm:$0xff] }
 0x616   : > { %v12689_v28 = vpop.f32.mrb[56].mxu1 }
 0x617   : > { %v6310_v43 = vpop.f32.mrb[57].mxu1  ;;  %6572 = vmatmul.mubr.f32.gmra.mrb[162].mxu1 %v5530_v56  ;;  %v5551_v56 = vld [vmem:[%s13968_s5 + $0xa68] sm:$0xff] }
 0x618   : > { %6576 = vmatprep.mubr.f32.mxu1 %v5534_v60  ;;  %v5555_v60 = vld [vmem:[%s13968_s5 + $0xa88] sm:$0xff] }
 0x61a   : > { %v12703_v59 = vpop.f32.mrb[58].mxu1 }
 0x61b   : > { %v6315_v51 = vpop.f32.mrb[59].mxu1  ;;  %6577 = vmatmul.mubr.f32.gmra.mrb[164].mxu1 %v5533_v57  ;;  %v5558_v57 = vld [vmem:[%s13968_s5 + $0xaa0] sm:$0xff] }
 0x61c   : > { %6581 = vmatprep.mubr.f32.mxu1 %v5537_v14  ;;  %v5557_v51 = vld [vmem:[%s13968_s5 + $0xa98] sm:$0xff] }
 0x61e   : > { %v12717_v54 = vpop.f32.mrb[60].mxu1 }
 0x61f   : > { %v6320_v22 = vpop.f32.mrb[61].mxu1  ;;  %6582 = vmatmul.mubr.f32.gmra.mrb[166].mxu1 %v5536_v21 }
 0x620   : > { %6586 = vmatprep.mubr.f32.mxu1 %v5540_v33  ;;  %v5564_v22 = vld [vmem:[%s13968_s5 + $0xad0] sm:$0xff] }
 0x622   : > { %v12731_v34 = vpop.f32.mrb[62].mxu1 }
 0x623   : > { %14119 = vst [vmem:[#allocation2_spill] sm:$0xff] %v12731_v34  ;;  %v6325_v47 = vpop.f32.mrb[63].mxu1  ;;  %6587 = vmatmul.mubr.f32.gmra.mrb[168].mxu1 %v5539_v58 }
 0x624   : > { %6591 = vmatprep.mubr.f32.mxu1 %v5543_v41  ;;  %v5563_v41 = vld [vmem:[%s13968_s5 + $0xac8] sm:$0xff] }
 0x626   : > { %v12745_v61 = vpop.f32.mrb[64].mxu1 }
 0x627   : > { %v6330_v20 = vpop.f32.mrb[65].mxu1  ;;  %6592 = vmatmul.mubr.f32.gmra.mrb[170].mxu1 %v5542_v7  ;;  %v5566_v7 = vld [vmem:[%s13968_s5 + $0xae0] sm:$0xff] }
 0x628   : > { %6596 = vmatprep.mubr.f32.mxu1 %v5546_v23  ;;  %v5570_v23 = vld [vmem:[%s13968_s5 + $0xb00] sm:$0xff] }
 0x62a   : > { %v12759_v19 = vpop.f32.mrb[66].mxu1 }
 0x62b   : > { %14120 = vst [vmem:[#allocation3_spill] sm:$0xff] %v12759_v19  ;;  %v6335_v38 = vpop.f32.mrb[67].mxu1  ;;  %6597 = vmatmul.mubr.f32.gmra.mrb[172].mxu1 %v5545_v6  ;;  %v5573_v6 = vld [vmem:[%s13968_s5 + $0xb18] sm:$0xff] }
 0x62c   : > { %6601 = vmatprep.mubr.f32.mxu1 %v5549_v52 }
 0x62e   : > { %v12767_v36 = vpop.f32.mrb[68].mxu1 }
 0x62f   : > { %14121 = vst [vmem:[#allocation5_spill] sm:$0xff] %v12767_v36  ;;  %v6340_v32 = vpop.f32.mrb[69].mxu1  ;;  %6602 = vmatmul.mubr.f32.gmra.mrb[174].mxu1 %v5548_v55  ;;  %v5572_v55 = vld [vmem:[%s13968_s5 + $0xb10] sm:$0xff] }
 0x630   : > { %6606 = vmatprep.mubr.f32.mxu1 %v5552_v4  ;;  %v5576_v4 = vld [vmem:[%s13968_s5 + $0xb30] sm:$0xff] }
 0x632   : > { %v12775_v11 = vpop.f32.mrb[70].mxu1 }
 0x633   : > { %14122 = vst [vmem:[#allocation4_spill] sm:$0xff] %v12775_v11  ;;  %v6345_v43 = vpop.f32.mrb[71].mxu1  ;;  %6607 = vmatmul.mubr.f32.gmra.mrb[176].mxu1 %v5551_v56 }
 0x634   : > { %6611 = vmatprep.mubr.f32.mxu1 %v5555_v60  ;;  %v5575_v60 = vld [vmem:[%s13968_s5 + $0xb28] sm:$0xff] }
 0x635   : > { %v5579_v43 = vld [vmem:[%s13968_s5 + $0xb48] sm:$0xff] }
 0x636   : > { %v12783_v14 = vpop.f32.mrb[72].mxu1 }
 0x637   : > { %14123 = vst [vmem:[#allocation6_spill] sm:$0xff] %v12783_v14  ;;  %v6350_v16 = vpop.f32.mrb[73].mxu1  ;;  %6612 = vmatmul.mubr.f32.gmra.mrb[178].mxu1 %v5554_v63 }
 0x638   : > { %6616 = vmatprep.mubr.f32.mxu1 %v5558_v57  ;;  %v5578_v16 = vld [vmem:[%s13968_s5 + $0xb40] sm:$0xff] }
 0x63a   : > { %v12791_v21 = vpop.f32.mrb[74].mxu1 }
 0x63b   : > { %14124 = vst [vmem:[#allocation7_spill] sm:$0xff] %v12791_v21  ;;  %v6355_v33 = vpop.f32.mrb[75].mxu1  ;;  %6617 = vmatmul.mubr.f32.gmra.mrb[180].mxu1 %v5557_v51  ;;  %v5582_v51 = vld [vmem:[%s13968_s5 + $0xb60] sm:$0xff] }
 0x63c   : > { %6621 = vmatprep.mubr.f32.mxu1 %v5561_v27 }
 0x63e   : > { %v12799_v48 = vpop.f32.mrb[76].mxu1 }
 0x63f   : > { %14125 = vst [vmem:[#allocation8_spill] sm:$0xff] %v12799_v48  ;;  %v6360_v58 = vpop.f32.mrb[77].mxu1  ;;  %6622 = vmatmul.mubr.f32.gmra.mrb[182].mxu1 %v5560_v46  ;;  %v5581_v46 = vld [vmem:[%s13968_s5 + $0xb58] sm:$0xff] }
 0x640   : > { %6626 = vmatprep.mubr.f32.mxu1 %v5564_v22  ;;  %v5585_v22 = vld [vmem:[%s13968_s5 + $0xb78] sm:$0xff] }
 0x642   : > { %v12807_v47 = vpop.f32.mrb[78].mxu1 }
 0x643   : > { %14126 = vst [vmem:[#allocation9_spill] sm:$0xff] %v12807_v47  ;;  %v6365_v8 = vpop.f32.mrb[79].mxu1  ;;  %6627 = vmatmul.mubr.f32.gmra.mrb[184].mxu1 %v5563_v41 }
 0x644   : > { %6631 = vmatprep.mubr.f32.mxu1 %v5567_v42  ;;  %v5584_v42 = vld [vmem:[%s13968_s5 + $0xb70] sm:$0xff] }
 0x645   : > { %v5588_v8 = vld [vmem:[%s13968_s5 + $0xb90] sm:$0xff] }
 0x646   : > { %v12815_v39 = vpop.f32.mrb[80].mxu1 }
 0x647   : > { %14127 = vst [vmem:[#allocation10_spill] sm:$0xff] %v12815_v39  ;;  %v6370_v20 = vpop.f32.mrb[81].mxu1  ;;  %6632 = vmatmul.mubr.f32.gmra.mrb[186].mxu1 %v5566_v7 }
 0x648   : > { %6636 = vmatprep.mubr.f32.mxu1 %v5570_v23  ;;  %v5587_v20 = vld [vmem:[%s13968_s5 + $0xb88] sm:$0xff] }
 0x64a   : > { %v12823_v52 = vpop.f32.mrb[82].mxu1 }
 0x64b   : > { %14128 = vst [vmem:[#allocation11_spill] sm:$0xff] %v12823_v52  ;;  %v6375_v38 = vpop.f32.mrb[83].mxu1  ;;  %6637 = vmatmul.mubr.f32.gmra.mrb[188].mxu1 %v5569_v30  ;;  %v5591_v30 = vld [vmem:[%s13968_s5 + $0xba8] sm:$0xff] }
 0x64c   : > { %6641 = vmatprep.mubr.f32.mxu1 %v5573_v6 }
 0x64e   : > { %v12831_v32 = vpop.f32.mrb[84].mxu1 }
 0x64f   : > { %14129 = vst [vmem:[#allocation12_spill] sm:$0xff] %v12831_v32  ;;  %v6380_v56 = vpop.f32.mrb[85].mxu1  ;;  %6642 = vmatmul.mubr.f32.gmra.mrb[190].mxu1 %v5572_v55  ;;  %v5590_v55 = vld [vmem:[%s13968_s5 + $0xba0] sm:$0xff] }
 0x650   : > { %6646 = vmatprep.mubr.f32.mxu1 %v5576_v4  ;;  %v5594_v4 = vld [vmem:[%s13968_s5 + $0xbc0] sm:$0xff] }
 0x652   : > { %v12839_v63 = vpop.f32.mrb[86].mxu1 }
 0x653   : > { %14130 = vst [vmem:[#allocation13_spill] sm:$0xff] %v12839_v63  ;;  %v6385_v57 = vpop.f32.mrb[87].mxu1  ;;  %6647 = vmatmul.mubr.f32.gmra.mrb[192].mxu1 %v5575_v60 }
 0x654   : > { %6651 = vmatprep.mubr.f32.mxu1 %v5579_v43  ;;  %v5593_v43 = vld [vmem:[%s13968_s5 + $0xbb8] sm:$0xff] }
 0x655   : > { %v5597_v57 = vld [vmem:[%s13968_s5 + $0xbd8] sm:$0xff] }
 0x656   : > { %v12847_v27 = vpop.f32.mrb[88].mxu1 }
 0x657   : > { %14131 = vst [vmem:[#allocation14_spill] sm:$0xff] %v12847_v27  ;;  %v6390_v33 = vpop.f32.mrb[89].mxu1  ;;  %6652 = vmatmul.mubr.f32.gmra.mrb[194].mxu1 %v5578_v16 }
 0x658   : > { %6656 = vmatprep.mubr.f32.mxu1 %v5582_v51  ;;  %v5596_v33 = vld [vmem:[%s13968_s5 + $0xbd0] sm:$0xff] }
 0x65a   : > { %v12855_v58 = vpop.f32.mrb[90].mxu1 }
 0x65b   : > { %14132 = vst [vmem:[#allocation15_spill] sm:$0xff] %v12855_v58  ;;  %v6395_v41 = vpop.f32.mrb[91].mxu1  ;;  %6657 = vmatmul.mubr.f32.gmra.mrb[196].mxu1 %v5581_v46  ;;  %v5600_v46 = vld [vmem:[%s13968_s5 + $0xbf0] sm:$0xff] }
 0x65c   : > { %6661 = vmatprep.mubr.f32.mxu1 %v5585_v22 }
 0x65e   : > { %v12863_v7 = vpop.f32.mrb[92].mxu1 }
 0x65f   : > { %14133 = vst [vmem:[#allocation16_spill] sm:$0xff] %v12863_v7  ;;  %v6400_v23 = vpop.f32.mrb[93].mxu1  ;;  %6662 = vmatmul.mubr.f32.gmra.mrb[198].mxu1 %v5584_v42  ;;  %v5599_v42 = vld [vmem:[%s13968_s5 + $0xbe8] sm:$0xff] }
 0x660   : > { %6666 = vmatprep.mubr.f32.mxu1 %v5588_v8  ;;  %v5220_v8 = vld [vmem:[%s13968_s5 + $0x10] sm:$0xff] }
 0x662   : > { %v12871_v6 = vpop.f32.mrb[94].mxu1 }
 0x663   : > { %14134 = vst [vmem:[#allocation17_spill] sm:$0xff] %v12871_v6  ;;  %v6405_v38 = vpop.f32.mrb[95].mxu1  ;;  %6667 = vmatmul.mubr.f32.gmra.mrb[200].mxu1 %v5587_v20 }
 0x664   : > { %6671 = vmatprep.mubr.f32.mxu1 %v5591_v30  ;;  %v5223_v30 = vld [vmem:[%s13968_s5 + $0x28] sm:$0xff]  ;;  %v5226_v38 = vld [vmem:[%s13968_s5 + $0x40] sm:$0xff] }
 0x666   : > { %v12879_v56 = vpop.f32.mrb[96].mxu1 }
 0x667   : > { %14135 = vst [vmem:[#allocation18_spill] sm:$0xff] %v12879_v56  ;;  %v6410_v60 = vpop.f32.mrb[97].mxu1  ;;  %6672 = vmatmul.mubr.f32.gmra.mrb[202].mxu1 %v5590_v55 }
 0x668   : > { %6676 = vmatprep.mubr.f32.mxu1 %v5594_v4  ;;  %v5229_v60 = vld [vmem:[%s13968_s5 + $0x58] sm:$0xff] }
 0x66a   : > { %v12887_v16 = vpop.f32.mrb[98].mxu1 }
 0x66b   : > { %14136 = vst [vmem:[#allocation19_spill] sm:$0xff] %v12887_v16  ;;  %v6415_v51 = vpop.f32.mrb[99].mxu1  ;;  %6677 = vmatmul.mubr.f32.gmra.mrb[204].mxu1 %v5593_v43  ;;  %v5232_v43 = vld [vmem:[%s13968_s5 + $0x70] sm:$0xff] }
 0x66c   : > { %6681 = vmatprep.mubr.f32.mxu1 %v5597_v57 }
 0x66e   : > { %v12895_v22 = vpop.f32.mrb[100].mxu1 }
 0x66f   : > { %14137 = vst [vmem:[#allocation20_spill] sm:$0xff] %v12895_v22  ;;  %v6420_v41 = vpop.f32.mrb[101].mxu1  ;;  %6682 = vmatmul.mubr.f32.gmra.mrb[206].mxu1 %v5596_v33  ;;  %v5235_v33 = vld [vmem:[%s13968_s5 + $0x88] sm:$0xff] }
 0x670   : > { %6686 = vmatprep.mubr.f32.mxu1 %v5600_v46  ;;  %v5238_v46 = vld [vmem:[%s13968_s5 + $0xa0] sm:$0xff] }
 0x672   : > { %v12903_v23 = vpop.f32.mrb[102].mxu1 }
 0x673   : > { %14138 = vst [vmem:[#allocation21_spill] sm:$0xff] %v12903_v23  ;;  %v6425_v20 = vpop.f32.mrb[103].mxu1  ;;  %6687 = vmatmul.mubr.f32.gmra.mrb[208].mxu1 %v5599_v42 }
 0x674   : > { %8872 = vmatprep.mubr.msk.f32.mxu1 %vm5602_vm6, %v5220_v8  ;;  %v5241_v8 = vld [vmem:[%s13968_s5 + $0xb8] sm:$0xff]  ;;  %v5244_v20 = vld [vmem:[%s13968_s5 + $0xd0] sm:$0xff] }
 0x676   : > { %v12912_v55 = vpop.f32.mrb[104].mxu1 }
 0x677   : > { %14139 = vst [vmem:[#allocation22_spill] sm:$0xff] %v12912_v55  ;;  %v6430_v4 = vpop.f32.mrb[105].mxu1  ;;  %8873 = vmatmul.mubr.msk.f32.vlgmr.msra.gmra.mrb[210].mxu1 %vm5602_vm6, %v5223_v30 }
 0x678   : > { %8875 = vmatprep.mubr.msk.f32.mxu1 %vm5602_vm6, %v5226_v38  ;;  %v5247_v4 = vld [vmem:[%s13968_s5 + $0xe8] sm:$0xff] }
 0x67a   : > { %v12922_v57 = vpop.f32.mrb[106].mxu1 }
 0x67b   : > { %14140 = vst [vmem:[#allocation23_spill] sm:$0xff] %v12922_v57  ;;  %v6435_v51 = vpop.f32.mrb[107].mxu1  ;;  %8876 = vmatmul.mubr.msk.f32.gmra.mrb[212].mxu1 %vm5602_vm6, %v5229_v60  ;;  %v5250_v60 = vld [vmem:[%s13968_s5 + $0x100] sm:$0xff] }
 0x67c   : > { %8878 = vmatprep.mubr.msk.f32.mxu1 %vm5602_vm6, %v5232_v43 }
 0x67e   : > { %v12932_v41 = vpop.f32.mrb[108].mxu1 }
 0x67f   : > { %14141 = vst [vmem:[#allocation24_spill] sm:$0xff] %v12932_v41  ;;  %v6440_v42 = vpop.f32.mrb[109].mxu1  ;;  %8879 = vmatmul.mubr.msk.f32.gmra.mrb[214].mxu1 %vm5602_vm6, %v5235_v33  ;;  %v5253_v33 = vld [vmem:[%s13968_s5 + $0x118] sm:$0xff] }
 0x680   : > { %8881 = vmatprep.mubr.msk.f32.mxu1 %vm5602_vm6, %v5238_v46  ;;  %v5256_v46 = vld [vmem:[%s13968_s5 + $0x130] sm:$0xff] }
 0x682   : > { %v12942_v30 = vpop.f32.mrb[110].mxu1 }
 0x683   : > { %14142 = vst [vmem:[#allocation25_spill] sm:$0xff] %v12942_v30  ;;  %v6445_v38 = vpop.f32.mrb[111].mxu1  ;;  %8882 = vmatmul.mubr.msk.f32.gmra.mrb[216].mxu1 %vm5602_vm6, %v5241_v8 }
 0x684   : > { %8884 = vmatprep.mubr.msk.f32.mxu1 %vm5602_vm6, %v5244_v20  ;;  %v5259_v20 = vld [vmem:[%s13968_s5 + $0x148] sm:$0xff]  ;;  %v5262_v38 = vld [vmem:[%s13968_s5 + $0x160] sm:$0xff] }
 0x686   : > { %v12952_v43 = vpop.f32.mrb[112].mxu1 }
 0x687   : > { %14143 = vst [vmem:[#allocation26_spill] sm:$0xff] %v12952_v43  ;;  %v6450_v51 = vpop.f32.mrb[113].mxu1  ;;  %8885 = vmatmul.mubr.msk.f32.gmra.mrb[218].mxu1 %vm5602_vm6, %v5247_v4 }
 0x688   : > { %8887 = vmatprep.mubr.msk.f32.mxu1 %vm5602_vm6, %v5250_v60  ;;  %v5265_v51 = vld [vmem:[%s13968_s5 + $0x178] sm:$0xff] }
 0x68a   : > { %v12962_v42 = vpop.f32.mrb[114].mxu1 }
 0x68b   : > { %14144 = vst [vmem:[#allocation27_spill] sm:$0xff] %v12962_v42  ;;  %v6455_v8 = vpop.f32.mrb[115].mxu1  ;;  %8888 = vmatmul.mubr.msk.f32.gmra.mrb[220].mxu1 %vm5602_vm6, %v5253_v33  ;;  %v5268_v33 = vld [vmem:[%s13968_s5 + $0x190] sm:$0xff] }
 0x68c   : > { %8890 = vmatprep.mubr.msk.f32.mxu1 %vm5602_vm6, %v5256_v46 }
 0x68e   : > { %v12972_v4 = vpop.f32.mrb[116].mxu1 }
 0x68f   : > { %14145 = vst [vmem:[#allocation28_spill] sm:$0xff] %v12972_v4  ;;  %v6460_v60 = vpop.f32.mrb[117].mxu1  ;;  %8891 = vmatmul.mubr.msk.f32.gmra.mrb[222].mxu1 %vm5602_vm6, %v5259_v20  ;;  %v5271_v20 = vld [vmem:[%s13968_s5 + $0x1a8] sm:$0xff]  ;;  %v13115_v4 = vpop.f32.mrb[36].mxu0 }
 0x690   : > { %8893 = vmatprep.mubr.msk.f32.mxu1 %vm5602_vm6, %v5262_v38  ;;  %v5274_v38 = vld [vmem:[%s13968_s5 + $0x1c0] sm:$0xff] }
 0x692   : > { %v12982_v46 = vpop.f32.mrb[118].mxu1 }
 0x693   : > { %14146 = vst [vmem:[#allocation29_spill] sm:$0xff] %v12982_v46  ;;  %v6465_v8 = vpop.f32.mrb[119].mxu1  ;;  %8894 = vmatmul.mubr.msk.f32.gmra.mrb[224].mxu1 %vm5602_vm6, %v5265_v51  ;;  %v5277_v51 = vld [vmem:[%s13968_s5 + $0x1d8] sm:$0xff] }
 0x694   : > { %8896 = vmatprep.mubr.msk.f32.mxu1 %vm5602_vm6, %v5268_v33  ;;  %v5280_v33 = vld [vmem:[%s13968_s5 + $0x1f0] sm:$0xff] }
 0x696   : > { %v12992_v60 = vpop.f32.mrb[120].mxu1 }
 0x697   : > { %14147 = vst [vmem:[#allocation30_spill] sm:$0xff] %v12992_v60  ;;  %v6470_v42 = vpop.f32.mrb[121].mxu1  ;;  %8897 = vmatmul.mubr.msk.f32.gmra.mrb[226].mxu1 %vm5602_vm6, %v5271_v20  ;;  %v5286_v20 = vld [vmem:[%s13968_s5 + $0x220] sm:$0xff] }
 0x698   : > { %8899 = vmatprep.mubr.msk.f32.mxu1 %vm5602_vm6, %v5274_v38  ;;  %v5283_v42 = vld [vmem:[%s13968_s5 + $0x208] sm:$0xff] }
 0x69a   : > { %v13002_v8 = vpop.f32.mrb[122].mxu1 }
 0x69b   : > { %14148 = vst [vmem:[#allocation31_spill] sm:$0xff] %v13002_v8  ;;  %v6475_v46 = vpop.f32.mrb[123].mxu1  ;;  %8900 = vmatmul.mubr.msk.f32.gmra.mrb[228].mxu1 %vm5602_vm6, %v5277_v51  ;;  %v5292_v51 = vld [vmem:[%s13968_s5 + $0x250] sm:$0xff] }
 0x69c   : > { %8902 = vmatprep.mubr.msk.f32.mxu1 %vm5602_vm6, %v5280_v33  ;;  %v5289_v46 = vld [vmem:[%s13968_s5 + $0x238] sm:$0xff] }
 0x69e   : > { %v13012_v38 = vpop.f32.mrb[124].mxu1 }
 0x69f   : > { %14149 = vst [vmem:[#allocation32_spill] sm:$0xff] %v13012_v38  ;;  %v6480_v60 = vpop.f32.mrb[125].mxu1  ;;  %8903 = vmatmul.mubr.msk.f32.gmra.mrb[230].mxu1 %vm5602_vm6, %v5283_v42  ;;  %v5298_v42 = vld [vmem:[%s13968_s5 + $0x280] sm:$0xff] }
 0x6a0   : > { %8905 = vmatprep.mubr.msk.f32.mxu1 %vm5602_vm6, %v5286_v20  ;;  %v5295_v60 = vld [vmem:[%s13968_s5 + $0x268] sm:$0xff] }
 0x6a2   : > { %v13022_v33 = vpop.f32.mrb[126].mxu1 }
 0x6a3   : > { %14150 = vst [vmem:[#allocation33_spill] sm:$0xff] %v13022_v33  ;;  %v6485_v8 = vpop.f32.mrb[127].mxu1  ;;  %8906 = vmatmul.mubr.msk.f32.gmra.mrb[232].mxu1 %vm5602_vm6, %v5289_v46  ;;  %v5304_v46 = vld [vmem:[%s13968_s5 + $0x2b0] sm:$0xff] }
 0x6a4   : > { %8908 = vmatprep.mubr.msk.f32.mxu1 %vm5602_vm6, %v5292_v51  ;;  %v5301_v8 = vld [vmem:[%s13968_s5 + $0x298] sm:$0xff] }
 0x6a6   : > { %v13032_v20 = vpop.f32.mrb[128].mxu1 }
 0x6a7   : > { %14151 = vst [vmem:[#allocation34_spill] sm:$0xff] %v13032_v20  ;;  %v6490_v38 = vpop.f32.mrb[129].mxu1  ;;  %8909 = vmatmul.mubr.msk.f32.gmra.mrb[234].mxu1 %vm5602_vm6, %v5295_v60  ;;  %v5310_v60 = vld [vmem:[%s13968_s5 + $0x2e0] sm:$0xff] }
 0x6a8   : > { %8911 = vmatprep.mubr.msk.f32.mxu1 %vm5602_vm6, %v5298_v42  ;;  %v5307_v38 = vld [vmem:[%s13968_s5 + $0x2c8] sm:$0xff] }
 0x6aa   : > { %v13042_v51 = vpop.f32.mrb[130].mxu1 }
 0x6ab   : > { %14152 = vst [vmem:[#allocation35_spill] sm:$0xff] %v13042_v51  ;;  %v6495_v33 = vpop.f32.mrb[131].mxu1  ;;  %8912 = vmatmul.mubr.msk.f32.gmra.mrb[236].mxu1 %vm5602_vm6, %v5301_v8  ;;  %v5316_v8 = vld [vmem:[%s13968_s5 + $0x310] sm:$0xff] }
 0x6ac   : > { %8914 = vmatprep.mubr.msk.f32.mxu1 %vm5602_vm6, %v5304_v46  ;;  %v5313_v33 = vld [vmem:[%s13968_s5 + $0x2f8] sm:$0xff] }
 0x6ae   : > { %v13052_v42 = vpop.f32.mrb[132].mxu1 }
 0x6af   : > { %14153 = vst [vmem:[#allocation36_spill] sm:$0xff] %v13052_v42  ;;  %v6500_v20 = vpop.f32.mrb[133].mxu1  ;;  %8915 = vmatmul.mubr.msk.f32.gmra.mrb[238].mxu1 %vm5602_vm6, %v5307_v38  ;;  %v5322_v38 = vld [vmem:[%s13968_s5 + $0x340] sm:$0xff] }
 0x6b0   : > { %8917 = vmatprep.mubr.msk.f32.mxu1 %vm5602_vm6, %v5310_v60  ;;  %v5319_v20 = vld [vmem:[%s13968_s5 + $0x328] sm:$0xff] }
 0x6b2   : > { %v13062_v46 = vpop.f32.mrb[134].mxu1 }
 0x6b3   : > { %14154 = vst [vmem:[#allocation37_spill] sm:$0xff] %v13062_v46  ;;  %v6505_v51 = vpop.f32.mrb[135].mxu1  ;;  %8918 = vmatmul.mubr.msk.f32.gmra.mrb[240].mxu1 %vm5602_vm6, %v5313_v33  ;;  %v5328_v33 = vld [vmem:[%s13968_s5 + $0x370] sm:$0xff] }
 0x6b4   : > { %8920 = vmatprep.mubr.msk.f32.mxu1 %vm5602_vm6, %v5316_v8  ;;  %v5325_v51 = vld [vmem:[%s13968_s5 + $0x358] sm:$0xff] }
 0x6b6   : > { %v13072_v60 = vpop.f32.mrb[136].mxu1 }
 0x6b7   : > { %14155 = vst [vmem:[#allocation38_spill] sm:$0xff] %v13072_v60  ;;  %v6510_v42 = vpop.f32.mrb[137].mxu1  ;;  %8921 = vmatmul.mubr.msk.f32.gmra.mrb[242].mxu1 %vm5602_vm6, %v5319_v20  ;;  %v5334_v20 = vld [vmem:[%s13968_s5 + $0x3a0] sm:$0xff] }
 0x6b8   : > { %8923 = vmatprep.mubr.msk.f32.mxu1 %vm5602_vm6, %v5322_v38  ;;  %v5331_v42 = vld [vmem:[%s13968_s5 + $0x388] sm:$0xff] }
 0x6ba   : > { %v13082_v8 = vpop.f32.mrb[138].mxu1 }
 0x6bb   : > { %14156 = vst [vmem:[#allocation39_spill] sm:$0xff] %v13082_v8  ;;  %v6515_v46 = vpop.f32.mrb[139].mxu1  ;;  %8924 = vmatmul.mubr.msk.f32.gmra.mrb[244].mxu1 %vm5602_vm6, %v5325_v51  ;;  %v5340_v51 = vld [vmem:[%s13968_s5 + $0x3d0] sm:$0xff] }
 0x6bc   : > { %8926 = vmatprep.mubr.msk.f32.mxu1 %vm5602_vm6, %v5328_v33  ;;  %v5337_v46 = vld [vmem:[%s13968_s5 + $0x3b8] sm:$0xff] }
 0x6be   : > { %v13092_v38 = vpop.f32.mrb[140].mxu1 }
 0x6bf   : > { %14157 = vst [vmem:[#allocation40_spill] sm:$0xff] %v13092_v38  ;;  %v6520_v60 = vpop.f32.mrb[141].mxu1  ;;  %8927 = vmatmul.mubr.msk.f32.gmra.mrb[246].mxu1 %vm5602_vm6, %v5331_v42  ;;  %v5346_v42 = vld [vmem:[%s13968_s5 + $0x400] sm:$0xff] }
 0x6c0   : > { %8929 = vmatprep.mubr.msk.f32.mxu1 %vm5602_vm6, %v5334_v20  ;;  %v5343_v60 = vld [vmem:[%s13968_s5 + $0x3e8] sm:$0xff] }
 0x6c2   : > { %v13102_v33 = vpop.f32.mrb[142].mxu1 }
 0x6c3   : > { %14158 = vst [vmem:[#allocation41_spill] sm:$0xff] %v13102_v33  ;;  %v6525_v8 = vpop.f32.mrb[143].mxu1  ;;  %8930 = vmatmul.mubr.msk.f32.gmra.mrb[248].mxu1 %vm5602_vm6, %v5337_v46  ;;  %v6055_v46 = vpop.f32.mrb[37].mxu0 }
 0x6c4   : > { %8932 = vmatprep.mubr.msk.f32.mxu1 %vm5602_vm6, %v5340_v51  ;;  %v5349_v8 = vld [vmem:[%s13968_s5 + $0x418] sm:$0xff]  ;;  %v5352_v51 = vld [vmem:[%s13968_s5 + $0x430] sm:$0xff]  ;;  %v13126_v30 = vpop.f32.mrb[38].mxu0  ;;  %v5358_v46 = vld [vmem:[%s13968_s5 + $0x460] sm:$0xff] }
 0x6c6   : > { %v13112_v20 = vpop.f32.mrb[144].mxu1 }
 0x6c7   : > { %14159 = vst [vmem:[#allocation42_spill] sm:$0xff] %v13112_v20  ;;  %v6530_v38 = vpop.f32.mrb[145].mxu1  ;;  %8933 = vmatmul.mubr.msk.f32.gmra.mrb[250].mxu1 %vm5602_vm6, %v5343_v60  ;;  %v6060_v60 = vpop.f32.mrb[39].mxu0 }
 0x6c8   : > { %8935 = vmatprep.mubr.msk.f32.mxu1 %vm5602_vm6, %v5346_v42  ;;  %v5355_v42 = vld [vmem:[%s13968_s5 + $0x448] sm:$0xff]  ;;  %v13138_v43 = vpop.f32.mrb[40].mxu0  ;;  %v5364_v60 = vld [vmem:[%s13968_s5 + $0x490] sm:$0xff] }
 0x6ca   : > { %v13124_v33 = vpop.f32.mrb[146].mxu1 }
 0x6cb   : > { %14160 = vst [vmem:[#allocation43_spill] sm:$0xff] %v13124_v33  ;;  %v6535_v38 = vpop.f32.mrb[147].mxu1  ;;  %8936 = vmatmul.mubr.msk.f32.gmra.mrb[252].mxu1 %vm5602_vm6, %v5349_v8  ;;  %v5361_v8 = vld [vmem:[%s13968_s5 + $0x478] sm:$0xff] }
 0x6cc   : > { %8938 = vmatprep.mubr.msk.f32.mxu1 %vm5602_vm6, %v5352_v51  ;;  %v6065_v38 = vpop.f32.mrb[41].mxu0 }
 0x6cd   : > { %v13145_v51 = vpop.f32.mrb[42].mxu0 }
 0x6ce   : > { %v13136_v20 = vpop.f32.mrb[148].mxu1  ;;  %v6070_v57 = vpop.f32.mrb[43].mxu0 }
 0x6cf   : > { %14161 = vst [vmem:[#allocation44_spill] sm:$0xff] %v13136_v20  ;;  %v6540_v33 = vpop.f32.mrb[149].mxu1  ;;  %8939 = vmatmul.mubr.msk.f32.gmra.mrb[254].mxu1 %vm5602_vm6, %v5355_v42  ;;  %v13152_v41 = vpop.f32.mrb[44].mxu0  ;;  %v5370_v57 = vld [vmem:[%s13968_s5 + $0x4c0] sm:$0xff] }
 0x6d0   : > { %8941 = vmatprep.mubr.msk.f32.mxu1 %vm5602_vm6, %v5358_v46  ;;  %v6075_v42 = vpop.f32.mrb[45].mxu0  ;;  %v5367_v46 = vld [vmem:[%s13968_s5 + $0x4a8] sm:$0xff] }
 0x6d1   : > { %v13159_v38 = vpop.f32.mrb[46].mxu0 }
 0x6d2   : > { %v13150_v20 = vpop.f32.mrb[150].mxu1  ;;  %v6080_v23 = vpop.f32.mrb[47].mxu0 }
 0x6d3   : > { %14162 = vst [vmem:[#allocation45_spill] sm:$0xff] %v13150_v20  ;;  %v6545_v33 = vpop.f32.mrb[151].mxu1  ;;  %8942 = vmatmul.mubr.msk.f32.gmra.mrb[0].mxu1 %vm5602_vm6, %v5361_v8  ;;  %v13166_v55 = vpop.f32.mrb[48].mxu0  ;;  %v5376_v23 = vld [vmem:[%s13968_s5 + $0x4f0] sm:$0xff] }
 0x6d4   : > { %8944 = vmatprep.mubr.msk.f32.mxu1 %vm5602_vm6, %v5364_v60  ;;  %v6085_v8 = vpop.f32.mrb[49].mxu0  ;;  %v5373_v60 = vld [vmem:[%s13968_s5 + $0x4d8] sm:$0xff] }
 0x6d5   : > { %v13173_v42 = vpop.f32.mrb[50].mxu0 }
 0x6d6   : > { %v13164_v20 = vpop.f32.mrb[152].mxu1  ;;  %v6090_v16 = vpop.f32.mrb[51].mxu0 }
 0x6d7   : > { %14163 = vst [vmem:[#allocation46_spill] sm:$0xff] %v13164_v20  ;;  %v6550_v33 = vpop.f32.mrb[153].mxu1  ;;  %8945 = vmatmul.mubr.msk.f32.gmra.mrb[2].mxu1 %vm5602_vm6, %v5367_v46  ;;  %v13180_v22 = vpop.f32.mrb[52].mxu0  ;;  %v5382_v16 = vld [vmem:[%s13968_s5 + $0x520] sm:$0xff] }
 0x6d8   : > { %8947 = vmatprep.mubr.msk.f32.mxu1 %vm5602_vm6, %v5370_v57  ;;  %v6095_v46 = vpop.f32.mrb[53].mxu0  ;;  %v5379_v57 = vld [vmem:[%s13968_s5 + $0x508] sm:$0xff] }
 0x6d9   : > { %v13187_v8 = vpop.f32.mrb[54].mxu0 }
 0x6da   : > { %v13178_v20 = vpop.f32.mrb[154].mxu1  ;;  %v6100_v6 = vpop.f32.mrb[55].mxu0 }
 0x6db   : > { %14164 = vst [vmem:[#allocation47_spill] sm:$0xff] %v13178_v20  ;;  %v6555_v33 = vpop.f32.mrb[155].mxu1  ;;  %8948 = vmatmul.mubr.msk.f32.gmra.mrb[4].mxu1 %vm5602_vm6, %v5373_v60  ;;  %v13194_v56 = vpop.f32.mrb[56].mxu0  ;;  %v5388_v6 = vld [vmem:[%s13968_s5 + $0x550] sm:$0xff] }
 0x6dc   : > { %8950 = vmatprep.mubr.msk.f32.mxu1 %vm5602_vm6, %v5376_v23  ;;  %v6105_v60 = vpop.f32.mrb[57].mxu0  ;;  %v5385_v23 = vld [vmem:[%s13968_s5 + $0x538] sm:$0xff] }
 0x6dd   : > { %v13201_v46 = vpop.f32.mrb[58].mxu0 }
 0x6de   : > { %v13192_v20 = vpop.f32.mrb[156].mxu1  ;;  %v6110_v58 = vpop.f32.mrb[59].mxu0 }
 0x6df   : > { %14165 = vst [vmem:[#allocation48_spill] sm:$0xff] %v13192_v20  ;;  %v6560_v33 = vpop.f32.mrb[157].mxu1  ;;  %8951 = vmatmul.mubr.msk.f32.gmra.mrb[6].mxu1 %vm5602_vm6, %v5379_v57  ;;  %v13208_v7 = vpop.f32.mrb[60].mxu0  ;;  %v5394_v58 = vld [vmem:[%s13968_s5 + $0x580] sm:$0xff] }
 0x6e0   : > { %8953 = vmatprep.mubr.msk.f32.mxu1 %vm5602_vm6, %v5382_v16  ;;  %v6115_v57 = vpop.f32.mrb[61].mxu0  ;;  %v5391_v16 = vld [vmem:[%s13968_s5 + $0x568] sm:$0xff] }
 0x6e1   : > { %v13215_v60 = vpop.f32.mrb[62].mxu0 }
 0x6e2   : > { %v13206_v20 = vpop.f32.mrb[158].mxu1  ;;  %v6120_v63 = vpop.f32.mrb[63].mxu0 }
 0x6e3   : > { %14166 = vst [vmem:[#allocation49_spill] sm:$0xff] %v13206_v20  ;;  %v6565_v33 = vpop.f32.mrb[159].mxu1  ;;  %8954 = vmatmul.mubr.msk.f32.gmra.mrb[8].mxu1 %vm5602_vm6, %v5385_v23  ;;  %v13222_v27 = vpop.f32.mrb[64].mxu0  ;;  %v5400_v63 = vld [vmem:[%s13968_s5 + $0x5b0] sm:$0xff] }
 0x6e4   : > { %8956 = vmatprep.mubr.msk.f32.mxu1 %vm5602_vm6, %v5388_v6  ;;  %v6125_v23 = vpop.f32.mrb[65].mxu0  ;;  %v5397_v6 = vld [vmem:[%s13968_s5 + $0x598] sm:$0xff] }
 0x6e5   : > { %v13229_v57 = vpop.f32.mrb[66].mxu0 }
 0x6e6   : > { %v13220_v20 = vpop.f32.mrb[160].mxu1  ;;  %v6130_v52 = vpop.f32.mrb[67].mxu0 }
 0x6e7   : > { %14167 = vst [vmem:[#allocation50_spill] sm:$0xff] %v13220_v20  ;;  %v6570_v33 = vpop.f32.mrb[161].mxu1  ;;  %8957 = vmatmul.mubr.msk.f32.gmra.mrb[10].mxu1 %vm5602_vm6, %v5391_v16  ;;  %v13236_v32 = vpop.f32.mrb[68].mxu0  ;;  %v5406_v52 = vld [vmem:[%s13968_s5 + $0x5e0] sm:$0xff] }
 0x6e8   : > { %8959 = vmatprep.mubr.msk.f32.mxu1 %vm5602_vm6, %v5394_v58  ;;  %v6135_v16 = vpop.f32.mrb[69].mxu0  ;;  %v5403_v58 = vld [vmem:[%s13968_s5 + $0x5c8] sm:$0xff] }
 0x6e9   : > { %v13243_v23 = vpop.f32.mrb[70].mxu0 }
 0x6ea   : > { %v13234_v20 = vpop.f32.mrb[162].mxu1  ;;  %v6140_v47 = vpop.f32.mrb[71].mxu0 }
 0x6eb   : > { %14168 = vst [vmem:[#allocation51_spill] sm:$0xff] %v13234_v20  ;;  %v6575_v33 = vpop.f32.mrb[163].mxu1  ;;  %8960 = vmatmul.mubr.msk.f32.gmra.mrb[12].mxu1 %vm5602_vm6, %v5397_v6  ;;  %v13250_v39 = vpop.f32.mrb[72].mxu0  ;;  %v5412_v47 = vld [vmem:[%s13968_s5 + $0x610] sm:$0xff] }
 0x6ec   : > { %8962 = vmatprep.mubr.msk.f32.mxu1 %vm5602_vm6, %v5400_v63  ;;  %v6145_v6 = vpop.f32.mrb[73].mxu0  ;;  %v5409_v63 = vld [vmem:[%s13968_s5 + $0x5f8] sm:$0xff] }
 0x6ed   : > { %v13257_v16 = vpop.f32.mrb[74].mxu0 }
 0x6ee   : > { %v13248_v20 = vpop.f32.mrb[164].mxu1  ;;  %v6150_v21 = vpop.f32.mrb[75].mxu0 }
 0x6ef   : > { %14169 = vst [vmem:[#allocation52_spill] sm:$0xff] %v13248_v20  ;;  %v6580_v33 = vpop.f32.mrb[165].mxu1  ;;  %8963 = vmatmul.mubr.msk.f32.gmra.mrb[14].mxu1 %vm5602_vm6, %v5403_v58  ;;  %v13264_v48 = vpop.f32.mrb[76].mxu0  ;;  %v5418_v21 = vld [vmem:[%s13968_s5 + $0x640] sm:$0xff] }
 0x6f0   : > { %8965 = vmatprep.mubr.msk.f32.mxu1 %vm5602_vm6, %v5406_v52  ;;  %v6155_v58 = vpop.f32.mrb[77].mxu0  ;;  %v5415_v52 = vld [vmem:[%s13968_s5 + $0x628] sm:$0xff] }
 0x6f1   : > { %v13271_v6 = vpop.f32.mrb[78].mxu0 }
 0x6f2   : > { %v13262_v20 = vpop.f32.mrb[166].mxu1  ;;  %v6160_v11 = vpop.f32.mrb[79].mxu0 }
 0x6f3   : > { %14170 = vst [vmem:[#allocation53_spill] sm:$0xff] %v13262_v20  ;;  %v6585_v33 = vpop.f32.mrb[167].mxu1  ;;  %8966 = vmatmul.mubr.msk.f32.gmra.mrb[16].mxu1 %vm5602_vm6, %v5409_v63  ;;  %v13278_v14 = vpop.f32.mrb[80].mxu0  ;;  %v5424_v11 = vld [vmem:[%s13968_s5 + $0x670] sm:$0xff] }
 0x6f4   : > { %8968 = vmatprep.mubr.msk.f32.mxu1 %vm5602_vm6, %v5412_v47  ;;  %v6165_v63 = vpop.f32.mrb[81].mxu0  ;;  %v5421_v47 = vld [vmem:[%s13968_s5 + $0x658] sm:$0xff] }
 0x6f5   : > { %v13285_v58 = vpop.f32.mrb[82].mxu0 }
 0x6f6   : > { %v13276_v20 = vpop.f32.mrb[168].mxu1  ;;  %v6170_v19 = vpop.f32.mrb[83].mxu0 }
 0x6f7   : > { %14171 = vst [vmem:[#allocation54_spill] sm:$0xff] %v13276_v20  ;;  %v6590_v33 = vpop.f32.mrb[169].mxu1  ;;  %8969 = vmatmul.mubr.msk.f32.gmra.mrb[18].mxu1 %vm5602_vm6, %v5415_v52  ;;  %v5427_v52 = vld [vmem:[%s13968_s5 + $0x688] sm:$0xff] }
 0x6f8   : > { %8971 = vmatprep.mubr.msk.f32.mxu1 %vm5602_vm6, %v5418_v21  ;;  %v5430_v21 = vld [vmem:[%s13968_s5 + $0x6a0] sm:$0xff]  ;;  %v13300_v33 = vpop.f32.mrb[84].mxu0 }
 0x6f9   : > { %v6175_v19 = vpop.f32.mrb[85].mxu0 }
 0x6fa   : > { %v13290_v20 = vpop.f32.mrb[170].mxu1 }
 0x6fb   : > { %14172 = vst [vmem:[#allocation55_spill] sm:$0xff] %v13290_v20  ;;  %v6595_v36 = vpop.f32.mrb[171].mxu1  ;;  %8972 = vmatmul.mubr.msk.f32.gmra.mrb[20].mxu1 %vm5602_vm6, %v5421_v47  ;;  %v5436_v47 = vld [vmem:[%s13968_s5 + $0x6d0] sm:$0xff] }
 0x6fc   : > { %8974 = vmatprep.mubr.msk.f32.mxu1 %vm5602_vm6, %v5424_v11  ;;  %v5433_v36 = vld [vmem:[%s13968_s5 + $0x6b8] sm:$0xff] }
 0x6fe   : > { %v13302_v63 = vpop.f32.mrb[172].mxu1 }
 0x6ff   : > { %v6600_v34 = vpop.f32.mrb[173].mxu1  ;;  %8975 = vmatmul.mubr.msk.f32.gmra.mrb[22].mxu1 %vm5602_vm6, %v5427_v52  ;;  %v5442_v52 = vld [vmem:[%s13968_s5 + $0x700] sm:$0xff] }
 0x700   : > { %8977 = vmatprep.mubr.msk.f32.mxu1 %vm5602_vm6, %v5430_v21  ;;  %v5439_v34 = vld [vmem:[%s13968_s5 + $0x6e8] sm:$0xff] }
 0x702   : > { %v13312_v11 = vpop.f32.mrb[174].mxu1 }
 0x703   : > { %14173 = vst [vmem:[#allocation56_spill] sm:$0xff] %v13312_v11  ;;  %v6605_v20 = vpop.f32.mrb[175].mxu1  ;;  %8978 = vmatmul.mubr.msk.f32.gmra.mrb[24].mxu1 %vm5602_vm6, %v5433_v36  ;;  %v5448_v36 = vld [vmem:[%s13968_s5 + $0x730] sm:$0xff] }
 0x704   : > { %8980 = vmatprep.mubr.msk.f32.mxu1 %vm5602_vm6, %v5436_v47  ;;  %v5445_v20 = vld [vmem:[%s13968_s5 + $0x718] sm:$0xff] }
 0x706   : > { %v13322_v21 = vpop.f32.mrb[176].mxu1 }
 0x707   : > { %14174 = vst [vmem:[#allocation57_spill] sm:$0xff] %v13322_v21  ;;  %v6610_v19 = vpop.f32.mrb[177].mxu1  ;;  %8981 = vmatmul.mubr.msk.f32.gmra.mrb[26].mxu1 %vm5602_vm6, %v5439_v34  ;;  %v5451_v34 = vld [vmem:[%s13968_s5 + $0x748] sm:$0xff] }
 0x708   : > { %8983 = vmatprep.mubr.msk.f32.mxu1 %vm5602_vm6, %v5442_v52  ;;  %v5454_v52 = vld [vmem:[%s13968_s5 + $0x760] sm:$0xff] }
 0x70a   : > { %v13332_v47 = vpop.f32.mrb[178].mxu1 }
 0x70b   : > { %14175 = vst [vmem:[#allocation58_spill] sm:$0xff] %v13332_v47  ;;  %v6615_v11 = vpop.f32.mrb[179].mxu1  ;;  %8984 = vmatmul.mubr.msk.f32.gmra.mrb[28].mxu1 %vm5602_vm6, %v5445_v20  ;;  %v5460_v20 = vld [vmem:[%s13968_s5 + $0x790] sm:$0xff] }
 0x70c   : > { %8986 = vmatprep.mubr.msk.f32.mxu1 %vm5602_vm6, %v5448_v36  ;;  %v5457_v11 = vld [vmem:[%s13968_s5 + $0x778] sm:$0xff] }
 0x70e   : > { %v13342_v19 = vpop.f32.mrb[180].mxu1 }
 0x70f   : > { %14176 = vst [vmem:[#allocation59_spill] sm:$0xff] %v13342_v19  ;;  %v6620_v21 = vpop.f32.mrb[181].mxu1  ;;  %8987 = vmatmul.mubr.msk.f32.gmra.mrb[30].mxu1 %vm5602_vm6, %v5451_v34  ;;  %v5466_v34 = vld [vmem:[%s13968_s5 + $0x7c0] sm:$0xff] }
 0x710   : > { %8989 = vmatprep.mubr.msk.f32.mxu1 %vm5602_vm6, %v5454_v52  ;;  %v5463_v21 = vld [vmem:[%s13968_s5 + $0x7a8] sm:$0xff] }
 0x712   : > { %v13352_v36 = vpop.f32.mrb[182].mxu1 }
 0x713   : > { %14177 = vst [vmem:[#allocation60_spill] sm:$0xff] %v13352_v36  ;;  %v6625_v47 = vpop.f32.mrb[183].mxu1  ;;  %8990 = vmatmul.mubr.msk.f32.gmra.mrb[32].mxu1 %vm5602_vm6, %v5457_v11  ;;  %v5472_v11 = vld [vmem:[%s13968_s5 + $0x7f0] sm:$0xff] }
 0x714   : > { %8992 = vmatprep.mubr.msk.f32.mxu1 %vm5602_vm6, %v5460_v20  ;;  %v5469_v47 = vld [vmem:[%s13968_s5 + $0x7d8] sm:$0xff] }
 0x716   : > { %v13362_v52 = vpop.f32.mrb[184].mxu1 }
 0x717   : > { %14178 = vst [vmem:[#allocation61_spill] sm:$0xff] %v13362_v52  ;;  %v6630_v19 = vpop.f32.mrb[185].mxu1  ;;  %8993 = vmatmul.mubr.msk.f32.gmra.mrb[34].mxu1 %vm5602_vm6, %v5463_v21  ;;  %v5478_v21 = vld [vmem:[%s13968_s5 + $0x820] sm:$0xff] }
 0x718   : > { %8995 = vmatprep.mubr.msk.f32.mxu1 %vm5602_vm6, %v5466_v34  ;;  %v5475_v19 = vld [vmem:[%s13968_s5 + $0x808] sm:$0xff] }
 0x71a   : > { %v13372_v20 = vpop.f32.mrb[186].mxu1 }
 0x71b   : > { %14179 = vst [vmem:[#allocation62_spill] sm:$0xff] %v13372_v20  ;;  %v6635_v36 = vpop.f32.mrb[187].mxu1  ;;  %8996 = vmatmul.mubr.msk.f32.gmra.mrb[36].mxu1 %vm5602_vm6, %v5469_v47  ;;  %v5484_v47 = vld [vmem:[%s13968_s5 + $0x850] sm:$0xff] }
 0x71c   : > { %8998 = vmatprep.mubr.msk.f32.mxu1 %vm5602_vm6, %v5472_v11  ;;  %v5481_v36 = vld [vmem:[%s13968_s5 + $0x838] sm:$0xff] }
 0x71e   : > { %v13382_v34 = vpop.f32.mrb[188].mxu1 }
 0x71f   : > { %14180 = vst [vmem:[#allocation63_spill] sm:$0xff] %v13382_v34  ;;  %v6640_v52 = vpop.f32.mrb[189].mxu1  ;;  %8999 = vmatmul.mubr.msk.f32.gmra.mrb[38].mxu1 %vm5602_vm6, %v5475_v19  ;;  %v5490_v19 = vld [vmem:[%s13968_s5 + $0x880] sm:$0xff] }
 0x720   : > { %9001 = vmatprep.mubr.msk.f32.mxu1 %vm5602_vm6, %v5478_v21  ;;  %v5487_v52 = vld [vmem:[%s13968_s5 + $0x868] sm:$0xff] }
 0x722   : > { %v13392_v11 = vpop.f32.mrb[190].mxu1 }
 0x723   : > { %14181 = vst [vmem:[#allocation64_spill] sm:$0xff] %v13392_v11  ;;  %v6645_v20 = vpop.f32.mrb[191].mxu1  ;;  %9002 = vmatmul.mubr.msk.f32.gmra.mrb[40].mxu1 %vm5602_vm6, %v5481_v36  ;;  %v5496_v36 = vld [vmem:[%s13968_s5 + $0x8b0] sm:$0xff] }
 0x724   : > { %9004 = vmatprep.mubr.msk.f32.mxu1 %vm5602_vm6, %v5484_v47  ;;  %v5493_v20 = vld [vmem:[%s13968_s5 + $0x898] sm:$0xff] }
 0x726   : > { %v13402_v21 = vpop.f32.mrb[192].mxu1 }
 0x727   : > { %14182 = vst [vmem:[#allocation65_spill] sm:$0xff] %v13402_v21  ;;  %v6650_v34 = vpop.f32.mrb[193].mxu1  ;;  %9005 = vmatmul.mubr.msk.f32.gmra.mrb[42].mxu1 %vm5602_vm6, %v5487_v52  ;;  %v5502_v52 = vld [vmem:[%s13968_s5 + $0x8e0] sm:$0xff] }
 0x728   : > { %9007 = vmatprep.mubr.msk.f32.mxu1 %vm5602_vm6, %v5490_v19  ;;  %v5499_v34 = vld [vmem:[%s13968_s5 + $0x8c8] sm:$0xff] }
 0x72a   : > { %v13412_v47 = vpop.f32.mrb[194].mxu1 }
 0x72b   : > { %14183 = vst [vmem:[#allocation66_spill] sm:$0xff] %v13412_v47  ;;  %v6655_v11 = vpop.f32.mrb[195].mxu1  ;;  %9008 = vmatmul.mubr.msk.f32.gmra.mrb[44].mxu1 %vm5602_vm6, %v5493_v20  ;;  %v5508_v20 = vld [vmem:[%s13968_s5 + $0x910] sm:$0xff] }
 0x72c   : > { %9010 = vmatprep.mubr.msk.f32.mxu1 %vm5602_vm6, %v5496_v36  ;;  %v5505_v11 = vld [vmem:[%s13968_s5 + $0x8f8] sm:$0xff] }
 0x72e   : > { %v13422_v19 = vpop.f32.mrb[196].mxu1 }
 0x72f   : > { %14184 = vst [vmem:[#allocation67_spill] sm:$0xff] %v13422_v19  ;;  %v6660_v21 = vpop.f32.mrb[197].mxu1  ;;  %9011 = vmatmul.mubr.msk.f32.gmra.mrb[46].mxu1 %vm5602_vm6, %v5499_v34  ;;  %v5514_v34 = vld [vmem:[%s13968_s5 + $0x940] sm:$0xff] }
 0x730   : > { %9013 = vmatprep.mubr.msk.f32.mxu1 %vm5602_vm6, %v5502_v52  ;;  %v5511_v21 = vld [vmem:[%s13968_s5 + $0x928] sm:$0xff] }
 0x732   : > { %v13432_v36 = vpop.f32.mrb[198].mxu1 }
 0x733   : > { %14185 = vst [vmem:[#allocation68_spill] sm:$0xff] %v13432_v36  ;;  %v6665_v47 = vpop.f32.mrb[199].mxu1  ;;  %9014 = vmatmul.mubr.msk.f32.gmra.mrb[48].mxu1 %vm5602_vm6, %v5505_v11  ;;  %v5520_v11 = vld [vmem:[%s13968_s5 + $0x970] sm:$0xff] }
 0x734   : > { %9016 = vmatprep.mubr.msk.f32.mxu1 %vm5602_vm6, %v5508_v20  ;;  %v5517_v47 = vld [vmem:[%s13968_s5 + $0x958] sm:$0xff] }
 0x736   : > { %v13442_v52 = vpop.f32.mrb[200].mxu1 }
 0x737   : > { %14186 = vst [vmem:[#allocation69_spill] sm:$0xff] %v13442_v52  ;;  %v6670_v19 = vpop.f32.mrb[201].mxu1  ;;  %9017 = vmatmul.mubr.msk.f32.gmra.mrb[50].mxu1 %vm5602_vm6, %v5511_v21  ;;  %v5526_v21 = vld [vmem:[%s13968_s5 + $0x9a0] sm:$0xff] }
 0x738   : > { %9019 = vmatprep.mubr.msk.f32.mxu1 %vm5602_vm6, %v5514_v34  ;;  %v5523_v19 = vld [vmem:[%s13968_s5 + $0x988] sm:$0xff] }
 0x73a   : > { %v13452_v20 = vpop.f32.mrb[202].mxu1 }
 0x73b   : > { %14187 = vst [vmem:[#allocation70_spill] sm:$0xff] %v13452_v20  ;;  %v6675_v36 = vpop.f32.mrb[203].mxu1  ;;  %9020 = vmatmul.mubr.msk.f32.gmra.mrb[52].mxu1 %vm5602_vm6, %v5517_v47  ;;  %v5532_v47 = vld [vmem:[%s13968_s5 + $0x9d0] sm:$0xff] }
 0x73c   : > { %9022 = vmatprep.mubr.msk.f32.mxu1 %vm5602_vm6, %v5520_v11  ;;  %v5529_v36 = vld [vmem:[%s13968_s5 + $0x9b8] sm:$0xff] }
 0x73e   : > { %v13462_v34 = vpop.f32.mrb[204].mxu1 }
 0x73f   : > { %14188 = vst [vmem:[#allocation71_spill] sm:$0xff] %v13462_v34  ;;  %v6680_v52 = vpop.f32.mrb[205].mxu1  ;;  %9023 = vmatmul.mubr.msk.f32.gmra.mrb[54].mxu1 %vm5602_vm6, %v5523_v19  ;;  %v5538_v19 = vld [vmem:[%s13968_s5 + $0xa00] sm:$0xff] }
 0x740   : > { %9025 = vmatprep.mubr.msk.f32.mxu1 %vm5602_vm6, %v5526_v21  ;;  %v5535_v52 = vld [vmem:[%s13968_s5 + $0x9e8] sm:$0xff] }
 0x742   : > { %v13472_v11 = vpop.f32.mrb[206].mxu1 }
 0x743   : > { %14189 = vst [vmem:[#allocation72_spill] sm:$0xff] %v13472_v11  ;;  %v6685_v20 = vpop.f32.mrb[207].mxu1  ;;  %9026 = vmatmul.mubr.msk.f32.gmra.mrb[56].mxu1 %vm5602_vm6, %v5529_v36  ;;  %v5544_v36 = vld [vmem:[%s13968_s5 + $0xa30] sm:$0xff]  ;;  %v5547_v11 = vld [vmem:[%s13968_s5 + $0xa48] sm:$0xff] }
 0x744   : > { %9028 = vmatprep.mubr.msk.f32.mxu1 %vm5602_vm6, %v5532_v47  ;;  %v5541_v20 = vld [vmem:[%s13968_s5 + $0xa18] sm:$0xff] }
 0x746   : > { %v13482_v21 = vpop.f32.mrb[208].mxu1 }
 0x747   : > { %14190 = vst [vmem:[#allocation73_spill] sm:$0xff] %v13482_v21  ;;  %v6690_v34 = vpop.f32.mrb[209].mxu1  ;;  %9029 = vmatmul.mubr.msk.f32.gmra.mrb[58].mxu1 %vm5602_vm6, %v5535_v52  ;;  %v5550_v21 = vld [vmem:[%s13968_s5 + $0xa60] sm:$0xff] }
 0x748   : > { %9031 = vmatprep.mubr.msk.f32.mxu1 %vm5602_vm6, %v5538_v19 }
 0x74a   : > { %v8874_v34 = vpop.f32.mrb[210].mxu1 }
 0x74b   : > { %v6764_v47 = vadd.f32 %v8874_v34, %v13126_v30  ;;  %v6758_v52 = vpop.f32.mrb[211].mxu1  ;;  %9032 = vmatmul.mubr.msk.f32.gmra.mrb[60].mxu1 %vm5602_vm6, %v5541_v20 }
 0x74c   : > { %v6759_v19 = vadd.f32 %v6758_v52, %v13115_v4  ;;  %9034 = vmatprep.mubr.msk.f32.mxu1 %vm5602_vm6, %v5544_v36  ;;  %v5553_v36 = vld [vmem:[%s13968_s5 + $0xa78] sm:$0xff] }
 0x74d   : > { %7398 = vst.msk [vmem:[%s13496_s16 + $0x8] sm:$0xff] %vm573_vm0, %v6764_v47  ;;  %v5556_v47 = vld [vmem:[%s13968_s5 + $0xa90] sm:$0xff] }
 0x74e   : > { %7397 = vst.msk [vmem:[%s13496_s16] sm:$0xff] %vm573_vm0, %v6759_v19  ;;  %v8877_v30 = vpop.f32.mrb[212].mxu1  ;;  %v5562_v19 = vld [vmem:[%s13968_s5 + $0xac0] sm:$0xff] }
 0x74f   : > { %v6774_v20 = vadd.f32 %v8877_v30, %v13145_v51  ;;  %v6768_v34 = vpop.f32.mrb[213].mxu1  ;;  %9035 = vmatmul.mubr.msk.f32.gmra.mrb[62].mxu1 %vm5602_vm6, %v5547_v11 }
 0x750   : > { %v6769_v4 = vadd.f32 %v6768_v34, %v13138_v43  ;;  %9037 = vmatprep.mubr.msk.f32.mxu1 %vm5602_vm6, %v5550_v21  ;;  %v5559_v21 = vld [vmem:[%s13968_s5 + $0xaa8] sm:$0xff]  ;;  %v5565_v34 = vld [vmem:[%s13968_s5 + $0xad8] sm:$0xff] }
 0x751   : > { %7400 = vst.msk [vmem:[%s13496_s16 + $0x18] sm:$0xff] %vm573_vm0, %v6774_v20 }
 0x752   : > { %7399 = vst.msk [vmem:[%s13496_s16 + $0x10] sm:$0xff] %vm573_vm0, %v6769_v4  ;;  %v8880_v51 = vpop.f32.mrb[214].mxu1  ;;  %v5568_v4 = vld [vmem:[%s13968_s5 + $0xaf0] sm:$0xff] }
 0x753   : > { %v6784_v11 = vadd.f32 %v8880_v51, %v13159_v38  ;;  %v6778_v52 = vpop.f32.mrb[215].mxu1  ;;  %9038 = vmatmul.mubr.msk.f32.gmra.mrb[64].mxu1 %vm5602_vm6, %v5553_v36  ;;  %v5571_v51 = vld [vmem:[%s13968_s5 + $0xb08] sm:$0xff] }
 0x754   : > { %v6779_v43 = vadd.f32 %v6778_v52, %v13152_v41  ;;  %9040 = vmatprep.mubr.msk.f32.mxu1 %vm5602_vm6, %v5556_v47 }
 0x755   : > { %7402 = vst.msk [vmem:[%s13496_s16 + $0x28] sm:$0xff] %vm573_vm0, %v6784_v11  ;;  %v5574_v11 = vld [vmem:[%s13968_s5 + $0xb20] sm:$0xff] }
 0x756   : > { %7401 = vst.msk [vmem:[%s13496_s16 + $0x20] sm:$0xff] %vm573_vm0, %v6779_v43  ;;  %v8883_v38 = vpop.f32.mrb[216].mxu1 }
 0x757   : > { %v6794_v30 = vadd.f32 %v8883_v38, %v13173_v42  ;;  %v6788_v20 = vpop.f32.mrb[217].mxu1  ;;  %9041 = vmatmul.mubr.msk.f32.gmra.mrb[66].mxu1 %vm5602_vm6, %v5559_v21  ;;  %v5577_v21 = vld [vmem:[%s13968_s5 + $0xb38] sm:$0xff] }
 0x758   : > { %v6789_v41 = vadd.f32 %v6788_v20, %v13166_v55  ;;  %9043 = vmatprep.mubr.msk.f32.mxu1 %vm5602_vm6, %v5562_v19  ;;  %v5580_v19 = vld [vmem:[%s13968_s5 + $0xb50] sm:$0xff]  ;;  %v5583_v20 = vld [vmem:[%s13968_s5 + $0xb68] sm:$0xff] }
 0x759   : > { %7404 = vst.msk [vmem:[%s13496_s16 + $0x38] sm:$0xff] %vm573_vm0, %v6794_v30 }
 0x75a   : > { %7403 = vst.msk [vmem:[%s13496_s16 + $0x30] sm:$0xff] %vm573_vm0, %v6789_v41  ;;  %v8886_v42 = vpop.f32.mrb[218].mxu1  ;;  %v5586_v41 = vld [vmem:[%s13968_s5 + $0xb80] sm:$0xff] }
 0x75b   : > { %v6804_v36 = vadd.f32 %v8886_v42, %v13187_v8  ;;  %v6798_v47 = vpop.f32.mrb[219].mxu1  ;;  %9044 = vmatmul.mubr.msk.f32.gmra.mrb[68].mxu1 %vm5602_vm6, %v5565_v34  ;;  %v5589_v42 = vld [vmem:[%s13968_s5 + $0xb98] sm:$0xff] }
 0x75c   : > { %v6799_v55 = vadd.f32 %v6798_v47, %v13180_v22  ;;  %9046 = vmatprep.mubr.msk.f32.mxu1 %vm5602_vm6, %v5568_v4 }
 0x75d   : > { %7406 = vst.msk [vmem:[%s13496_s16 + $0x48] sm:$0xff] %vm573_vm0, %v6804_v36  ;;  %v5592_v36 = vld [vmem:[%s13968_s5 + $0xbb0] sm:$0xff] }
 0x75e   : > { %7405 = vst.msk [vmem:[%s13496_s16 + $0x40] sm:$0xff] %vm573_vm0, %v6799_v55  ;;  %v8889_v8 = vpop.f32.mrb[220].mxu1 }
 0x75f   : > { %v6814_v52 = vadd.f32 %v8889_v8, %v13201_v46  ;;  %v6808_v43 = vpop.f32.mrb[221].mxu1  ;;  %9047 = vmatmul.mubr.msk.f32.gmra.mrb[70].mxu1 %vm5602_vm6, %v5571_v51  ;;  %v5595_v51 = vld [vmem:[%s13968_s5 + $0xbc8] sm:$0xff] }
 0x760   : > { %v6809_v22 = vadd.f32 %v6808_v43, %v13194_v56  ;;  %9049 = vmatprep.mubr.msk.f32.mxu1 %vm5602_vm6, %v5574_v11  ;;  %v5598_v11 = vld [vmem:[%s13968_s5 + $0xbe0] sm:$0xff]  ;;  %v5601_v43 = vld [vmem:[%s13968_s5 + $0xbf8] sm:$0xff] }
 0x761   : > { %7408 = vst.msk [vmem:[%s13496_s16 + $0x58] sm:$0xff] %vm573_vm0, %v6814_v52 }
 0x762   : > { %7407 = vst.msk [vmem:[%s13496_s16 + $0x50] sm:$0xff] %vm573_vm0, %v6809_v22  ;;  %v8892_v46 = vpop.f32.mrb[222].mxu1 }
 0x763   : > { %v6824_v38 = vadd.f32 %v8892_v46, %v13215_v60  ;;  %v6818_v30 = vpop.f32.mrb[223].mxu1  ;;  %9050 = vmatmul.mubr.msk.f32.gmra.mrb[72].mxu1 %vm5602_vm6, %v5577_v21 }
 0x764   : > { %v6819_v56 = vadd.f32 %v6818_v30, %v13208_v7  ;;  %9052 = vmatprep.mubr.msk.f32.mxu1 %vm5602_vm6, %v5580_v19 }
 0x765   : > { %7410 = vst.msk [vmem:[%s13496_s16 + $0x68] sm:$0xff] %vm573_vm0, %v6824_v38 }
 0x766   : > { %7409 = vst.msk [vmem:[%s13496_s16 + $0x60] sm:$0xff] %vm573_vm0, %v6819_v56  ;;  %v8895_v60 = vpop.f32.mrb[224].mxu1 }
 0x767   : > { %v6834_v34 = vadd.f32 %v8895_v60, %v13229_v57  ;;  %v6828_v4 = vpop.f32.mrb[225].mxu1  ;;  %9053 = vmatmul.mubr.msk.f32.gmra.mrb[74].mxu1 %vm5602_vm6, %v5583_v20 }
 0x768   : > { %v6829_v7 = vadd.f32 %v6828_v4, %v13222_v27  ;;  %9055 = vmatprep.mubr.msk.f32.mxu1 %vm5602_vm6, %v5586_v41 }
 0x769   : > { %7412 = vst.msk [vmem:[%s13496_s16 + $0x78] sm:$0xff] %vm573_vm0, %v6834_v34 }
 0x76a   : > { %7411 = vst.msk [vmem:[%s13496_s16 + $0x70] sm:$0xff] %vm573_vm0, %v6829_v7  ;;  %v8898_v57 = vpop.f32.mrb[226].mxu1 }
 0x76b   : > { %v6844_v47 = vadd.f32 %v8898_v57, %v13243_v23  ;;  %v6838_v55 = vpop.f32.mrb[227].mxu1  ;;  %9056 = vmatmul.mubr.msk.f32.gmra.mrb[76].mxu1 %vm5602_vm6, %v5589_v42 }
 0x76c   : > { %v6839_v27 = vadd.f32 %v6838_v55, %v13236_v32  ;;  %9058 = vmatprep.mubr.msk.f32.mxu1 %vm5602_vm6, %v5592_v36 }
 0x76d   : > { %7414 = vst.msk [vmem:[%s13496_s16 + $0x88] sm:$0xff] %vm573_vm0, %v6844_v47 }
 0x76e   : > { %7413 = vst.msk [vmem:[%s13496_s16 + $0x80] sm:$0xff] %vm573_vm0, %v6839_v27  ;;  %v8901_v23 = vpop.f32.mrb[228].mxu1 }
 0x76f   : > { %v6854_v8 = vadd.f32 %v8901_v23, %v13257_v16  ;;  %v6848_v32 = vpop.f32.mrb[229].mxu1  ;;  %9059 = vmatmul.mubr.msk.f32.gmra.mrb[78].mxu1 %vm5602_vm6, %v5595_v51 }
 0x770   : > { %v6849_v52 = vadd.f32 %v6848_v32, %v13250_v39  ;;  %9061 = vmatprep.mubr.msk.f32.mxu1 %vm5602_vm6, %v5598_v11 }
 0x771   : > { %7416 = vst.msk [vmem:[%s13496_s16 + $0x98] sm:$0xff] %vm573_vm0, %v6854_v8 }
 0x772   : > { %7415 = vst.msk [vmem:[%s13496_s16 + $0x90] sm:$0xff] %vm573_vm0, %v6849_v52  ;;  %v8904_v22 = vpop.f32.mrb[230].mxu1 }
 0x773   : > { %v6864_v16 = vadd.f32 %v8904_v22, %v13271_v6  ;;  %v6858_v21 = vpop.f32.mrb[231].mxu1  ;;  %9062 = vmatmul.mubr.msk.f32.gmra.mrb[80].mxu1 %vm5602_vm6, %v5601_v43 }
 0x774   : > { %v6859_v39 = vadd.f32 %v6858_v21, %v13264_v48 }
 0x775   : > { %7418 = vst.msk [vmem:[%s13496_s16 + $0xa8] sm:$0xff] %vm573_vm0, %v6864_v16 }
 0x776   : > { %7417 = vst.msk [vmem:[%s13496_s16 + $0xa0] sm:$0xff] %vm573_vm0, %v6859_v39  ;;  %v8907_v19 = vpop.f32.mrb[232].mxu1 }
 0x777   : > { %v6874_v46 = vadd.f32 %v8907_v19, %v13285_v58  ;;  %v6868_v38 = vpop.f32.mrb[233].mxu1 }
 0x778   : > { %v6869_v30 = vadd.f32 %v6868_v38, %v13278_v14 }
 0x779   : > { %7420 = vst.msk [vmem:[%s13496_s16 + $0xb8] sm:$0xff] %vm573_vm0, %v6874_v46 }
 0x77a   : > { %7419 = vst.msk [vmem:[%s13496_s16 + $0xb0] sm:$0xff] %vm573_vm0, %v6869_v30  ;;  %v8910_v6 = vpop.f32.mrb[234].mxu1 }
 0x77b   : > { %v6884_v48 = vadd.f32 %v8910_v6, %v12361_v25  ;;  %v6878_v56 = vpop.f32.mrb[235].mxu1 }
 0x77c   : > { %v6879_v20 = vadd.f32 %v6878_v56, %v13300_v33 }
 0x77d   : > { %7422 = vst.msk [vmem:[%s13496_s16 + $0xc8] sm:$0xff] %vm573_vm0, %v6884_v48 }
 0x77e   : > { %7421 = vst.msk [vmem:[%s13496_s16 + $0xc0] sm:$0xff] %vm573_vm0, %v6879_v20  ;;  %v8913_v58 = vpop.f32.mrb[236].mxu1  ;;  %v14191_v20 = vld [vmem:[#allocation2_spill] sm:$0xff] }
 0x77f   : > { %v6894_v14 = vadd.f32 %v8913_v58, %v12377_v31  ;;  %v6888_v41 = vpop.f32.mrb[237].mxu1 }
 0x780   : > { %v6889_v60 = vadd.f32 %v6888_v41, %v12369_v29 }
 0x781   : > { %7424 = vst.msk [vmem:[%s13496_s16 + $0xd8] sm:$0xff] %vm573_vm0, %v6894_v14  ;;  %v14192_v14 = vld [vmem:[#allocation5_spill] sm:$0xff] }
 0x782   : > { %7423 = vst.msk [vmem:[%s13496_s16 + $0xd0] sm:$0xff] %vm573_vm0, %v6889_v60  ;;  %v8916_v25 = vpop.f32.mrb[238].mxu1  ;;  %v14193_v60 = vld [vmem:[#allocation3_spill] sm:$0xff] }
 0x783   : > { %v6904_v33 = vadd.f32 %v8916_v25, %v12393_v35  ;;  %v6898_v34 = vpop.f32.mrb[239].mxu1 }
 0x784   : > { %v6899_v4 = vadd.f32 %v6898_v34, %v12385_v0 }
 0x785   : > { %7426 = vst.msk [vmem:[%s13496_s16 + $0xe8] sm:$0xff] %vm573_vm0, %v6904_v33  ;;  %v14194_v33 = vld [vmem:[#allocation6_spill] sm:$0xff] }
 0x786   : > { %7425 = vst.msk [vmem:[%s13496_s16 + $0xe0] sm:$0xff] %vm573_vm0, %v6899_v4  ;;  %v8919_v31 = vpop.f32.mrb[240].mxu1 }
 0x787   : > { %v6914_v29 = vadd.f32 %v8919_v31, %v12409_v5  ;;  %v6908_v7 = vpop.f32.mrb[241].mxu1  ;;  %v14195_v31 = vld [vmem:[#allocation4_spill] sm:$0xff] }
 0x788   : > { %v6909_v42 = vadd.f32 %v6908_v7, %v12401_v10 }
 0x789   : > { %7428 = vst.msk [vmem:[%s13496_s16 + $0xf8] sm:$0xff] %vm573_vm0, %v6914_v29 }
 0x78a   : > { %7427 = vst.msk [vmem:[%s13496_s16 + $0xf0] sm:$0xff] %vm573_vm0, %v6909_v42  ;;  %v8922_v35 = vpop.f32.mrb[242].mxu1  ;;  %v14196_v42 = vld [vmem:[#allocation8_spill] sm:$0xff] }
 0x78b   : > { %v6924_v0 = vadd.f32 %v8922_v35, %v12437_v45  ;;  %v6918_v36 = vpop.f32.mrb[243].mxu1 }
 0x78c   : > { %v6919_v57 = vadd.f32 %v6918_v36, %v12423_v62  ;;  %v14197_v36 = vld [vmem:[#allocation7_spill] sm:$0xff] }
 0x78d   : > { %7430 = vst.msk [vmem:[%s13496_s16 + $0x108] sm:$0xff] %vm573_vm0, %v6924_v0 }
 0x78e   : > { %7429 = vst.msk [vmem:[%s13496_s16 + $0x100] sm:$0xff] %vm573_vm0, %v6919_v57  ;;  %v8925_v5 = vpop.f32.mrb[244].mxu1 }
 0x78f   : > { %v6934_v10 = vadd.f32 %v8925_v5, %v12465_v53  ;;  %v6928_v47 = vpop.f32.mrb[245].mxu1 }
 0x790   : > { %v6929_v55 = vadd.f32 %v6928_v47, %v12451_v50 }
 0x791   : > { %7432 = vst.msk [vmem:[%s13496_s16 + $0x118] sm:$0xff] %vm573_vm0, %v6934_v10  ;;  %v14198_v10 = vld [vmem:[#allocation10_spill] sm:$0xff] }
 0x792   : > { %7431 = vst.msk [vmem:[%s13496_s16 + $0x110] sm:$0xff] %vm573_vm0, %v6929_v55  ;;  %v8928_v45 = vpop.f32.mrb[246].mxu1 }
 0x793   : > { %v6944_v62 = vadd.f32 %v8928_v45, %v12493_v12  ;;  %v6938_v27 = vpop.f32.mrb[247].mxu1  ;;  %v14199_v45 = vld [vmem:[#allocation9_spill] sm:$0xff] }
 0x794   : > { %v6939_v51 = vadd.f32 %v6938_v27, %v12479_v1 }
 0x795   : > { %7434 = vst.msk [vmem:[%s13496_s16 + $0x128] sm:$0xff] %vm573_vm0, %v6944_v62 }
 0x796   : > { %7433 = vst.msk [vmem:[%s13496_s16 + $0x120] sm:$0xff] %vm573_vm0, %v6939_v51  ;;  %v8931_v53 = vpop.f32.mrb[248].mxu1  ;;  %v14200_v51 = vld [vmem:[#allocation12_spill] sm:$0xff] }
 0x797   : > { %v6954_v50 = vadd.f32 %v8931_v53, %v12521_v3  ;;  %v6948_v11 = vpop.f32.mrb[249].mxu1 }
 0x798   : > { %v6949_v23 = vadd.f32 %v6948_v11, %v12507_v17  ;;  %v14201_v11 = vld [vmem:[#allocation11_spill] sm:$0xff] }
 0x799   : > { %7436 = vst.msk [vmem:[%s13496_s16 + $0x138] sm:$0xff] %vm573_vm0, %v6954_v50 }
 0x79a   : > { %7435 = vst.msk [vmem:[%s13496_s16 + $0x130] sm:$0xff] %vm573_vm0, %v6949_v23  ;;  %v8934_v12 = vpop.f32.mrb[250].mxu1 }
 0x79b   : > { %v6964_v1 = vadd.f32 %v8934_v12, %v12549_v9  ;;  %v6958_v8 = vpop.f32.mrb[251].mxu1 }
 0x79c   : > { %v6959_v32 = vadd.f32 %v6958_v8, %v12535_v15 }
 0x79d   : > { %7438 = vst.msk [vmem:[%s13496_s16 + $0x148] sm:$0xff] %vm573_vm0, %v6964_v1  ;;  %v14202_v1 = vld [vmem:[#allocation14_spill] sm:$0xff] }
 0x79e   : > { %7437 = vst.msk [vmem:[%s13496_s16 + $0x140] sm:$0xff] %vm573_vm0, %v6959_v32  ;;  %v8937_v3 = vpop.f32.mrb[252].mxu1 }
 0x79f   : > { %v6974_v17 = vadd.f32 %v8937_v3, %v12577_v24  ;;  %v6968_v52 = vpop.f32.mrb[253].mxu1  ;;  %v14203_v3 = vld [vmem:[#allocation13_spill] sm:$0xff] }
 0x7a0   : > { %v6969_v43 = vadd.f32 %v6968_v52, %v12563_v44 }
 0x7a1   : > { %7440 = vst.msk [vmem:[%s13496_s16 + $0x158] sm:$0xff] %vm573_vm0, %v6974_v17 }
 0x7a2   : > { %7439 = vst.msk [vmem:[%s13496_s16 + $0x150] sm:$0xff] %vm573_vm0, %v6969_v43  ;;  %v8940_v9 = vpop.f32.mrb[254].mxu1  ;;  %v14204_v43 = vld [vmem:[#allocation16_spill] sm:$0xff] }
 0x7a3   : > { %v6984_v15 = vadd.f32 %v8940_v9, %v12605_v13  ;;  %v6978_v22 = vpop.f32.mrb[255].mxu1 }
 0x7a4   : > { %v6979_v16 = vadd.f32 %v6978_v22, %v12591_v18  ;;  %v14205_v22 = vld [vmem:[#allocation15_spill] sm:$0xff] }
 0x7a5   : > { %7442 = vst.msk [vmem:[%s13496_s16 + $0x168] sm:$0xff] %vm573_vm0, %v6984_v15 }
 0x7a6   : > { %7441 = vst.msk [vmem:[%s13496_s16 + $0x160] sm:$0xff] %vm573_vm0, %v6979_v16  ;;  %v8943_v24 = vpop.f32.mrb[0].mxu1 }
 0x7a7   : > { %v6994_v44 = vadd.f32 %v8943_v24, %v12633_v26  ;;  %v6988_v21 = vpop.f32.mrb[1].mxu1 }
 0x7a8   : > { %v6989_v39 = vadd.f32 %v6988_v21, %v12619_v37 }
 0x7a9   : > { %7444 = vst.msk [vmem:[%s13496_s16 + $0x178] sm:$0xff] %vm573_vm0, %v6994_v44  ;;  %v14206_v44 = vld [vmem:[#allocation18_spill] sm:$0xff] }
 0x7aa   : > { %7443 = vst.msk [vmem:[%s13496_s16 + $0x170] sm:$0xff] %vm573_vm0, %v6989_v39  ;;  %v8946_v13 = vpop.f32.mrb[2].mxu1 }
 0x7ab   : > { %v7004_v18 = vadd.f32 %v8946_v13, %v12661_v49  ;;  %v6998_v19 = vpop.f32.mrb[3].mxu1  ;;  %v14207_v13 = vld [vmem:[#allocation17_spill] sm:$0xff] }
 0x7ac   : > { %v6999_v46 = vadd.f32 %v6998_v19, %v12647_v40 }
 0x7ad   : > { %7446 = vst.msk [vmem:[%s13496_s16 + $0x188] sm:$0xff] %vm573_vm0, %v7004_v18 }
 0x7ae   : > { %7445 = vst.msk [vmem:[%s13496_s16 + $0x180] sm:$0xff] %vm573_vm0, %v6999_v46  ;;  %v8949_v26 = vpop.f32.mrb[4].mxu1  ;;  %v14208_v46 = vld [vmem:[#allocation20_spill] sm:$0xff] }
 0x7af   : > { %v7014_v37 = vadd.f32 %v8949_v26, %v12689_v28  ;;  %v7008_v38 = vpop.f32.mrb[5].mxu1 }
 0x7b0   : > { %v7009_v30 = vadd.f32 %v7008_v38, %v12675_v2  ;;  %v14209_v38 = vld [vmem:[#allocation19_spill] sm:$0xff] }
 0x7b1   : > { %7448 = vst.msk [vmem:[%s13496_s16 + $0x198] sm:$0xff] %vm573_vm0, %v7014_v37 }
 0x7b2   : > { %7447 = vst.msk [vmem:[%s13496_s16 + $0x190] sm:$0xff] %vm573_vm0, %v7009_v30  ;;  %v8952_v49 = vpop.f32.mrb[6].mxu1 }
 0x7b3   : > { %v7024_v40 = vadd.f32 %v8952_v49, %v12717_v54  ;;  %v7018_v6 = vpop.f32.mrb[7].mxu1 }
 0x7b4   : > { %v7019_v48 = vadd.f32 %v7018_v6, %v12703_v59 }
 0x7b5   : > { %7450 = vst.msk [vmem:[%s13496_s16 + $0x1a8] sm:$0xff] %vm573_vm0, %v7024_v40  ;;  %v14210_v40 = vld [vmem:[#allocation22_spill] sm:$0xff] }
 0x7b6   : > { %7449 = vst.msk [vmem:[%s13496_s16 + $0x1a0] sm:$0xff] %vm573_vm0, %v7019_v48  ;;  %v8955_v28 = vpop.f32.mrb[8].mxu1 }
 0x7b7   : > { %v7034_v2 = vadd.f32 %v8955_v28, %v12745_v61  ;;  %v7028_v56 = vpop.f32.mrb[9].mxu1  ;;  %v14211_v28 = vld [vmem:[#allocation21_spill] sm:$0xff] }
 0x7b8   : > { %v7029_v58 = vadd.f32 %v7028_v56, %v14191_v20  ;;  %v14212_v20 = vld [vmem:[#allocation24_spill] sm:$0xff] }
 0x7b9   : > { %7452 = vst.msk [vmem:[%s13496_s16 + $0x1b8] sm:$0xff] %vm573_vm0, %v7034_v2 }
 0x7ba   : > { %7451 = vst.msk [vmem:[%s13496_s16 + $0x1b0] sm:$0xff] %vm573_vm0, %v7029_v58  ;;  %v8958_v54 = vpop.f32.mrb[10].mxu1 }
 0x7bb   : > { %v7044_v59 = vadd.f32 %v8958_v54, %v14192_v14  ;;  %v7038_v41 = vpop.f32.mrb[11].mxu1  ;;  %v14213_v14 = vld [vmem:[#allocation23_spill] sm:$0xff] }
 0x7bc   : > { %v7039_v25 = vadd.f32 %v7038_v41, %v14193_v60  ;;  %v14214_v60 = vld [vmem:[#allocation26_spill] sm:$0xff] }
 0x7bd   : > { %7454 = vst.msk [vmem:[%s13496_s16 + $0x1c8] sm:$0xff] %vm573_vm0, %v7044_v59 }
 0x7be   : > { %7453 = vst.msk [vmem:[%s13496_s16 + $0x1c0] sm:$0xff] %vm573_vm0, %v7039_v25  ;;  %v8961_v61 = vpop.f32.mrb[12].mxu1 }
 0x7bf   : > { %v7054_v34 = vadd.f32 %v8961_v61, %v14194_v33  ;;  %v7048_v4 = vpop.f32.mrb[13].mxu1  ;;  %v14215_v33 = vld [vmem:[#allocation25_spill] sm:$0xff] }
 0x7c0   : > { %v7049_v29 = vadd.f32 %v7048_v4, %v14195_v31  ;;  %v14216_v31 = vld [vmem:[#allocation28_spill] sm:$0xff] }
 0x7c1   : > { %7456 = vst.msk [vmem:[%s13496_s16 + $0x1d8] sm:$0xff] %vm573_vm0, %v7054_v34 }
 0x7c2   : > { %7455 = vst.msk [vmem:[%s13496_s16 + $0x1d0] sm:$0xff] %vm573_vm0, %v7049_v29  ;;  %v8964_v7 = vpop.f32.mrb[14].mxu1 }
 0x7c3   : > { %v7064_v35 = vadd.f32 %v8964_v7, %v14196_v42  ;;  %v7058_v0 = vpop.f32.mrb[15].mxu1  ;;  %v14217_v42 = vld [vmem:[#allocation27_spill] sm:$0xff] }
 0x7c4   : > { %v7059_v57 = vadd.f32 %v7058_v0, %v14197_v36  ;;  %v14218_v36 = vld [vmem:[#allocation30_spill] sm:$0xff] }
 0x7c5   : > { %7458 = vst.msk [vmem:[%s13496_s16 + $0x1e8] sm:$0xff] %vm573_vm0, %v7064_v35 }
 0x7c6   : > { %7457 = vst.msk [vmem:[%s13496_s16 + $0x1e0] sm:$0xff] %vm573_vm0, %v7059_v57  ;;  %v8967_v5 = vpop.f32.mrb[16].mxu1 }
 0x7c7   : > { %v7074_v47 = vadd.f32 %v8967_v5, %v14198_v10  ;;  %v7068_v55 = vpop.f32.mrb[17].mxu1  ;;  %v14219_v10 = vld [vmem:[#allocation29_spill] sm:$0xff] }
 0x7c8   : > { %v7069_v62 = vadd.f32 %v7068_v55, %v14199_v45  ;;  %v14220_v45 = vld [vmem:[#allocation32_spill] sm:$0xff] }
 0x7c9   : > { %7460 = vst.msk [vmem:[%s13496_s16 + $0x1f8] sm:$0xff] %vm573_vm0, %v7074_v47 }
 0x7ca   : > { %7459 = vst.msk [vmem:[%s13496_s16 + $0x1f0] sm:$0xff] %vm573_vm0, %v7069_v62  ;;  %v8970_v27 = vpop.f32.mrb[18].mxu1 }
 0x7cb   : > { %v7084_v53 = vadd.f32 %v8970_v27, %v14200_v51  ;;  %v7078_v50 = vpop.f32.mrb[19].mxu1  ;;  %v14221_v51 = vld [vmem:[#allocation31_spill] sm:$0xff] }
 0x7cc   : > { %v7079_v23 = vadd.f32 %v7078_v50, %v14201_v11  ;;  %v14222_v11 = vld [vmem:[#allocation34_spill] sm:$0xff] }
 0x7cd   : > { %7462 = vst.msk [vmem:[%s13496_s16 + $0x208] sm:$0xff] %vm573_vm0, %v7084_v53 }
 0x7ce   : > { %7461 = vst.msk [vmem:[%s13496_s16 + $0x200] sm:$0xff] %vm573_vm0, %v7079_v23  ;;  %v8973_v12 = vpop.f32.mrb[20].mxu1 }
 0x7cf   : > { %v7094_v8 = vadd.f32 %v8973_v12, %v14202_v1  ;;  %v7088_v32 = vpop.f32.mrb[21].mxu1  ;;  %v14223_v1 = vld [vmem:[#allocation33_spill] sm:$0xff] }
 0x7d0   : > { %v7089_v17 = vadd.f32 %v7088_v32, %v14203_v3  ;;  %v14224_v3 = vld [vmem:[#allocation36_spill] sm:$0xff] }
 0x7d1   : > { %7464 = vst.msk [vmem:[%s13496_s16 + $0x218] sm:$0xff] %vm573_vm0, %v7094_v8 }
 0x7d2   : > { %7463 = vst.msk [vmem:[%s13496_s16 + $0x210] sm:$0xff] %vm573_vm0, %v7089_v17  ;;  %v8976_v52 = vpop.f32.mrb[22].mxu1 }
 0x7d3   : > { %v7104_v9 = vadd.f32 %v8976_v52, %v14204_v43  ;;  %v7098_v15 = vpop.f32.mrb[23].mxu1  ;;  %v14225_v43 = vld [vmem:[#allocation35_spill] sm:$0xff] }
 0x7d4   : > { %v7099_v16 = vadd.f32 %v7098_v15, %v14205_v22  ;;  %v14226_v22 = vld [vmem:[#allocation38_spill] sm:$0xff] }
 0x7d5   : > { %7466 = vst.msk [vmem:[%s13496_s16 + $0x228] sm:$0xff] %vm573_vm0, %v7104_v9 }
 0x7d6   : > { %7465 = vst.msk [vmem:[%s13496_s16 + $0x220] sm:$0xff] %vm573_vm0, %v7099_v16  ;;  %v8979_v24 = vpop.f32.mrb[24].mxu1 }
 0x7d7   : > { %v7114_v21 = vadd.f32 %v8979_v24, %v14206_v44  ;;  %v7108_v39 = vpop.f32.mrb[25].mxu1  ;;  %v14227_v44 = vld [vmem:[#allocation37_spill] sm:$0xff] }
 0x7d8   : > { %v7109_v18 = vadd.f32 %v7108_v39, %v14207_v13  ;;  %v14228_v13 = vld [vmem:[#allocation40_spill] sm:$0xff] }
 0x7d9   : > { %7468 = vst.msk [vmem:[%s13496_s16 + $0x238] sm:$0xff] %vm573_vm0, %v7114_v21 }
 0x7da   : > { %7467 = vst.msk [vmem:[%s13496_s16 + $0x230] sm:$0xff] %vm573_vm0, %v7109_v18  ;;  %v8982_v19 = vpop.f32.mrb[26].mxu1 }
 0x7db   : > { %v7124_v26 = vadd.f32 %v8982_v19, %v14208_v46  ;;  %v7118_v37 = vpop.f32.mrb[27].mxu1  ;;  %v14229_v46 = vld [vmem:[#allocation39_spill] sm:$0xff] }
 0x7dc   : > { %v7119_v30 = vadd.f32 %v7118_v37, %v14209_v38  ;;  %v14230_v38 = vld [vmem:[#allocation42_spill] sm:$0xff] }
 0x7dd   : > { %7470 = vst.msk [vmem:[%s13496_s16 + $0x248] sm:$0xff] %vm573_vm0, %v7124_v26 }
 0x7de   : > { %7469 = vst.msk [vmem:[%s13496_s16 + $0x240] sm:$0xff] %vm573_vm0, %v7119_v30  ;;  %v8985_v49 = vpop.f32.mrb[28].mxu1 }
 0x7df   : > { %v7134_v6 = vadd.f32 %v8985_v49, %v14210_v40  ;;  %v7128_v48 = vpop.f32.mrb[29].mxu1  ;;  %v14231_v40 = vld [vmem:[#allocation41_spill] sm:$0xff] }
 0x7e0   : > { %v7129_v2 = vadd.f32 %v7128_v48, %v14211_v28  ;;  %v14232_v28 = vld [vmem:[#allocation44_spill] sm:$0xff] }
 0x7e1   : > { %7472 = vst.msk [vmem:[%s13496_s16 + $0x258] sm:$0xff] %vm573_vm0, %v7134_v6 }
 0x7e2   : > { %7471 = vst.msk [vmem:[%s13496_s16 + $0x250] sm:$0xff] %vm573_vm0, %v7129_v2  ;;  %v8988_v56 = vpop.f32.mrb[30].mxu1 }
 0x7e3   : > { %v7144_v58 = vadd.f32 %v8988_v56, %v14212_v20  ;;  %v7138_v54 = vpop.f32.mrb[31].mxu1  ;;  %v14233_v20 = vld [vmem:[#allocation43_spill] sm:$0xff] }
 0x7e4   : > { %v7139_v59 = vadd.f32 %v7138_v54, %v14213_v14  ;;  %v14234_v14 = vld [vmem:[#allocation46_spill] sm:$0xff] }
 0x7e5   : > { %7474 = vst.msk [vmem:[%s13496_s16 + $0x268] sm:$0xff] %vm573_vm0, %v7144_v58 }
 0x7e6   : > { %7473 = vst.msk [vmem:[%s13496_s16 + $0x260] sm:$0xff] %vm573_vm0, %v7139_v59  ;;  %v8991_v41 = vpop.f32.mrb[32].mxu1 }
 0x7e7   : > { %v7154_v25 = vadd.f32 %v8991_v41, %v14214_v60  ;;  %v7148_v61 = vpop.f32.mrb[33].mxu1  ;;  %v14235_v60 = vld [vmem:[#allocation45_spill] sm:$0xff] }
 0x7e8   : > { %v7149_v34 = vadd.f32 %v7148_v61, %v14215_v33  ;;  %v14236_v33 = vld [vmem:[#allocation48_spill] sm:$0xff] }
 0x7e9   : > { %7476 = vst.msk [vmem:[%s13496_s16 + $0x278] sm:$0xff] %vm573_vm0, %v7154_v25 }
 0x7ea   : > { %7475 = vst.msk [vmem:[%s13496_s16 + $0x270] sm:$0xff] %vm573_vm0, %v7149_v34  ;;  %v8994_v4 = vpop.f32.mrb[34].mxu1 }
 0x7eb   : > { %v7164_v29 = vadd.f32 %v8994_v4, %v14216_v31  ;;  %v7158_v7 = vpop.f32.mrb[35].mxu1  ;;  %v14237_v31 = vld [vmem:[#allocation47_spill] sm:$0xff] }
 0x7ec   : > { %v7159_v35 = vadd.f32 %v7158_v7, %v14217_v42  ;;  %v14238_v42 = vld [vmem:[#allocation50_spill] sm:$0xff] }
 0x7ed   : > { %7478 = vst.msk [vmem:[%s13496_s16 + $0x288] sm:$0xff] %vm573_vm0, %v7164_v29 }
 0x7ee   : > { %7477 = vst.msk [vmem:[%s13496_s16 + $0x280] sm:$0xff] %vm573_vm0, %v7159_v35  ;;  %v8997_v0 = vpop.f32.mrb[36].mxu1 }
 0x7ef   : > { %v7174_v57 = vadd.f32 %v8997_v0, %v14218_v36  ;;  %v7168_v5 = vpop.f32.mrb[37].mxu1  ;;  %v14239_v36 = vld [vmem:[#allocation49_spill] sm:$0xff] }
 0x7f0   : > { %v7169_v47 = vadd.f32 %v7168_v5, %v14219_v10  ;;  %v14240_v10 = vld [vmem:[#allocation52_spill] sm:$0xff] }
 0x7f1   : > { %7480 = vst.msk [vmem:[%s13496_s16 + $0x298] sm:$0xff] %vm573_vm0, %v7174_v57 }
 0x7f2   : > { %7479 = vst.msk [vmem:[%s13496_s16 + $0x290] sm:$0xff] %vm573_vm0, %v7169_v47  ;;  %v9000_v55 = vpop.f32.mrb[38].mxu1 }
 0x7f3   : > { %v7184_v62 = vadd.f32 %v9000_v55, %v14220_v45  ;;  %v7178_v27 = vpop.f32.mrb[39].mxu1  ;;  %v14241_v45 = vld [vmem:[#allocation51_spill] sm:$0xff] }
 0x7f4   : > { %v7179_v53 = vadd.f32 %v7178_v27, %v14221_v51  ;;  %v14242_v51 = vld [vmem:[#allocation54_spill] sm:$0xff] }
 0x7f5   : > { %7482 = vst.msk [vmem:[%s13496_s16 + $0x2a8] sm:$0xff] %vm573_vm0, %v7184_v62 }
 0x7f6   : > { %7481 = vst.msk [vmem:[%s13496_s16 + $0x2a0] sm:$0xff] %vm573_vm0, %v7179_v53  ;;  %v9003_v50 = vpop.f32.mrb[40].mxu1 }
 0x7f7   : > { %v7194_v23 = vadd.f32 %v9003_v50, %v14222_v11  ;;  %v7188_v12 = vpop.f32.mrb[41].mxu1  ;;  %v14243_v11 = vld [vmem:[#allocation53_spill] sm:$0xff] }
 0x7f8   : > { %v7189_v8 = vadd.f32 %v7188_v12, %v14223_v1 }
 0x7f9   : > { %7484 = vst.msk [vmem:[%s13496_s16 + $0x2b8] sm:$0xff] %vm573_vm0, %v7194_v23 }
 0x7fa   : > { %7483 = vst.msk [vmem:[%s13496_s16 + $0x2b0] sm:$0xff] %vm573_vm0, %v7189_v8  ;;  %v9006_v32 = vpop.f32.mrb[42].mxu1 }
 0x7fb   : > { %v7204_v17 = vadd.f32 %v9006_v32, %v14224_v3  ;;  %v7198_v52 = vpop.f32.mrb[43].mxu1  ;;  %v14244_v32 = vld [vmem:[#allocation55_spill] sm:$0xff] }
 0x7fc   : > { %v7199_v9 = vadd.f32 %v7198_v52, %v14225_v43  ;;  %v14245_v52 = vld [vmem:[#allocation57_spill] sm:$0xff] }
 0x7fd   : > { %7486 = vst.msk [vmem:[%s13496_s16 + $0x2c8] sm:$0xff] %vm573_vm0, %v7204_v17 }
 0x7fe   : > { %7485 = vst.msk [vmem:[%s13496_s16 + $0x2c0] sm:$0xff] %vm573_vm0, %v7199_v9  ;;  %v9009_v15 = vpop.f32.mrb[44].mxu1 }
 0x7ff   : > { %v7214_v16 = vadd.f32 %v9009_v15, %v14226_v22  ;;  %v7208_v24 = vpop.f32.mrb[45].mxu1  ;;  %v14246_v15 = vld [vmem:[#allocation56_spill] sm:$0xff] }
 0x800   : > { %v7209_v21 = vadd.f32 %v7208_v24, %v14227_v44 }
 0x801   : > { %7488 = vst.msk [vmem:[%s13496_s16 + $0x2d8] sm:$0xff] %vm573_vm0, %v7214_v16  ;;  %v14247_v16 = vld [vmem:[#allocation59_spill] sm:$0xff] }
 0x802   : > { %7487 = vst.msk [vmem:[%s13496_s16 + $0x2d0] sm:$0xff] %vm573_vm0, %v7209_v21  ;;  %v9012_v39 = vpop.f32.mrb[46].mxu1  ;;  %v14248_v21 = vld [vmem:[#allocation58_spill] sm:$0xff] }
 0x803   : > { %v7224_v18 = vadd.f32 %v9012_v39, %v14228_v13  ;;  %v7218_v19 = vpop.f32.mrb[47].mxu1 }
 0x804   : > { %v7219_v26 = vadd.f32 %v7218_v19, %v14229_v46 }
 0x805   : > { %7490 = vst.msk [vmem:[%s13496_s16 + $0x2e8] sm:$0xff] %vm573_vm0, %v7224_v18  ;;  %v14249_v18 = vld [vmem:[#allocation61_spill] sm:$0xff] }
 0x806   : > { %7489 = vst.msk [vmem:[%s13496_s16 + $0x2e0] sm:$0xff] %vm573_vm0, %v7219_v26  ;;  %v9015_v37 = vpop.f32.mrb[48].mxu1  ;;  %v14250_v26 = vld [vmem:[#allocation60_spill] sm:$0xff] }
 0x807   : > { %v7234_v30 = vadd.f32 %v9015_v37, %v14230_v38  ;;  %v7228_v49 = vpop.f32.mrb[49].mxu1 }
 0x808   : > { %v7229_v6 = vadd.f32 %v7228_v49, %v14231_v40 }
 0x809   : > { %7492 = vst.msk [vmem:[%s13496_s16 + $0x2f8] sm:$0xff] %vm573_vm0, %v7234_v30  ;;  %v14251_v30 = vld [vmem:[#allocation63_spill] sm:$0xff] }
 0x80a   : > { %7491 = vst.msk [vmem:[%s13496_s16 + $0x2f0] sm:$0xff] %vm573_vm0, %v7229_v6  ;;  %v9018_v48 = vpop.f32.mrb[50].mxu1  ;;  %v14252_v6 = vld [vmem:[#allocation62_spill] sm:$0xff] }
 0x80b   : > { %v7244_v2 = vadd.f32 %v9018_v48, %v14232_v28  ;;  %v7238_v56 = vpop.f32.mrb[51].mxu1 }
 0x80c   : > { %v7239_v58 = vadd.f32 %v7238_v56, %v14233_v20 }
 0x80d   : > { %7494 = vst.msk [vmem:[%s13496_s16 + $0x308] sm:$0xff] %vm573_vm0, %v7244_v2  ;;  %v14253_v2 = vld [vmem:[#allocation65_spill] sm:$0xff] }
 0x80e   : > { %7493 = vst.msk [vmem:[%s13496_s16 + $0x300] sm:$0xff] %vm573_vm0, %v7239_v58  ;;  %v9021_v54 = vpop.f32.mrb[52].mxu1  ;;  %v14254_v58 = vld [vmem:[#allocation64_spill] sm:$0xff] }
 0x80f   : > { %v7254_v59 = vadd.f32 %v9021_v54, %v14234_v14  ;;  %v7248_v41 = vpop.f32.mrb[53].mxu1 }
 0x810   : > { %v7249_v25 = vadd.f32 %v7248_v41, %v14235_v60 }
 0x811   : > { %7496 = vst.msk [vmem:[%s13496_s16 + $0x318] sm:$0xff] %vm573_vm0, %v7254_v59  ;;  %v14255_v59 = vld [vmem:[#allocation67_spill] sm:$0xff] }
 0x812   : > { %7495 = vst.msk [vmem:[%s13496_s16 + $0x310] sm:$0xff] %vm573_vm0, %v7249_v25  ;;  %v9024_v61 = vpop.f32.mrb[54].mxu1  ;;  %v14256_v25 = vld [vmem:[#allocation66_spill] sm:$0xff] }
 0x813   : > { %v7264_v34 = vadd.f32 %v9024_v61, %v14236_v33  ;;  %v7258_v4 = vpop.f32.mrb[55].mxu1 }
 0x814   : > { %v7259_v29 = vadd.f32 %v7258_v4, %v14237_v31 }
 0x815   : > { %7498 = vst.msk [vmem:[%s13496_s16 + $0x328] sm:$0xff] %vm573_vm0, %v7264_v34  ;;  %v14257_v34 = vld [vmem:[#allocation69_spill] sm:$0xff] }
 0x816   : > { %7497 = vst.msk [vmem:[%s13496_s16 + $0x320] sm:$0xff] %vm573_vm0, %v7259_v29  ;;  %v9027_v7 = vpop.f32.mrb[56].mxu1  ;;  %v14258_v29 = vld [vmem:[#allocation68_spill] sm:$0xff] }
 0x817   : > { %v7274_v35 = vadd.f32 %v9027_v7, %v14238_v42  ;;  %v7268_v0 = vpop.f32.mrb[57].mxu1 }
 0x818   : > { %v7269_v57 = vadd.f32 %v7268_v0, %v14239_v36 }
 0x819   : > { %7500 = vst.msk [vmem:[%s13496_s16 + $0x338] sm:$0xff] %vm573_vm0, %v7274_v35  ;;  %v14259_v35 = vld [vmem:[#allocation71_spill] sm:$0xff] }
 0x81a   : > { %7499 = vst.msk [vmem:[%s13496_s16 + $0x330] sm:$0xff] %vm573_vm0, %v7269_v57  ;;  %v9030_v5 = vpop.f32.mrb[58].mxu1  ;;  %v14260_v57 = vld [vmem:[#allocation70_spill] sm:$0xff] }
 0x81b   : > { %v7284_v47 = vadd.f32 %v9030_v5, %v14240_v10  ;;  %v7278_v55 = vpop.f32.mrb[59].mxu1 }
 0x81c   : > { %v7279_v62 = vadd.f32 %v7278_v55, %v14241_v45 }
 0x81d   : > { %7502 = vst.msk [vmem:[%s13496_s16 + $0x348] sm:$0xff] %vm573_vm0, %v7284_v47  ;;  %v14261_v47 = vld [vmem:[#allocation73_spill] sm:$0xff] }
 0x81e   : > { %7501 = vst.msk [vmem:[%s13496_s16 + $0x340] sm:$0xff] %vm573_vm0, %v7279_v62  ;;  %v9033_v27 = vpop.f32.mrb[60].mxu1  ;;  %v14262_v62 = vld [vmem:[#allocation72_spill] sm:$0xff] }
 0x81f   : > { %v7294_v53 = vadd.f32 %v9033_v27, %v14242_v51  ;;  %v7288_v50 = vpop.f32.mrb[61].mxu1 }
 0x820   : > { %v7289_v23 = vadd.f32 %v7288_v50, %v14243_v11 }
 0x821   : > { %7504 = vst.msk [vmem:[%s13496_s16 + $0x358] sm:$0xff] %vm573_vm0, %v7294_v53 }
 0x822   : > { %7503 = vst.msk [vmem:[%s13496_s16 + $0x350] sm:$0xff] %vm573_vm0, %v7289_v23  ;;  %v9036_v12 = vpop.f32.mrb[62].mxu1 }
 0x823   : > { %v7304_v1 = vadd.f32 %v9036_v12, %v13302_v63  ;;  %v7298_v8 = vpop.f32.mrb[63].mxu1 }
 0x824   : > { %v7299_v3 = vadd.f32 %v7298_v8, %v14244_v32 }
 0x825   : > { %7506 = vst.msk [vmem:[%s13496_s16 + $0x368] sm:$0xff] %vm573_vm0, %v7304_v1 }
 0x826   : > { %7505 = vst.msk [vmem:[%s13496_s16 + $0x360] sm:$0xff] %vm573_vm0, %v7299_v3  ;;  %v9039_v17 = vpop.f32.mrb[64].mxu1 }
 0x827   : > { %v7314_v43 = vadd.f32 %v9039_v17, %v14245_v52  ;;  %v7308_v9 = vpop.f32.mrb[65].mxu1 }
 0x828   : > { %v7309_v22 = vadd.f32 %v7308_v9, %v14246_v15 }
 0x829   : > { %7508 = vst.msk [vmem:[%s13496_s16 + $0x378] sm:$0xff] %vm573_vm0, %v7314_v43 }
 0x82a   : > { %7507 = vst.msk [vmem:[%s13496_s16 + $0x370] sm:$0xff] %vm573_vm0, %v7309_v22  ;;  %v9042_v63 = vpop.f32.mrb[66].mxu1 }
 0x82b   : > { %v7324_v24 = vadd.f32 %v9042_v63, %v14247_v16  ;;  %v7318_v44 = vpop.f32.mrb[67].mxu1 }
 0x82c   : > { %v7319_v39 = vadd.f32 %v7318_v44, %v14248_v21 }
 0x82d   : > { %7510 = vst.msk [vmem:[%s13496_s16 + $0x388] sm:$0xff] %vm573_vm0, %v7324_v24 }
 0x82e   : > { %7509 = vst.msk [vmem:[%s13496_s16 + $0x380] sm:$0xff] %vm573_vm0, %v7319_v39  ;;  %v9045_v13 = vpop.f32.mrb[68].mxu1 }
 0x82f   : > { %v7334_v19 = vadd.f32 %v9045_v13, %v14249_v18  ;;  %v7328_v46 = vpop.f32.mrb[69].mxu1 }
 0x830   : > { %v7329_v37 = vadd.f32 %v7328_v46, %v14250_v26 }
 0x831   : > { %7512 = vst.msk [vmem:[%s13496_s16 + $0x398] sm:$0xff] %vm573_vm0, %v7334_v19 }
 0x832   : > { %7511 = vst.msk [vmem:[%s13496_s16 + $0x390] sm:$0xff] %vm573_vm0, %v7329_v37  ;;  %v9048_v38 = vpop.f32.mrb[70].mxu1 }
 0x833   : > { %v7344_v49 = vadd.f32 %v9048_v38, %v14251_v30  ;;  %v7338_v40 = vpop.f32.mrb[71].mxu1 }
 0x834   : > { %v7339_v48 = vadd.f32 %v7338_v40, %v14252_v6 }
 0x835   : > { %7514 = vst.msk [vmem:[%s13496_s16 + $0x3a8] sm:$0xff] %vm573_vm0, %v7344_v49 }
 0x836   : > { %7513 = vst.msk [vmem:[%s13496_s16 + $0x3a0] sm:$0xff] %vm573_vm0, %v7339_v48  ;;  %v9051_v28 = vpop.f32.mrb[72].mxu1 }
 0x837   : > { %v7354_v56 = vadd.f32 %v9051_v28, %v14253_v2  ;;  %v7348_v20 = vpop.f32.mrb[73].mxu1 }
 0x838   : > { %v7349_v54 = vadd.f32 %v7348_v20, %v14254_v58 }
 0x839   : > { %7516 = vst.msk [vmem:[%s13496_s16 + $0x3b8] sm:$0xff] %vm573_vm0, %v7354_v56 }
 0x83a   : > { %7515 = vst.msk [vmem:[%s13496_s16 + $0x3b0] sm:$0xff] %vm573_vm0, %v7349_v54  ;;  %v9054_v14 = vpop.f32.mrb[74].mxu1 }
 0x83b   : > { %v7364_v41 = vadd.f32 %v9054_v14, %v14255_v59  ;;  %v7358_v60 = vpop.f32.mrb[75].mxu1 }
 0x83c   : > { %v7359_v61 = vadd.f32 %v7358_v60, %v14256_v25 }
 0x83d   : > { %7518 = vst.msk [vmem:[%s13496_s16 + $0x3c8] sm:$0xff] %vm573_vm0, %v7364_v41 }
 0x83e   : > { %7517 = vst.msk [vmem:[%s13496_s16 + $0x3c0] sm:$0xff] %vm573_vm0, %v7359_v61  ;;  %v9057_v33 = vpop.f32.mrb[76].mxu1 }
 0x83f   : > { %v7374_v4 = vadd.f32 %v9057_v33, %v14257_v34  ;;  %v7368_v31 = vpop.f32.mrb[77].mxu1 }
 0x840   : > { %v7369_v7 = vadd.f32 %v7368_v31, %v14258_v29 }
 0x841   : > { %7520 = vst.msk [vmem:[%s13496_s16 + $0x3d8] sm:$0xff] %vm573_vm0, %v7374_v4 }
 0x842   : > { %7519 = vst.msk [vmem:[%s13496_s16 + $0x3d0] sm:$0xff] %vm573_vm0, %v7369_v7  ;;  %v9060_v42 = vpop.f32.mrb[78].mxu1 }
 0x843   : > { %v7384_v0 = vadd.f32 %v9060_v42, %v14259_v35  ;;  %v7378_v36 = vpop.f32.mrb[79].mxu1 }
 0x844   : > { %v7379_v5 = vadd.f32 %v7378_v36, %v14260_v57 }
 0x845   : > { %7522 = vst.msk [vmem:[%s13496_s16 + $0x3e8] sm:$0xff] %vm573_vm0, %v7384_v0 }
 0x846   : > { %7521 = vst.msk [vmem:[%s13496_s16 + $0x3e0] sm:$0xff] %vm573_vm0, %v7379_v5  ;;  %v9063_v10 = vpop.f32.mrb[80].mxu1 }
 0x847   : > { %v7394_v55 = vadd.f32 %v9063_v10, %v14261_v47  ;;  %v7388_v45 = vpop.f32.mrb[81].mxu1 }
 0x848   : > { %v7389_v27 = vadd.f32 %v7388_v45, %v14262_v62 }
 0x849   : > { %7524 = vst.msk [vmem:[%s13496_s16 + $0x3f8] sm:$0xff] %vm573_vm0, %v7394_v55 }
 0x84a   : > { %7523 = vst.msk [vmem:[%s13496_s16 + $0x3f0] sm:$0xff] %vm573_vm0, %v7389_v27 }
 0x84b PF: > { %s16_s21 = sadd.s32 1, %s9654_s21  }
 0x84c   : > { %p13_p4 = scmp.ge.s32.totalorder %s16_s21, 4  }
 0x84e   :  { %15 = sbr.rel (!%p13_p4) target bundleno = 1 (0x1), region = 82 }

</bundles_post_ra>
